<compile_context>
chip_gen: v6e
topology: v6e:2x2x1
jax: 0.10.0
libtpu: 0.0.40
codegen_flags: <defaults>
</compile_context>

<pallas_src>
import functools
import math

import jax
import jax.numpy as jnp
from jax.experimental import pallas as pl
from jax.experimental.pallas import tpu as pltpu

# ---------------- config (small shapes consistent with the module) -----------
C_IN = 16        # c_in   (input sentence-embedding dim)
C_HID = 32       # c_hid  (model dim)
E_HID = 64       # e_hid  (FFN hidden dim)
N_HEAD = 4
NUM_LAYERS = 2
N_POSTS = 8      # num_posts / max_len
BATCH = 2
LRELU_SLOPE = 0.01   # torch nn.LeakyReLU default
LN_EPS = 1e-5        # torch nn.LayerNorm default
SLAB_LANES = 128     # lane width of the packed small-operand slab
OUT_LANES = 128      # lane width of the packed output


def _slab_rows():
    """Row layout of the packed small-operand slab (all rows 128 lanes)."""
    rows, off = {}, 0

    def take(name, n):
        nonlocal off
        rows[name] = off
        off += n

    total_layers = 2 * NUM_LAYERS
    take("emb", C_IN)            # embed_w                  (C_IN, C_HID)
    take("gw", C_HID)            # gate_w                   (C_HID, C_HID)
    take("fcw", C_HID)           # fc_w                     (C_HID, C_IN)
    take("clsw", C_HID)          # [cls_all_w | cls_com_w]  (C_HID, 4)
    take("bqkv", total_layers)   # fused qkv bias per layer (1, 3*C_HID)
    take("b1", total_layers)     # ffn bias-1 per layer     (1, E_HID)
    take("vecs", 6 * total_layers)  # per layer: bo,b2,g1,be1,g2,be2 (1, C_HID)
    take("paw", 2)               # post-attn W rows [W[:D], W[D:]]
    take("gb", 1)                # gate_b
    take("clsb", 1)              # [cls_all_b | cls_com_b]  (1, 4)
    take("ainv", N_POSTS)        # attn_inverse, one row per post (lane 0)
    take("fcln", 2)              # fc LayerNorm gamma / beta (1, C_IN)
    rows["total"] = ((off + 7) // 8) * 8
    return rows


_ROWS = _slab_rows()


# ---------------- fused kernel ------------------------------------------------

def _mcsfd_kernel(x_ref, a_ref, wqkv_ref, wo_ref, w1_ref, w2_ref, vec_ref,
                  out_ref, *, n_head):
    f32 = jnp.float32
    B, N, Cin = x_ref.shape
    D = wqkv_ref.shape[1]
    E = w1_ref.shape[2]
    BN = B * N
    dh = D // n_head
    n_layers = wqkv_ref.shape[0] // 2     # first half = encoder, second = decoder
    R = _ROWS
    assert Cin + 3 * D + 4 <= OUT_LANES   # output packing fits one lane tile

    def vrow(row, width):                 # (1, width) static slab-row load
        return vec_ref[row:row + 1, 0:width]

    # ---- sentence_embedding: Linear(c_in, c_hid, bias=False) + LeakyReLU ----
    x2 = x_ref[...].reshape(BN, Cin)
    y = jnp.dot(x2, vec_ref[R["emb"]:R["emb"] + Cin, 0:D],
                preferred_element_type=f32)
    y = jnp.where(y > 0, y, LRELU_SLOPE * y)

    # mask_nonzero is computed on the *embedded* activations, exactly as the
    # reference does: `x = self.embedding(x); mask_nonzero = nonzero(x.sum(-1))`.
    nz = (jnp.sum(y, axis=-1, keepdims=True) != 0.0).astype(f32)      # (BN, 1)

    # Additive attention mask from A, replicated over heads (z = h*B + b).
    # TODO(synk): TransformerEncoder/Decoder bodies are not in the reference
    # source; a standard post-LN MHA+FFN layer with A as attention mask is used
    # (dropout off; mask_nonzero's exact in-layer usage is unknown).
    mask_b = jnp.where(a_ref[...] > 0, 0.0, -1e9).astype(f32)         # (B, N, N)
    mask_z = jnp.concatenate([mask_b] * n_head, axis=0)               # (H*B, N, N)

    def layer_norm(v, g, b):
        mu = jnp.mean(v, axis=-1, keepdims=True)
        var = jnp.mean((v - mu) ** 2, axis=-1, keepdims=True)
        return (v - mu) * jax.lax.rsqrt(var + LN_EPS) * g + b

    def layer(h2d, l):
        vb = R["vecs"] + 6 * l
        # Fused QKV projection (Wq / bq pre-scaled by 1/sqrt(dh) at pack time).
        qkv = (jnp.dot(h2d, wqkv_ref[l], preferred_element_type=f32)
               + vrow(R["bqkv"] + l, 3 * D)).reshape(B, N, 3 * D)
        # Merge (head, batch) into one batch dim so score/context are single
        # batched einsums and there is ONE softmax per layer.
        q = jnp.concatenate(
            [qkv[:, :, h * dh:(h + 1) * dh] for h in range(n_head)], axis=0)
        k = jnp.concatenate(
            [qkv[:, :, D + h * dh:D + (h + 1) * dh] for h in range(n_head)], axis=0)
        v = jnp.concatenate(
            [qkv[:, :, 2 * D + h * dh:2 * D + (h + 1) * dh] for h in range(n_head)],
            axis=0)                                                   # (H*B, N, dh)
        s = jnp.einsum('znd,zmd->znm', q, k, preferred_element_type=f32) + mask_z
        s = s - jnp.max(s, axis=-1, keepdims=True)
        p = jnp.exp(s)
        p = p / jnp.sum(p, axis=-1, keepdims=True)
        ctx = jnp.einsum('znm,zmd->znd', p, v, preferred_element_type=f32)
        # Reassemble heads along lanes, then ONE output-projection matmul.
        ctx2 = jnp.concatenate(
            [ctx[h * B:(h + 1) * B].reshape(BN, dh) for h in range(n_head)], axis=-1)
        attn_out = (jnp.dot(ctx2, wo_ref[l], preferred_element_type=f32)
                    + vrow(vb, D))                                    # + bo
        h1 = layer_norm(h2d + attn_out, vrow(vb + 2, D), vrow(vb + 3, D))
        ff = jnp.dot(h1, w1_ref[l], preferred_element_type=f32) + vrow(R["b1"] + l, E)
        ff = jnp.maximum(ff, 0.0)
        ff = jnp.dot(ff, w2_ref[l], preferred_element_type=f32) + vrow(vb + 1, D)
        return layer_norm(h1 + ff, vrow(vb + 4, D), vrow(vb + 5, D))

    # ---- Extractor: TransformerEncoder --------------------------------------
    h = y
    for l in range(n_layers):
        h = layer(h, l)

    # ---- Post_Attn -----------------------------------------------------------
    h3 = h.reshape(B, N, D)
    nz3 = nz.reshape(B, N, 1)
    root = nz3 * h3[:, 0:1, :]                 # root[b, r, :] = h[b, 0, :] on nonzero rows
    # cat([h, root], -1) @ W == sum(h*W[:D]) + sum(root*W[D:])
    logits = (jnp.sum(h3 * vrow(R["paw"], D), axis=-1, keepdims=True)
              + jnp.sum(root * vrow(R["paw"] + 1, D), axis=-1, keepdims=True))
    # Faithful to the reference: attn.masked_fill_(attn == 0, -1e20)
    logits = jnp.where(logits == 0.0, -1e20, logits)
    m = jnp.max(logits, axis=1, keepdims=True)
    pp = jnp.exp(logits - m)
    attn = pp / jnp.sum(pp, axis=1, keepdims=True)                    # (B, N, 1)
    xf = jnp.sum(h3 * attn, axis=1)                                   # (B, D)

    # ---- domaingate / gateFeature / classifiers (exact sigmoid) --------------
    z = (jnp.dot(xf, vec_ref[R["gw"]:R["gw"] + D, 0:D], preferred_element_type=f32)
         + vrow(R["gb"], D))
    dgate = 1.0 / (1.0 + jnp.exp(-z))
    xc = xf * dgate
    xs = xf * (1.0 - dgate)
    xall = xc + xs
    # Both classifier heads in one matmul: rows [xall; xc], cols [all | com].
    cls_out = (jnp.dot(jnp.concatenate([xall, xc], axis=0),
                       vec_ref[R["clsw"]:R["clsw"] + D, 0:4],
                       preferred_element_type=f32)
               + vrow(R["clsb"], 4))                                  # (2B, 4)
    preds = cls_out[0:B, 0:2]
    preds_xc = cls_out[B:2 * B, 2:4]
    # preds_xs == preds in the forward pass (detach == identity) -> deduped in
    # the wrapper, no extra matmul.

    # ---- Content_reconstruction ----------------------------------------------
    ainv = vec_ref[R["ainv"]:R["ainv"] + N, 0:1]                      # (N, 1)
    hdec = ((attn * ainv) * xall[:, None, :]).reshape(BN, D)          # repeat_interleave + mul
    for l in range(n_layers, 2 * n_layers):
        hdec = layer(hdec, l)
    zr = jnp.dot(hdec, vec_ref[R["fcw"]:R["fcw"] + D, 0:Cin],
                 preferred_element_type=f32)                          # Linear(c_hid, c_in, no bias)
    xr = layer_norm(zr, vrow(R["fcln"], Cin), vrow(R["fcln"] + 1, Cin))

    # ---- single lane-dense packed output (one full, unmasked store) ----------
    small = jnp.concatenate(
        [dgate, xc, xs, preds, preds_xc,
         jnp.zeros((B, OUT_LANES - Cin - 3 * D - 4), f32)], axis=-1)  # (B, 128-Cin)
    extras = jnp.concatenate(
        [small[:, None, :], jnp.zeros((B, N - 1, OUT_LANES - Cin), f32)], axis=1)
    out_ref[...] = jnp.concatenate([xr.reshape(B, N, Cin), extras], axis=-1)


# ---------------- parameters ---------------------------------------------------

def _init_layer(key, D, E):
    ks = jax.random.split(key, 6)
    s = 0.1
    return {
        "wq": jax.random.normal(ks[0], (D, D), jnp.float32) * s, "bq": jnp.zeros((1, D), jnp.float32),
        "wk": jax.random.normal(ks[1], (D, D), jnp.float32) * s, "bk": jnp.zeros((1, D), jnp.float32),
        "wv": jax.random.normal(ks[2], (D, D), jnp.float32) * s, "bv": jnp.zeros((1, D), jnp.float32),
        "wo": jax.random.normal(ks[3], (D, D), jnp.float32) * s, "bo": jnp.zeros((1, D), jnp.float32),
        "w1": jax.random.normal(ks[4], (D, E), jnp.float32) * s, "b1": jnp.zeros((1, E), jnp.float32),
        "w2": jax.random.normal(ks[5], (E, D), jnp.float32) * s, "b2": jnp.zeros((1, D), jnp.float32),
        "g1": jnp.ones((1, D), jnp.float32), "be1": jnp.zeros((1, D), jnp.float32),
        "g2": jnp.ones((1, D), jnp.float32), "be2": jnp.zeros((1, D), jnp.float32),
    }


def init_params(key):
    ks = jax.random.split(key, 6 + 2 * NUM_LAYERS)
    s = 0.1
    p = {
        "embed_w": jax.random.normal(ks[0], (C_IN, C_HID), jnp.float32) * s,
        "post_attn_w": jax.random.normal(ks[1], (2 * C_HID, 1), jnp.float32) * s,
        "gate_w": jax.random.normal(ks[2], (C_HID, C_HID), jnp.float32) * s,
        "gate_b": jnp.zeros((1, C_HID), jnp.float32),
        "cls_all_w": jax.random.normal(ks[3], (C_HID, 2), jnp.float32) * s,
        "cls_all_b": jnp.zeros((1, 2), jnp.float32),
        "cls_com_w": jax.random.normal(ks[4], (C_HID, 2), jnp.float32) * s,
        "cls_com_b": jnp.zeros((1, 2), jnp.float32),
        "attn_inverse": jnp.ones((N_POSTS, 1), jnp.float32),   # nn.init.constant_(1.0)
        "fc_w": jax.random.normal(ks[5], (C_HID, C_IN), jnp.float32) * s,
        "fc_ln_g": jnp.ones((1, C_IN), jnp.float32),
        "fc_ln_b": jnp.zeros((1, C_IN), jnp.float32),
    }
    p["enc_layers"] = [_init_layer(ks[6 + i], C_HID, E_HID) for i in range(NUM_LAYERS)]
    p["dec_layers"] = [_init_layer(ks[6 + NUM_LAYERS + i], C_HID, E_HID) for i in range(NUM_LAYERS)]
    return p


def pack_params(p):
    """Pack weights into 4 stacked big operands + one (rows, 128) small slab."""
    layers = p["enc_layers"] + p["dec_layers"]          # enc0, enc1, dec0, dec1
    scale = 1.0 / math.sqrt(C_HID // N_HEAD)
    # Fold the 1/sqrt(dh) attention score scale into Wq / bq (one-time).
    wqkv = jnp.stack([jnp.concatenate([l["wq"] * scale, l["wk"], l["wv"]], axis=1)
                      for l in layers])                                # (L, D, 3D)
    wo = jnp.stack([l["wo"] for l in layers])                          # (L, D, D)
    w1 = jnp.stack([l["w1"] for l in layers])                          # (L, D, E)
    w2 = jnp.stack([l["w2"] for l in layers])                          # (L, E, D)

    R = _ROWS
    slab = jnp.zeros((R["total"], SLAB_LANES), jnp.float32)
    slab = slab.at[R["emb"]:R["emb"] + C_IN, 0:C_HID].set(p["embed_w"])
    slab = slab.at[R["gw"]:R["gw"] + C_HID, 0:C_HID].set(p["gate_w"])
    slab = slab.at[R["fcw"]:R["fcw"] + C_HID, 0:C_IN].set(p["fc_w"])
    slab = slab.at[R["clsw"]:R["clsw"] + C_HID, 0:2].set(p["cls_all_w"])
    slab = slab.at[R["clsw"]:R["clsw"] + C_HID, 2:4].set(p["cls_com_w"])
    for i, l in enumerate(layers):
        bqkv = jnp.concatenate([l["bq"] * scale, l["bk"], l["bv"]], axis=1)
        slab = slab.at[R["bqkv"] + i, 0:3 * C_HID].set(bqkv[0])
        slab = slab.at[R["b1"] + i, 0:E_HID].set(l["b1"][0])
        vb = R["vecs"] + 6 * i
        for j, nm in enumerate(("bo", "b2", "g1", "be1", "g2", "be2")):
            slab = slab.at[vb + j, 0:C_HID].set(l[nm][0])
    slab = slab.at[R["paw"], 0:C_HID].set(p["post_attn_w"][:C_HID, 0])
    slab = slab.at[R["paw"] + 1, 0:C_HID].set(p["post_attn_w"][C_HID:, 0])
    slab = slab.at[R["gb"], 0:C_HID].set(p["gate_b"][0])
    slab = slab.at[R["clsb"], 0:2].set(p["cls_all_b"][0])
    slab = slab.at[R["clsb"], 2:4].set(p["cls_com_b"][0])
    slab = slab.at[R["ainv"]:R["ainv"] + N_POSTS, 0:1].set(p["attn_inverse"])
    slab = slab.at[R["fcln"], 0:C_IN].set(p["fc_ln_g"][0])
    slab = slab.at[R["fcln"] + 1, 0:C_IN].set(p["fc_ln_b"][0])
    return {"wqkv": wqkv, "wo": wo, "w1": w1, "w2": w2, "slab": slab}


# ---------------- full MCSFD forward (one fused pallas_call) -------------------

@functools.partial(jax.jit, static_argnames=("n_head",))
def mcsfd_forward(x, A, pk, n_head=N_HEAD):
    B, N, Cin = x.shape
    D = pk["wqkv"].shape[1]
    vm = pl.BlockSpec(memory_space=pltpu.MemorySpace.VMEM)
    out = pl.pallas_call(
        functools.partial(_mcsfd_kernel, n_head=n_head),
        out_shape=jax.ShapeDtypeStruct((B, N, OUT_LANES), jnp.float32),
        in_specs=[vm] * 7,
        out_specs=vm,
    )(x, A, pk["wqkv"], pk["wo"], pk["w1"], pk["w2"], pk["slab"])

    # Unpack the single lane-dense output slab.
    x_rec = out[:, :, 0:Cin]
    small = out[:, 0, :]
    dgate = small[:, Cin:Cin + D]
    xc = small[:, Cin + D:Cin + 2 * D]
    xs = small[:, Cin + 2 * D:Cin + 3 * D]
    preds = small[:, Cin + 3 * D:Cin + 3 * D + 2]
    preds_xc = small[:, Cin + 3 * D + 2:Cin + 3 * D + 4]
    preds_xs = preds            # xc.detach() + xs == xc + xs in the forward pass
    return preds, preds_xc, preds_xs, xc, xs, x_rec, dgate


if __name__ == "__main__":
    key = jax.random.PRNGKey(0)
    kx, ka, kp = jax.random.split(key, 3)
    x = jax.random.normal(kx, (BATCH, N_POSTS, C_IN), jnp.float32)
    A = (jax.random.uniform(ka, (BATCH, N_POSTS, N_POSTS)) > 0.5).astype(jnp.float32)
    A = jnp.maximum(A, jnp.eye(N_POSTS, dtype=jnp.float32)[None])   # self loops
    params = init_params(kp)
    packed = pack_params(params)

    outs = mcsfd_forward(x, A, packed)
    jax.block_until_ready(outs)

    preds, preds_xc, preds_xs, xc, xs, x_rec, dgate = outs
    assert preds.shape == (BATCH, 2) and preds_xc.shape == (BATCH, 2)
    assert preds_xs.shape == (BATCH, 2)
    assert xc.shape == (BATCH, C_HID) and xs.shape == (BATCH, C_HID)
    assert dgate.shape == (BATCH, C_HID)
    assert x_rec.shape == (BATCH, N_POSTS, C_IN)
    assert all(bool(jnp.all(jnp.isfinite(o))) for o in outs)
    print("KERNEL_OK")
</pallas_src>

<mosaic_0001>
module attributes {stable_mosaic.version = 11 : i64} {
  func.func @_mcsfd_kernel(%arg0: memref<2x8x16xf32, #tpu.memory_space<vmem>>, %arg1: memref<2x8x8xf32, #tpu.memory_space<vmem>>, %arg2: memref<4x32x96xf32, #tpu.memory_space<vmem>>, %arg3: memref<4x32x32xf32, #tpu.memory_space<vmem>>, %arg4: memref<4x32x64xf32, #tpu.memory_space<vmem>>, %arg5: memref<4x64x32xf32, #tpu.memory_space<vmem>>, %arg6: memref<160x128xf32, #tpu.memory_space<vmem>>, %arg7: memref<2x8x128xf32, #tpu.memory_space<vmem>>) attributes {dimension_semantics = [], scalar_prefetch = 0 : i64, scratch_operands = 0 : i64, tpu.core_type = #tpu.core_type<tc>} {
    %c0 = arith.constant 0 : index
    %c0_0 = arith.constant 0 : index
    %c0_1 = arith.constant 0 : index
    %0 = vector.load %arg0[%c0, %c0_0, %c0_1] : memref<2x8x16xf32, #tpu.memory_space<vmem>>, vector<2x8x16xf32>
    %1 = vector.shape_cast %0 : vector<2x8x16xf32> to vector<16x16xf32>
    %c0_2 = arith.constant 0 : index
    %c0_3 = arith.constant 0 : index
    %2 = vector.load %arg6[%c0_2, %c0_3] : memref<160x128xf32, #tpu.memory_space<vmem>>, vector<16x32xf32>
    %cst = arith.constant dense<0.000000e+00> : vector<16x32xf32>
    %3 = tpu.matmul %1, %2, %cst {dimension_numbers = #tpu.dot_dimension_numbers<[1], [0], [0], [1], [0, 0, 1, 1], [], []>} : vector<16x16xf32>, vector<16x32xf32>, vector<16x32xf32> -> vector<16x32xf32>
    %cst_4 = arith.constant 0.000000e+00 : f32
    %4 = vector.broadcast %cst_4 : f32 to vector<16x32xf32>
    %5 = arith.cmpf ogt, %3, %4 : vector<16x32xf32>
    %cst_5 = arith.constant 0.00999999977 : f32
    %6 = vector.broadcast %cst_5 : f32 to vector<16x32xf32>
    %7 = arith.mulf %6, %3 : vector<16x32xf32>
    %8 = arith.select %5, %3, %7 : vector<16x32xi1>, vector<16x32xf32>
    %cst_6 = arith.constant dense<0.000000e+00> : vector<16xf32>
    %9 = vector.multi_reduction <add>, %8, %cst_6 [1] : vector<16x32xf32> to vector<16xf32>
    %10 = vector.shape_cast %9 : vector<16xf32> to vector<16x1xf32>
    %cst_7 = arith.constant 0.000000e+00 : f32
    %11 = vector.broadcast %cst_7 : f32 to vector<16x1xf32>
    %12 = arith.cmpf one, %10, %11 : vector<16x1xf32>
    %13 = arith.extui %12 : vector<16x1xi1> to vector<16x1xi32>
    %14 = arith.sitofp %13 : vector<16x1xi32> to vector<16x1xf32>
    %c0_8 = arith.constant 0 : index
    %c0_9 = arith.constant 0 : index
    %c0_10 = arith.constant 0 : index
    %15 = vector.load %arg1[%c0_8, %c0_9, %c0_10] : memref<2x8x8xf32, #tpu.memory_space<vmem>>, vector<2x8x8xf32>
    %cst_11 = arith.constant 0.000000e+00 : f32
    %16 = vector.broadcast %cst_11 : f32 to vector<2x8x8xf32>
    %17 = arith.cmpf ogt, %15, %16 : vector<2x8x8xf32>
    %cst_12 = arith.constant 0.000000e+00 : f32
    %cst_13 = arith.constant -1.000000e+09 : f32
    %18 = vector.broadcast %cst_12 : f32 to vector<2x8x8xf32>
    %19 = vector.broadcast %cst_13 : f32 to vector<2x8x8xf32>
    %20 = arith.select %17, %18, %19 : vector<2x8x8xi1>, vector<2x8x8xf32>
    %21 = tpu.concatenate %20, %20, %20, %20 in 0 : vector<2x8x8xf32>, vector<2x8x8xf32>, vector<2x8x8xf32>, vector<2x8x8xf32> -> vector<8x8x8xf32>
    %c0_14 = arith.constant 0 : index
    %c0_15 = arith.constant 0 : index
    %c0_16 = arith.constant 0 : index
    %22 = vector.load %arg2[%c0_14, %c0_15, %c0_16] : memref<4x32x96xf32, #tpu.memory_space<vmem>>, vector<1x32x96xf32>
    %23 = vector.shape_cast %22 : vector<1x32x96xf32> to vector<32x96xf32>
    %cst_17 = arith.constant dense<0.000000e+00> : vector<16x96xf32>
    %24 = tpu.matmul %8, %23, %cst_17 {dimension_numbers = #tpu.dot_dimension_numbers<[1], [0], [0], [1], [0, 0, 1, 1], [], []>} : vector<16x32xf32>, vector<32x96xf32>, vector<16x96xf32> -> vector<16x96xf32>
    %c112 = arith.constant 112 : index
    %c0_18 = arith.constant 0 : index
    %25 = vector.load %arg6[%c112, %c0_18] : memref<160x128xf32, #tpu.memory_space<vmem>>, vector<1x96xf32>
    %26 = vector.broadcast %25 : vector<1x96xf32> to vector<16x96xf32>
    %27 = arith.addf %24, %26 : vector<16x96xf32>
    %28 = vector.shape_cast %27 : vector<16x96xf32> to vector<2x8x96xf32>
    %29 = vector.extract_strided_slice %28 {offsets = [0, 0, 0], sizes = [2, 8, 8], strides = [1, 1, 1]} : vector<2x8x96xf32> to vector<2x8x8xf32>
    %30 = vector.extract_strided_slice %28 {offsets = [0, 0, 8], sizes = [2, 8, 8], strides = [1, 1, 1]} : vector<2x8x96xf32> to vector<2x8x8xf32>
    %31 = vector.extract_strided_slice %28 {offsets = [0, 0, 16], sizes = [2, 8, 8], strides = [1, 1, 1]} : vector<2x8x96xf32> to vector<2x8x8xf32>
    %32 = vector.extract_strided_slice %28 {offsets = [0, 0, 24], sizes = [2, 8, 8], strides = [1, 1, 1]} : vector<2x8x96xf32> to vector<2x8x8xf32>
    %33 = tpu.concatenate %29, %30, %31, %32 in 0 : vector<2x8x8xf32>, vector<2x8x8xf32>, vector<2x8x8xf32>, vector<2x8x8xf32> -> vector<8x8x8xf32>
    %34 = vector.extract_strided_slice %28 {offsets = [0, 0, 32], sizes = [2, 8, 8], strides = [1, 1, 1]} : vector<2x8x96xf32> to vector<2x8x8xf32>
    %35 = vector.extract_strided_slice %28 {offsets = [0, 0, 40], sizes = [2, 8, 8], strides = [1, 1, 1]} : vector<2x8x96xf32> to vector<2x8x8xf32>
    %36 = vector.extract_strided_slice %28 {offsets = [0, 0, 48], sizes = [2, 8, 8], strides = [1, 1, 1]} : vector<2x8x96xf32> to vector<2x8x8xf32>
    %37 = vector.extract_strided_slice %28 {offsets = [0, 0, 56], sizes = [2, 8, 8], strides = [1, 1, 1]} : vector<2x8x96xf32> to vector<2x8x8xf32>
    %38 = tpu.concatenate %34, %35, %36, %37 in 0 : vector<2x8x8xf32>, vector<2x8x8xf32>, vector<2x8x8xf32>, vector<2x8x8xf32> -> vector<8x8x8xf32>
    %39 = vector.extract_strided_slice %28 {offsets = [0, 0, 64], sizes = [2, 8, 8], strides = [1, 1, 1]} : vector<2x8x96xf32> to vector<2x8x8xf32>
    %40 = vector.extract_strided_slice %28 {offsets = [0, 0, 72], sizes = [2, 8, 8], strides = [1, 1, 1]} : vector<2x8x96xf32> to vector<2x8x8xf32>
    %41 = vector.extract_strided_slice %28 {offsets = [0, 0, 80], sizes = [2, 8, 8], strides = [1, 1, 1]} : vector<2x8x96xf32> to vector<2x8x8xf32>
    %42 = vector.extract_strided_slice %28 {offsets = [0, 0, 88], sizes = [2, 8, 8], strides = [1, 1, 1]} : vector<2x8x96xf32> to vector<2x8x8xf32>
    %43 = tpu.concatenate %39, %40, %41, %42 in 0 : vector<2x8x8xf32>, vector<2x8x8xf32>, vector<2x8x8xf32>, vector<2x8x8xf32> -> vector<8x8x8xf32>
    "tpu.trace_start"() <{level = 10 : i32, message = "znd,zmd->znm"}> : () -> ()
    %cst_19 = arith.constant dense<0.000000e+00> : vector<8x8x8xf32>
    %44 = tpu.matmul %33, %38, %cst_19 {dimension_numbers = #tpu.dot_dimension_numbers<[2], [2], [1], [1], [0, 0, 0, 1, 1, 1], [0], [0]>} : vector<8x8x8xf32>, vector<8x8x8xf32>, vector<8x8x8xf32> -> vector<8x8x8xf32>
    "tpu.trace_stop"() : () -> ()
    %45 = arith.addf %44, %21 : vector<8x8x8xf32>
    %cst_20 = arith.constant dense<0xFF800000> : vector<8x8xf32>
    %46 = vector.multi_reduction <maximumf>, %45, %cst_20 [2] : vector<8x8x8xf32> to vector<8x8xf32>
    %47 = vector.shape_cast %46 : vector<8x8xf32> to vector<8x8x1xf32>
    %48 = vector.broadcast %47 : vector<8x8x1xf32> to vector<8x8x8xf32>
    %49 = arith.subf %45, %48 : vector<8x8x8xf32>
    %50 = math.exp %49 : vector<8x8x8xf32>
    %cst_21 = arith.constant dense<0.000000e+00> : vector<8x8xf32>
    %51 = vector.multi_reduction <add>, %50, %cst_21 [2] : vector<8x8x8xf32> to vector<8x8xf32>
    %52 = vector.shape_cast %51 : vector<8x8xf32> to vector<8x8x1xf32>
    %53 = vector.broadcast %52 : vector<8x8x1xf32> to vector<8x8x8xf32>
    %54 = arith.divf %50, %53 : vector<8x8x8xf32>
    "tpu.trace_start"() <{level = 10 : i32, message = "znm,zmd->znd"}> : () -> ()
    %cst_22 = arith.constant dense<0.000000e+00> : vector<8x8x8xf32>
    %55 = tpu.matmul %54, %43, %cst_22 {dimension_numbers = #tpu.dot_dimension_numbers<[2], [1], [1], [2], [0, 0, 0, 1, 1, 2], [0], [0]>} : vector<8x8x8xf32>, vector<8x8x8xf32>, vector<8x8x8xf32> -> vector<8x8x8xf32>
    "tpu.trace_stop"() : () -> ()
    %56 = vector.extract_strided_slice %55 {offsets = [0, 0, 0], sizes = [2, 8, 8], strides = [1, 1, 1]} : vector<8x8x8xf32> to vector<2x8x8xf32>
    %57 = vector.shape_cast %56 : vector<2x8x8xf32> to vector<16x8xf32>
    %58 = vector.extract_strided_slice %55 {offsets = [2, 0, 0], sizes = [2, 8, 8], strides = [1, 1, 1]} : vector<8x8x8xf32> to vector<2x8x8xf32>
    %59 = vector.shape_cast %58 : vector<2x8x8xf32> to vector<16x8xf32>
    %60 = vector.extract_strided_slice %55 {offsets = [4, 0, 0], sizes = [2, 8, 8], strides = [1, 1, 1]} : vector<8x8x8xf32> to vector<2x8x8xf32>
    %61 = vector.shape_cast %60 : vector<2x8x8xf32> to vector<16x8xf32>
    %62 = vector.extract_strided_slice %55 {offsets = [6, 0, 0], sizes = [2, 8, 8], strides = [1, 1, 1]} : vector<8x8x8xf32> to vector<2x8x8xf32>
    %63 = vector.shape_cast %62 : vector<2x8x8xf32> to vector<16x8xf32>
    %64 = tpu.concatenate %57, %59, %61, %63 in 1 : vector<16x8xf32>, vector<16x8xf32>, vector<16x8xf32>, vector<16x8xf32> -> vector<16x32xf32>
    %c0_23 = arith.constant 0 : index
    %c0_24 = arith.constant 0 : index
    %c0_25 = arith.constant 0 : index
    %65 = vector.load %arg3[%c0_23, %c0_24, %c0_25] : memref<4x32x32xf32, #tpu.memory_space<vmem>>, vector<1x32x32xf32>
    %66 = vector.shape_cast %65 : vector<1x32x32xf32> to vector<32x32xf32>
    %cst_26 = arith.constant dense<0.000000e+00> : vector<16x32xf32>
    %67 = tpu.matmul %64, %66, %cst_26 {dimension_numbers = #tpu.dot_dimension_numbers<[1], [0], [0], [1], [0, 0, 1, 1], [], []>} : vector<16x32xf32>, vector<32x32xf32>, vector<16x32xf32> -> vector<16x32xf32>
    %c120 = arith.constant 120 : index
    %c0_27 = arith.constant 0 : index
    %68 = vector.load %arg6[%c120, %c0_27] : memref<160x128xf32, #tpu.memory_space<vmem>>, vector<1x32xf32>
    %69 = vector.broadcast %68 : vector<1x32xf32> to vector<16x32xf32>
    %70 = arith.addf %67, %69 : vector<16x32xf32>
    %71 = arith.addf %8, %70 : vector<16x32xf32>
    %c122 = arith.constant 122 : index
    %c0_28 = arith.constant 0 : index
    %72 = vector.load %arg6[%c122, %c0_28] : memref<160x128xf32, #tpu.memory_space<vmem>>, vector<1x32xf32>
    %c123 = arith.constant 123 : index
    %c0_29 = arith.constant 0 : index
    %73 = vector.load %arg6[%c123, %c0_29] : memref<160x128xf32, #tpu.memory_space<vmem>>, vector<1x32xf32>
    %cst_30 = arith.constant dense<0.000000e+00> : vector<16xf32>
    %74 = vector.multi_reduction <add>, %71, %cst_30 [1] : vector<16x32xf32> to vector<16xf32>
    %75 = vector.shape_cast %74 : vector<16xf32> to vector<16x1xf32>
    %cst_31 = arith.constant 3.200000e+01 : f32
    %76 = vector.broadcast %cst_31 : f32 to vector<16x1xf32>
    %77 = arith.divf %75, %76 : vector<16x1xf32>
    %78 = vector.broadcast %77 : vector<16x1xf32> to vector<16x32xf32>
    %79 = arith.subf %71, %78 : vector<16x32xf32>
    %80 = arith.mulf %79, %79 : vector<16x32xf32>
    %cst_32 = arith.constant dense<0.000000e+00> : vector<16xf32>
    %81 = vector.multi_reduction <add>, %80, %cst_32 [1] : vector<16x32xf32> to vector<16xf32>
    %82 = vector.shape_cast %81 : vector<16xf32> to vector<16x1xf32>
    %cst_33 = arith.constant 3.200000e+01 : f32
    %83 = vector.broadcast %cst_33 : f32 to vector<16x1xf32>
    %84 = arith.divf %82, %83 : vector<16x1xf32>
    %85 = vector.broadcast %77 : vector<16x1xf32> to vector<16x32xf32>
    %86 = arith.subf %71, %85 : vector<16x32xf32>
    %cst_34 = arith.constant 9.99999974E-6 : f32
    %87 = vector.broadcast %cst_34 : f32 to vector<16x1xf32>
    %88 = arith.addf %84, %87 : vector<16x1xf32>
    %89 = math.rsqrt %88 : vector<16x1xf32>
    %90 = vector.broadcast %89 : vector<16x1xf32> to vector<16x32xf32>
    %91 = arith.mulf %86, %90 : vector<16x32xf32>
    %92 = vector.broadcast %72 : vector<1x32xf32> to vector<16x32xf32>
    %93 = arith.mulf %91, %92 : vector<16x32xf32>
    %94 = vector.broadcast %73 : vector<1x32xf32> to vector<16x32xf32>
    %95 = arith.addf %93, %94 : vector<16x32xf32>
    %c0_35 = arith.constant 0 : index
    %c0_36 = arith.constant 0 : index
    %c0_37 = arith.constant 0 : index
    %96 = vector.load %arg4[%c0_35, %c0_36, %c0_37] : memref<4x32x64xf32, #tpu.memory_space<vmem>>, vector<1x32x64xf32>
    %97 = vector.shape_cast %96 : vector<1x32x64xf32> to vector<32x64xf32>
    %cst_38 = arith.constant dense<0.000000e+00> : vector<16x64xf32>
    %98 = tpu.matmul %95, %97, %cst_38 {dimension_numbers = #tpu.dot_dimension_numbers<[1], [0], [0], [1], [0, 0, 1, 1], [], []>} : vector<16x32xf32>, vector<32x64xf32>, vector<16x64xf32> -> vector<16x64xf32>
    %c116 = arith.constant 116 : index
    %c0_39 = arith.constant 0 : index
    %99 = vector.load %arg6[%c116, %c0_39] : memref<160x128xf32, #tpu.memory_space<vmem>>, vector<1x64xf32>
    %100 = vector.broadcast %99 : vector<1x64xf32> to vector<16x64xf32>
    %101 = arith.addf %98, %100 : vector<16x64xf32>
    %cst_40 = arith.constant 0.000000e+00 : f32
    %102 = vector.broadcast %cst_40 : f32 to vector<16x64xf32>
    %103 = arith.maximumf %101, %102 : vector<16x64xf32>
    %c0_41 = arith.constant 0 : index
    %c0_42 = arith.constant 0 : index
    %c0_43 = arith.constant 0 : index
    %104 = vector.load %arg5[%c0_41, %c0_42, %c0_43] : memref<4x64x32xf32, #tpu.memory_space<vmem>>, vector<1x64x32xf32>
    %105 = vector.shape_cast %104 : vector<1x64x32xf32> to vector<64x32xf32>
    %cst_44 = arith.constant dense<0.000000e+00> : vector<16x32xf32>
    %106 = tpu.matmul %103, %105, %cst_44 {dimension_numbers = #tpu.dot_dimension_numbers<[1], [0], [0], [1], [0, 0, 1, 1], [], []>} : vector<16x64xf32>, vector<64x32xf32>, vector<16x32xf32> -> vector<16x32xf32>
    %c121 = arith.constant 121 : index
    %c0_45 = arith.constant 0 : index
    %107 = vector.load %arg6[%c121, %c0_45] : memref<160x128xf32, #tpu.memory_space<vmem>>, vector<1x32xf32>
    %108 = vector.broadcast %107 : vector<1x32xf32> to vector<16x32xf32>
    %109 = arith.addf %106, %108 : vector<16x32xf32>
    %110 = arith.addf %95, %109 : vector<16x32xf32>
    %c124 = arith.constant 124 : index
    %c0_46 = arith.constant 0 : index
    %111 = vector.load %arg6[%c124, %c0_46] : memref<160x128xf32, #tpu.memory_space<vmem>>, vector<1x32xf32>
    %c125 = arith.constant 125 : index
    %c0_47 = arith.constant 0 : index
    %112 = vector.load %arg6[%c125, %c0_47] : memref<160x128xf32, #tpu.memory_space<vmem>>, vector<1x32xf32>
    %cst_48 = arith.constant dense<0.000000e+00> : vector<16xf32>
    %113 = vector.multi_reduction <add>, %110, %cst_48 [1] : vector<16x32xf32> to vector<16xf32>
    %114 = vector.shape_cast %113 : vector<16xf32> to vector<16x1xf32>
    %cst_49 = arith.constant 3.200000e+01 : f32
    %115 = vector.broadcast %cst_49 : f32 to vector<16x1xf32>
    %116 = arith.divf %114, %115 : vector<16x1xf32>
    %117 = vector.broadcast %116 : vector<16x1xf32> to vector<16x32xf32>
    %118 = arith.subf %110, %117 : vector<16x32xf32>
    %119 = arith.mulf %118, %118 : vector<16x32xf32>
    %cst_50 = arith.constant dense<0.000000e+00> : vector<16xf32>
    %120 = vector.multi_reduction <add>, %119, %cst_50 [1] : vector<16x32xf32> to vector<16xf32>
    %121 = vector.shape_cast %120 : vector<16xf32> to vector<16x1xf32>
    %cst_51 = arith.constant 3.200000e+01 : f32
    %122 = vector.broadcast %cst_51 : f32 to vector<16x1xf32>
    %123 = arith.divf %121, %122 : vector<16x1xf32>
    %124 = vector.broadcast %116 : vector<16x1xf32> to vector<16x32xf32>
    %125 = arith.subf %110, %124 : vector<16x32xf32>
    %cst_52 = arith.constant 9.99999974E-6 : f32
    %126 = vector.broadcast %cst_52 : f32 to vector<16x1xf32>
    %127 = arith.addf %123, %126 : vector<16x1xf32>
    %128 = math.rsqrt %127 : vector<16x1xf32>
    %129 = vector.broadcast %128 : vector<16x1xf32> to vector<16x32xf32>
    %130 = arith.mulf %125, %129 : vector<16x32xf32>
    %131 = vector.broadcast %111 : vector<1x32xf32> to vector<16x32xf32>
    %132 = arith.mulf %130, %131 : vector<16x32xf32>
    %133 = vector.broadcast %112 : vector<1x32xf32> to vector<16x32xf32>
    %134 = arith.addf %132, %133 : vector<16x32xf32>
    %c1 = arith.constant 1 : index
    %c0_53 = arith.constant 0 : index
    %c0_54 = arith.constant 0 : index
    %135 = vector.load %arg2[%c1, %c0_53, %c0_54] : memref<4x32x96xf32, #tpu.memory_space<vmem>>, vector<1x32x96xf32>
    %136 = vector.shape_cast %135 : vector<1x32x96xf32> to vector<32x96xf32>
    %cst_55 = arith.constant dense<0.000000e+00> : vector<16x96xf32>
    %137 = tpu.matmul %134, %136, %cst_55 {dimension_numbers = #tpu.dot_dimension_numbers<[1], [0], [0], [1], [0, 0, 1, 1], [], []>} : vector<16x32xf32>, vector<32x96xf32>, vector<16x96xf32> -> vector<16x96xf32>
    %c113 = arith.constant 113 : index
    %c0_56 = arith.constant 0 : index
    %138 = vector.load %arg6[%c113, %c0_56] : memref<160x128xf32, #tpu.memory_space<vmem>>, vector<1x96xf32>
    %139 = vector.broadcast %138 : vector<1x96xf32> to vector<16x96xf32>
    %140 = arith.addf %137, %139 : vector<16x96xf32>
    %141 = vector.shape_cast %140 : vector<16x96xf32> to vector<2x8x96xf32>
    %142 = vector.extract_strided_slice %141 {offsets = [0, 0, 0], sizes = [2, 8, 8], strides = [1, 1, 1]} : vector<2x8x96xf32> to vector<2x8x8xf32>
    %143 = vector.extract_strided_slice %141 {offsets = [0, 0, 8], sizes = [2, 8, 8], strides = [1, 1, 1]} : vector<2x8x96xf32> to vector<2x8x8xf32>
    %144 = vector.extract_strided_slice %141 {offsets = [0, 0, 16], sizes = [2, 8, 8], strides = [1, 1, 1]} : vector<2x8x96xf32> to vector<2x8x8xf32>
    %145 = vector.extract_strided_slice %141 {offsets = [0, 0, 24], sizes = [2, 8, 8], strides = [1, 1, 1]} : vector<2x8x96xf32> to vector<2x8x8xf32>
    %146 = tpu.concatenate %142, %143, %144, %145 in 0 : vector<2x8x8xf32>, vector<2x8x8xf32>, vector<2x8x8xf32>, vector<2x8x8xf32> -> vector<8x8x8xf32>
    %147 = vector.extract_strided_slice %141 {offsets = [0, 0, 32], sizes = [2, 8, 8], strides = [1, 1, 1]} : vector<2x8x96xf32> to vector<2x8x8xf32>
    %148 = vector.extract_strided_slice %141 {offsets = [0, 0, 40], sizes = [2, 8, 8], strides = [1, 1, 1]} : vector<2x8x96xf32> to vector<2x8x8xf32>
    %149 = vector.extract_strided_slice %141 {offsets = [0, 0, 48], sizes = [2, 8, 8], strides = [1, 1, 1]} : vector<2x8x96xf32> to vector<2x8x8xf32>
    %150 = vector.extract_strided_slice %141 {offsets = [0, 0, 56], sizes = [2, 8, 8], strides = [1, 1, 1]} : vector<2x8x96xf32> to vector<2x8x8xf32>
    %151 = tpu.concatenate %147, %148, %149, %150 in 0 : vector<2x8x8xf32>, vector<2x8x8xf32>, vector<2x8x8xf32>, vector<2x8x8xf32> -> vector<8x8x8xf32>
    %152 = vector.extract_strided_slice %141 {offsets = [0, 0, 64], sizes = [2, 8, 8], strides = [1, 1, 1]} : vector<2x8x96xf32> to vector<2x8x8xf32>
    %153 = vector.extract_strided_slice %141 {offsets = [0, 0, 72], sizes = [2, 8, 8], strides = [1, 1, 1]} : vector<2x8x96xf32> to vector<2x8x8xf32>
    %154 = vector.extract_strided_slice %141 {offsets = [0, 0, 80], sizes = [2, 8, 8], strides = [1, 1, 1]} : vector<2x8x96xf32> to vector<2x8x8xf32>
    %155 = vector.extract_strided_slice %141 {offsets = [0, 0, 88], sizes = [2, 8, 8], strides = [1, 1, 1]} : vector<2x8x96xf32> to vector<2x8x8xf32>
    %156 = tpu.concatenate %152, %153, %154, %155 in 0 : vector<2x8x8xf32>, vector<2x8x8xf32>, vector<2x8x8xf32>, vector<2x8x8xf32> -> vector<8x8x8xf32>
    "tpu.trace_start"() <{level = 10 : i32, message = "znd,zmd->znm"}> : () -> ()
    %cst_57 = arith.constant dense<0.000000e+00> : vector<8x8x8xf32>
    %157 = tpu.matmul %146, %151, %cst_57 {dimension_numbers = #tpu.dot_dimension_numbers<[2], [2], [1], [1], [0, 0, 0, 1, 1, 1], [0], [0]>} : vector<8x8x8xf32>, vector<8x8x8xf32>, vector<8x8x8xf32> -> vector<8x8x8xf32>
    "tpu.trace_stop"() : () -> ()
    %158 = arith.addf %157, %21 : vector<8x8x8xf32>
    %cst_58 = arith.constant dense<0xFF800000> : vector<8x8xf32>
    %159 = vector.multi_reduction <maximumf>, %158, %cst_58 [2] : vector<8x8x8xf32> to vector<8x8xf32>
    %160 = vector.shape_cast %159 : vector<8x8xf32> to vector<8x8x1xf32>
    %161 = vector.broadcast %160 : vector<8x8x1xf32> to vector<8x8x8xf32>
    %162 = arith.subf %158, %161 : vector<8x8x8xf32>
    %163 = math.exp %162 : vector<8x8x8xf32>
    %cst_59 = arith.constant dense<0.000000e+00> : vector<8x8xf32>
    %164 = vector.multi_reduction <add>, %163, %cst_59 [2] : vector<8x8x8xf32> to vector<8x8xf32>
    %165 = vector.shape_cast %164 : vector<8x8xf32> to vector<8x8x1xf32>
    %166 = vector.broadcast %165 : vector<8x8x1xf32> to vector<8x8x8xf32>
    %167 = arith.divf %163, %166 : vector<8x8x8xf32>
    "tpu.trace_start"() <{level = 10 : i32, message = "znm,zmd->znd"}> : () -> ()
    %cst_60 = arith.constant dense<0.000000e+00> : vector<8x8x8xf32>
    %168 = tpu.matmul %167, %156, %cst_60 {dimension_numbers = #tpu.dot_dimension_numbers<[2], [1], [1], [2], [0, 0, 0, 1, 1, 2], [0], [0]>} : vector<8x8x8xf32>, vector<8x8x8xf32>, vector<8x8x8xf32> -> vector<8x8x8xf32>
    "tpu.trace_stop"() : () -> ()
    %169 = vector.extract_strided_slice %168 {offsets = [0, 0, 0], sizes = [2, 8, 8], strides = [1, 1, 1]} : vector<8x8x8xf32> to vector<2x8x8xf32>
    %170 = vector.shape_cast %169 : vector<2x8x8xf32> to vector<16x8xf32>
    %171 = vector.extract_strided_slice %168 {offsets = [2, 0, 0], sizes = [2, 8, 8], strides = [1, 1, 1]} : vector<8x8x8xf32> to vector<2x8x8xf32>
    %172 = vector.shape_cast %171 : vector<2x8x8xf32> to vector<16x8xf32>
    %173 = vector.extract_strided_slice %168 {offsets = [4, 0, 0], sizes = [2, 8, 8], strides = [1, 1, 1]} : vector<8x8x8xf32> to vector<2x8x8xf32>
    %174 = vector.shape_cast %173 : vector<2x8x8xf32> to vector<16x8xf32>
    %175 = vector.extract_strided_slice %168 {offsets = [6, 0, 0], sizes = [2, 8, 8], strides = [1, 1, 1]} : vector<8x8x8xf32> to vector<2x8x8xf32>
    %176 = vector.shape_cast %175 : vector<2x8x8xf32> to vector<16x8xf32>
    %177 = tpu.concatenate %170, %172, %174, %176 in 1 : vector<16x8xf32>, vector<16x8xf32>, vector<16x8xf32>, vector<16x8xf32> -> vector<16x32xf32>
    %c1_61 = arith.constant 1 : index
    %c0_62 = arith.constant 0 : index
    %c0_63 = arith.constant 0 : index
    %178 = vector.load %arg3[%c1_61, %c0_62, %c0_63] : memref<4x32x32xf32, #tpu.memory_space<vmem>>, vector<1x32x32xf32>
    %179 = vector.shape_cast %178 : vector<1x32x32xf32> to vector<32x32xf32>
    %cst_64 = arith.constant dense<0.000000e+00> : vector<16x32xf32>
    %180 = tpu.matmul %177, %179, %cst_64 {dimension_numbers = #tpu.dot_dimension_numbers<[1], [0], [0], [1], [0, 0, 1, 1], [], []>} : vector<16x32xf32>, vector<32x32xf32>, vector<16x32xf32> -> vector<16x32xf32>
    %c126 = arith.constant 126 : index
    %c0_65 = arith.constant 0 : index
    %181 = vector.load %arg6[%c126, %c0_65] : memref<160x128xf32, #tpu.memory_space<vmem>>, vector<1x32xf32>
    %182 = vector.broadcast %181 : vector<1x32xf32> to vector<16x32xf32>
    %183 = arith.addf %180, %182 : vector<16x32xf32>
    %184 = arith.addf %134, %183 : vector<16x32xf32>
    %c128 = arith.constant 128 : index
    %c0_66 = arith.constant 0 : index
    %185 = vector.load %arg6[%c128, %c0_66] : memref<160x128xf32, #tpu.memory_space<vmem>>, vector<1x32xf32>
    %c129 = arith.constant 129 : index
    %c0_67 = arith.constant 0 : index
    %186 = vector.load %arg6[%c129, %c0_67] : memref<160x128xf32, #tpu.memory_space<vmem>>, vector<1x32xf32>
    %cst_68 = arith.constant dense<0.000000e+00> : vector<16xf32>
    %187 = vector.multi_reduction <add>, %184, %cst_68 [1] : vector<16x32xf32> to vector<16xf32>
    %188 = vector.shape_cast %187 : vector<16xf32> to vector<16x1xf32>
    %cst_69 = arith.constant 3.200000e+01 : f32
    %189 = vector.broadcast %cst_69 : f32 to vector<16x1xf32>
    %190 = arith.divf %188, %189 : vector<16x1xf32>
    %191 = vector.broadcast %190 : vector<16x1xf32> to vector<16x32xf32>
    %192 = arith.subf %184, %191 : vector<16x32xf32>
    %193 = arith.mulf %192, %192 : vector<16x32xf32>
    %cst_70 = arith.constant dense<0.000000e+00> : vector<16xf32>
    %194 = vector.multi_reduction <add>, %193, %cst_70 [1] : vector<16x32xf32> to vector<16xf32>
    %195 = vector.shape_cast %194 : vector<16xf32> to vector<16x1xf32>
    %cst_71 = arith.constant 3.200000e+01 : f32
    %196 = vector.broadcast %cst_71 : f32 to vector<16x1xf32>
    %197 = arith.divf %195, %196 : vector<16x1xf32>
    %198 = vector.broadcast %190 : vector<16x1xf32> to vector<16x32xf32>
    %199 = arith.subf %184, %198 : vector<16x32xf32>
    %cst_72 = arith.constant 9.99999974E-6 : f32
    %200 = vector.broadcast %cst_72 : f32 to vector<16x1xf32>
    %201 = arith.addf %197, %200 : vector<16x1xf32>
    %202 = math.rsqrt %201 : vector<16x1xf32>
    %203 = vector.broadcast %202 : vector<16x1xf32> to vector<16x32xf32>
    %204 = arith.mulf %199, %203 : vector<16x32xf32>
    %205 = vector.broadcast %185 : vector<1x32xf32> to vector<16x32xf32>
    %206 = arith.mulf %204, %205 : vector<16x32xf32>
    %207 = vector.broadcast %186 : vector<1x32xf32> to vector<16x32xf32>
    %208 = arith.addf %206, %207 : vector<16x32xf32>
    %c1_73 = arith.constant 1 : index
    %c0_74 = arith.constant 0 : index
    %c0_75 = arith.constant 0 : index
    %209 = vector.load %arg4[%c1_73, %c0_74, %c0_75] : memref<4x32x64xf32, #tpu.memory_space<vmem>>, vector<1x32x64xf32>
    %210 = vector.shape_cast %209 : vector<1x32x64xf32> to vector<32x64xf32>
    %cst_76 = arith.constant dense<0.000000e+00> : vector<16x64xf32>
    %211 = tpu.matmul %208, %210, %cst_76 {dimension_numbers = #tpu.dot_dimension_numbers<[1], [0], [0], [1], [0, 0, 1, 1], [], []>} : vector<16x32xf32>, vector<32x64xf32>, vector<16x64xf32> -> vector<16x64xf32>
    %c117 = arith.constant 117 : index
    %c0_77 = arith.constant 0 : index
    %212 = vector.load %arg6[%c117, %c0_77] : memref<160x128xf32, #tpu.memory_space<vmem>>, vector<1x64xf32>
    %213 = vector.broadcast %212 : vector<1x64xf32> to vector<16x64xf32>
    %214 = arith.addf %211, %213 : vector<16x64xf32>
    %cst_78 = arith.constant 0.000000e+00 : f32
    %215 = vector.broadcast %cst_78 : f32 to vector<16x64xf32>
    %216 = arith.maximumf %214, %215 : vector<16x64xf32>
    %c1_79 = arith.constant 1 : index
    %c0_80 = arith.constant 0 : index
    %c0_81 = arith.constant 0 : index
    %217 = vector.load %arg5[%c1_79, %c0_80, %c0_81] : memref<4x64x32xf32, #tpu.memory_space<vmem>>, vector<1x64x32xf32>
    %218 = vector.shape_cast %217 : vector<1x64x32xf32> to vector<64x32xf32>
    %cst_82 = arith.constant dense<0.000000e+00> : vector<16x32xf32>
    %219 = tpu.matmul %216, %218, %cst_82 {dimension_numbers = #tpu.dot_dimension_numbers<[1], [0], [0], [1], [0, 0, 1, 1], [], []>} : vector<16x64xf32>, vector<64x32xf32>, vector<16x32xf32> -> vector<16x32xf32>
    %c127 = arith.constant 127 : index
    %c0_83 = arith.constant 0 : index
    %220 = vector.load %arg6[%c127, %c0_83] : memref<160x128xf32, #tpu.memory_space<vmem>>, vector<1x32xf32>
    %221 = vector.broadcast %220 : vector<1x32xf32> to vector<16x32xf32>
    %222 = arith.addf %219, %221 : vector<16x32xf32>
    %223 = arith.addf %208, %222 : vector<16x32xf32>
    %c130 = arith.constant 130 : index
    %c0_84 = arith.constant 0 : index
    %224 = vector.load %arg6[%c130, %c0_84] : memref<160x128xf32, #tpu.memory_space<vmem>>, vector<1x32xf32>
    %c131 = arith.constant 131 : index
    %c0_85 = arith.constant 0 : index
    %225 = vector.load %arg6[%c131, %c0_85] : memref<160x128xf32, #tpu.memory_space<vmem>>, vector<1x32xf32>
    %cst_86 = arith.constant dense<0.000000e+00> : vector<16xf32>
    %226 = vector.multi_reduction <add>, %223, %cst_86 [1] : vector<16x32xf32> to vector<16xf32>
    %227 = vector.shape_cast %226 : vector<16xf32> to vector<16x1xf32>
    %cst_87 = arith.constant 3.200000e+01 : f32
    %228 = vector.broadcast %cst_87 : f32 to vector<16x1xf32>
    %229 = arith.divf %227, %228 : vector<16x1xf32>
    %230 = vector.broadcast %229 : vector<16x1xf32> to vector<16x32xf32>
    %231 = arith.subf %223, %230 : vector<16x32xf32>
    %232 = arith.mulf %231, %231 : vector<16x32xf32>
    %cst_88 = arith.constant dense<0.000000e+00> : vector<16xf32>
    %233 = vector.multi_reduction <add>, %232, %cst_88 [1] : vector<16x32xf32> to vector<16xf32>
    %234 = vector.shape_cast %233 : vector<16xf32> to vector<16x1xf32>
    %cst_89 = arith.constant 3.200000e+01 : f32
    %235 = vector.broadcast %cst_89 : f32 to vector<16x1xf32>
    %236 = arith.divf %234, %235 : vector<16x1xf32>
    %237 = vector.broadcast %229 : vector<16x1xf32> to vector<16x32xf32>
    %238 = arith.subf %223, %237 : vector<16x32xf32>
    %cst_90 = arith.constant 9.99999974E-6 : f32
    %239 = vector.broadcast %cst_90 : f32 to vector<16x1xf32>
    %240 = arith.addf %236, %239 : vector<16x1xf32>
    %241 = math.rsqrt %240 : vector<16x1xf32>
    %242 = vector.broadcast %241 : vector<16x1xf32> to vector<16x32xf32>
    %243 = arith.mulf %238, %242 : vector<16x32xf32>
    %244 = vector.broadcast %224 : vector<1x32xf32> to vector<16x32xf32>
    %245 = arith.mulf %243, %244 : vector<16x32xf32>
    %246 = vector.broadcast %225 : vector<1x32xf32> to vector<16x32xf32>
    %247 = arith.addf %245, %246 : vector<16x32xf32>
    %248 = vector.shape_cast %247 : vector<16x32xf32> to vector<2x8x32xf32>
    %249 = vector.shape_cast %14 : vector<16x1xf32> to vector<2x8x1xf32>
    %250 = vector.extract_strided_slice %248 {offsets = [0, 0, 0], sizes = [2, 1, 32], strides = [1, 1, 1]} : vector<2x8x32xf32> to vector<2x1x32xf32>
    %251 = vector.broadcast %249 : vector<2x8x1xf32> to vector<2x8x32xf32>
    %252 = vector.broadcast %250 : vector<2x1x32xf32> to vector<2x8x32xf32>
    %253 = arith.mulf %251, %252 : vector<2x8x32xf32>
    %c144 = arith.constant 144 : index
    %c0_91 = arith.constant 0 : index
    %254 = vector.load %arg6[%c144, %c0_91] : memref<160x128xf32, #tpu.memory_space<vmem>>, vector<1x32xf32>
    %255 = vector.shape_cast %254 : vector<1x32xf32> to vector<1x1x32xf32>
    %256 = vector.broadcast %255 : vector<1x1x32xf32> to vector<2x8x32xf32>
    %257 = arith.mulf %248, %256 : vector<2x8x32xf32>
    %cst_92 = arith.constant dense<0.000000e+00> : vector<2x8xf32>
    %258 = vector.multi_reduction <add>, %257, %cst_92 [2] : vector<2x8x32xf32> to vector<2x8xf32>
    %259 = vector.shape_cast %258 : vector<2x8xf32> to vector<2x8x1xf32>
    %c145 = arith.constant 145 : index
    %c0_93 = arith.constant 0 : index
    %260 = vector.load %arg6[%c145, %c0_93] : memref<160x128xf32, #tpu.memory_space<vmem>>, vector<1x32xf32>
    %261 = vector.shape_cast %260 : vector<1x32xf32> to vector<1x1x32xf32>
    %262 = vector.broadcast %261 : vector<1x1x32xf32> to vector<2x8x32xf32>
    %263 = arith.mulf %253, %262 : vector<2x8x32xf32>
    %cst_94 = arith.constant dense<0.000000e+00> : vector<2x8xf32>
    %264 = vector.multi_reduction <add>, %263, %cst_94 [2] : vector<2x8x32xf32> to vector<2x8xf32>
    %265 = vector.shape_cast %264 : vector<2x8xf32> to vector<2x8x1xf32>
    %266 = arith.addf %259, %265 : vector<2x8x1xf32>
    %cst_95 = arith.constant 0.000000e+00 : f32
    %267 = vector.broadcast %cst_95 : f32 to vector<2x8x1xf32>
    %268 = arith.cmpf oeq, %266, %267 : vector<2x8x1xf32>
    %cst_96 = arith.constant -1.000000e+20 : f32
    %269 = vector.broadcast %cst_96 : f32 to vector<2x8x1xf32>
    %270 = arith.select %268, %269, %266 : vector<2x8x1xi1>, vector<2x8x1xf32>
    %cst_97 = arith.constant dense<0xFF800000> : vector<2x1xf32>
    %271 = vector.multi_reduction <maximumf>, %270, %cst_97 [1] : vector<2x8x1xf32> to vector<2x1xf32>
    %272 = vector.shape_cast %271 : vector<2x1xf32> to vector<2x1x1xf32>
    %273 = vector.broadcast %272 : vector<2x1x1xf32> to vector<2x8x1xf32>
    %274 = arith.subf %270, %273 : vector<2x8x1xf32>
    %275 = math.exp %274 : vector<2x8x1xf32>
    %cst_98 = arith.constant dense<0.000000e+00> : vector<2x1xf32>
    %276 = vector.multi_reduction <add>, %275, %cst_98 [1] : vector<2x8x1xf32> to vector<2x1xf32>
    %277 = vector.shape_cast %276 : vector<2x1xf32> to vector<2x1x1xf32>
    %278 = vector.broadcast %277 : vector<2x1x1xf32> to vector<2x8x1xf32>
    %279 = arith.divf %275, %278 : vector<2x8x1xf32>
    %280 = vector.broadcast %279 : vector<2x8x1xf32> to vector<2x8x32xf32>
    %281 = arith.mulf %248, %280 : vector<2x8x32xf32>
    %cst_99 = arith.constant dense<0.000000e+00> : vector<2x32xf32>
    %282 = vector.multi_reduction <add>, %281, %cst_99 [1] : vector<2x8x32xf32> to vector<2x32xf32>
    %c16 = arith.constant 16 : index
    %c0_100 = arith.constant 0 : index
    %283 = vector.load %arg6[%c16, %c0_100] : memref<160x128xf32, #tpu.memory_space<vmem>>, vector<32x32xf32>
    %cst_101 = arith.constant dense<0.000000e+00> : vector<2x32xf32>
    %284 = tpu.matmul %282, %283, %cst_101 {dimension_numbers = #tpu.dot_dimension_numbers<[1], [0], [0], [1], [0, 0, 1, 1], [], []>} : vector<2x32xf32>, vector<32x32xf32>, vector<2x32xf32> -> vector<2x32xf32>
    %c146 = arith.constant 146 : index
    %c0_102 = arith.constant 0 : index
    %285 = vector.load %arg6[%c146, %c0_102] : memref<160x128xf32, #tpu.memory_space<vmem>>, vector<1x32xf32>
    %286 = vector.broadcast %285 : vector<1x32xf32> to vector<2x32xf32>
    %287 = arith.addf %284, %286 : vector<2x32xf32>
    %cst_103 = arith.constant 0.000000e+00 : f32
    %288 = vector.broadcast %cst_103 : f32 to vector<2x32xf32>
    %289 = arith.subf %288, %287 : vector<2x32xf32>
    %290 = math.exp %289 : vector<2x32xf32>
    %cst_104 = arith.constant 1.000000e+00 : f32
    %291 = vector.broadcast %cst_104 : f32 to vector<2x32xf32>
    %292 = arith.addf %291, %290 : vector<2x32xf32>
    %cst_105 = arith.constant 1.000000e+00 : f32
    %293 = vector.broadcast %cst_105 : f32 to vector<2x32xf32>
    %294 = arith.divf %293, %292 : vector<2x32xf32>
    %295 = arith.mulf %282, %294 : vector<2x32xf32>
    %cst_106 = arith.constant 1.000000e+00 : f32
    %296 = vector.broadcast %cst_106 : f32 to vector<2x32xf32>
    %297 = arith.subf %296, %294 : vector<2x32xf32>
    %298 = arith.mulf %282, %297 : vector<2x32xf32>
    %299 = arith.addf %295, %298 : vector<2x32xf32>
    %300 = tpu.concatenate %299, %295 in 0 : vector<2x32xf32>, vector<2x32xf32> -> vector<4x32xf32>
    %c80 = arith.constant 80 : index
    %c0_107 = arith.constant 0 : index
    %301 = vector.load %arg6[%c80, %c0_107] : memref<160x128xf32, #tpu.memory_space<vmem>>, vector<32x4xf32>
    %cst_108 = arith.constant dense<0.000000e+00> : vector<4x4xf32>
    %302 = tpu.matmul %300, %301, %cst_108 {dimension_numbers = #tpu.dot_dimension_numbers<[1], [0], [0], [1], [0, 0, 1, 1], [], []>} : vector<4x32xf32>, vector<32x4xf32>, vector<4x4xf32> -> vector<4x4xf32>
    %c147 = arith.constant 147 : index
    %c0_109 = arith.constant 0 : index
    %303 = vector.load %arg6[%c147, %c0_109] : memref<160x128xf32, #tpu.memory_space<vmem>>, vector<1x4xf32>
    %304 = vector.broadcast %303 : vector<1x4xf32> to vector<4x4xf32>
    %305 = arith.addf %302, %304 : vector<4x4xf32>
    %306 = vector.extract_strided_slice %305 {offsets = [0, 0], sizes = [2, 2], strides = [1, 1]} : vector<4x4xf32> to vector<2x2xf32>
    %307 = vector.extract_strided_slice %305 {offsets = [2, 2], sizes = [2, 2], strides = [1, 1]} : vector<4x4xf32> to vector<2x2xf32>
    %c148 = arith.constant 148 : index
    %c0_110 = arith.constant 0 : index
    %308 = vector.load %arg6[%c148, %c0_110] : memref<160x128xf32, #tpu.memory_space<vmem>>, vector<8x1xf32>
    %309 = vector.shape_cast %308 : vector<8x1xf32> to vector<1x8x1xf32>
    %310 = vector.broadcast %309 : vector<1x8x1xf32> to vector<2x8x1xf32>
    %311 = arith.mulf %279, %310 : vector<2x8x1xf32>
    %312 = vector.shape_cast %299 : vector<2x32xf32> to vector<2x1x32xf32>
    %313 = vector.broadcast %311 : vector<2x8x1xf32> to vector<2x8x32xf32>
    %314 = vector.broadcast %312 : vector<2x1x32xf32> to vector<2x8x32xf32>
    %315 = arith.mulf %313, %314 : vector<2x8x32xf32>
    %316 = vector.shape_cast %315 : vector<2x8x32xf32> to vector<16x32xf32>
    %c2 = arith.constant 2 : index
    %c0_111 = arith.constant 0 : index
    %c0_112 = arith.constant 0 : index
    %317 = vector.load %arg2[%c2, %c0_111, %c0_112] : memref<4x32x96xf32, #tpu.memory_space<vmem>>, vector<1x32x96xf32>
    %318 = vector.shape_cast %317 : vector<1x32x96xf32> to vector<32x96xf32>
    %cst_113 = arith.constant dense<0.000000e+00> : vector<16x96xf32>
    %319 = tpu.matmul %316, %318, %cst_113 {dimension_numbers = #tpu.dot_dimension_numbers<[1], [0], [0], [1], [0, 0, 1, 1], [], []>} : vector<16x32xf32>, vector<32x96xf32>, vector<16x96xf32> -> vector<16x96xf32>
    %c114 = arith.constant 114 : index
    %c0_114 = arith.constant 0 : index
    %320 = vector.load %arg6[%c114, %c0_114] : memref<160x128xf32, #tpu.memory_space<vmem>>, vector<1x96xf32>
    %321 = vector.broadcast %320 : vector<1x96xf32> to vector<16x96xf32>
    %322 = arith.addf %319, %321 : vector<16x96xf32>
    %323 = vector.shape_cast %322 : vector<16x96xf32> to vector<2x8x96xf32>
    %324 = vector.extract_strided_slice %323 {offsets = [0, 0, 0], sizes = [2, 8, 8], strides = [1, 1, 1]} : vector<2x8x96xf32> to vector<2x8x8xf32>
    %325 = vector.extract_strided_slice %323 {offsets = [0, 0, 8], sizes = [2, 8, 8], strides = [1, 1, 1]} : vector<2x8x96xf32> to vector<2x8x8xf32>
    %326 = vector.extract_strided_slice %323 {offsets = [0, 0, 16], sizes = [2, 8, 8], strides = [1, 1, 1]} : vector<2x8x96xf32> to vector<2x8x8xf32>
    %327 = vector.extract_strided_slice %323 {offsets = [0, 0, 24], sizes = [2, 8, 8], strides = [1, 1, 1]} : vector<2x8x96xf32> to vector<2x8x8xf32>
    %328 = tpu.concatenate %324, %325, %326, %327 in 0 : vector<2x8x8xf32>, vector<2x8x8xf32>, vector<2x8x8xf32>, vector<2x8x8xf32> -> vector<8x8x8xf32>
    %329 = vector.extract_strided_slice %323 {offsets = [0, 0, 32], sizes = [2, 8, 8], strides = [1, 1, 1]} : vector<2x8x96xf32> to vector<2x8x8xf32>
    %330 = vector.extract_strided_slice %323 {offsets = [0, 0, 40], sizes = [2, 8, 8], strides = [1, 1, 1]} : vector<2x8x96xf32> to vector<2x8x8xf32>
    %331 = vector.extract_strided_slice %323 {offsets = [0, 0, 48], sizes = [2, 8, 8], strides = [1, 1, 1]} : vector<2x8x96xf32> to vector<2x8x8xf32>
    %332 = vector.extract_strided_slice %323 {offsets = [0, 0, 56], sizes = [2, 8, 8], strides = [1, 1, 1]} : vector<2x8x96xf32> to vector<2x8x8xf32>
    %333 = tpu.concatenate %329, %330, %331, %332 in 0 : vector<2x8x8xf32>, vector<2x8x8xf32>, vector<2x8x8xf32>, vector<2x8x8xf32> -> vector<8x8x8xf32>
    %334 = vector.extract_strided_slice %323 {offsets = [0, 0, 64], sizes = [2, 8, 8], strides = [1, 1, 1]} : vector<2x8x96xf32> to vector<2x8x8xf32>
    %335 = vector.extract_strided_slice %323 {offsets = [0, 0, 72], sizes = [2, 8, 8], strides = [1, 1, 1]} : vector<2x8x96xf32> to vector<2x8x8xf32>
    %336 = vector.extract_strided_slice %323 {offsets = [0, 0, 80], sizes = [2, 8, 8], strides = [1, 1, 1]} : vector<2x8x96xf32> to vector<2x8x8xf32>
    %337 = vector.extract_strided_slice %323 {offsets = [0, 0, 88], sizes = [2, 8, 8], strides = [1, 1, 1]} : vector<2x8x96xf32> to vector<2x8x8xf32>
    %338 = tpu.concatenate %334, %335, %336, %337 in 0 : vector<2x8x8xf32>, vector<2x8x8xf32>, vector<2x8x8xf32>, vector<2x8x8xf32> -> vector<8x8x8xf32>
    "tpu.trace_start"() <{level = 10 : i32, message = "znd,zmd->znm"}> : () -> ()
    %cst_115 = arith.constant dense<0.000000e+00> : vector<8x8x8xf32>
    %339 = tpu.matmul %328, %333, %cst_115 {dimension_numbers = #tpu.dot_dimension_numbers<[2], [2], [1], [1], [0, 0, 0, 1, 1, 1], [0], [0]>} : vector<8x8x8xf32>, vector<8x8x8xf32>, vector<8x8x8xf32> -> vector<8x8x8xf32>
    "tpu.trace_stop"() : () -> ()
    %340 = arith.addf %339, %21 : vector<8x8x8xf32>
    %cst_116 = arith.constant dense<0xFF800000> : vector<8x8xf32>
    %341 = vector.multi_reduction <maximumf>, %340, %cst_116 [2] : vector<8x8x8xf32> to vector<8x8xf32>
    %342 = vector.shape_cast %341 : vector<8x8xf32> to vector<8x8x1xf32>
    %343 = vector.broadcast %342 : vector<8x8x1xf32> to vector<8x8x8xf32>
    %344 = arith.subf %340, %343 : vector<8x8x8xf32>
    %345 = math.exp %344 : vector<8x8x8xf32>
    %cst_117 = arith.constant dense<0.000000e+00> : vector<8x8xf32>
    %346 = vector.multi_reduction <add>, %345, %cst_117 [2] : vector<8x8x8xf32> to vector<8x8xf32>
    %347 = vector.shape_cast %346 : vector<8x8xf32> to vector<8x8x1xf32>
    %348 = vector.broadcast %347 : vector<8x8x1xf32> to vector<8x8x8xf32>
    %349 = arith.divf %345, %348 : vector<8x8x8xf32>
    "tpu.trace_start"() <{level = 10 : i32, message = "znm,zmd->znd"}> : () -> ()
    %cst_118 = arith.constant dense<0.000000e+00> : vector<8x8x8xf32>
    %350 = tpu.matmul %349, %338, %cst_118 {dimension_numbers = #tpu.dot_dimension_numbers<[2], [1], [1], [2], [0, 0, 0, 1, 1, 2], [0], [0]>} : vector<8x8x8xf32>, vector<8x8x8xf32>, vector<8x8x8xf32> -> vector<8x8x8xf32>
    "tpu.trace_stop"() : () -> ()
    %351 = vector.extract_strided_slice %350 {offsets = [0, 0, 0], sizes = [2, 8, 8], strides = [1, 1, 1]} : vector<8x8x8xf32> to vector<2x8x8xf32>
    %352 = vector.shape_cast %351 : vector<2x8x8xf32> to vector<16x8xf32>
    %353 = vector.extract_strided_slice %350 {offsets = [2, 0, 0], sizes = [2, 8, 8], strides = [1, 1, 1]} : vector<8x8x8xf32> to vector<2x8x8xf32>
    %354 = vector.shape_cast %353 : vector<2x8x8xf32> to vector<16x8xf32>
    %355 = vector.extract_strided_slice %350 {offsets = [4, 0, 0], sizes = [2, 8, 8], strides = [1, 1, 1]} : vector<8x8x8xf32> to vector<2x8x8xf32>
    %356 = vector.shape_cast %355 : vector<2x8x8xf32> to vector<16x8xf32>
    %357 = vector.extract_strided_slice %350 {offsets = [6, 0, 0], sizes = [2, 8, 8], strides = [1, 1, 1]} : vector<8x8x8xf32> to vector<2x8x8xf32>
    %358 = vector.shape_cast %357 : vector<2x8x8xf32> to vector<16x8xf32>
    %359 = tpu.concatenate %352, %354, %356, %358 in 1 : vector<16x8xf32>, vector<16x8xf32>, vector<16x8xf32>, vector<16x8xf32> -> vector<16x32xf32>
    %c2_119 = arith.constant 2 : index
    %c0_120 = arith.constant 0 : index
    %c0_121 = arith.constant 0 : index
    %360 = vector.load %arg3[%c2_119, %c0_120, %c0_121] : memref<4x32x32xf32, #tpu.memory_space<vmem>>, vector<1x32x32xf32>
    %361 = vector.shape_cast %360 : vector<1x32x32xf32> to vector<32x32xf32>
    %cst_122 = arith.constant dense<0.000000e+00> : vector<16x32xf32>
    %362 = tpu.matmul %359, %361, %cst_122 {dimension_numbers = #tpu.dot_dimension_numbers<[1], [0], [0], [1], [0, 0, 1, 1], [], []>} : vector<16x32xf32>, vector<32x32xf32>, vector<16x32xf32> -> vector<16x32xf32>
    %c132 = arith.constant 132 : index
    %c0_123 = arith.constant 0 : index
    %363 = vector.load %arg6[%c132, %c0_123] : memref<160x128xf32, #tpu.memory_space<vmem>>, vector<1x32xf32>
    %364 = vector.broadcast %363 : vector<1x32xf32> to vector<16x32xf32>
    %365 = arith.addf %362, %364 : vector<16x32xf32>
    %366 = arith.addf %316, %365 : vector<16x32xf32>
    %c134 = arith.constant 134 : index
    %c0_124 = arith.constant 0 : index
    %367 = vector.load %arg6[%c134, %c0_124] : memref<160x128xf32, #tpu.memory_space<vmem>>, vector<1x32xf32>
    %c135 = arith.constant 135 : index
    %c0_125 = arith.constant 0 : index
    %368 = vector.load %arg6[%c135, %c0_125] : memref<160x128xf32, #tpu.memory_space<vmem>>, vector<1x32xf32>
    %cst_126 = arith.constant dense<0.000000e+00> : vector<16xf32>
    %369 = vector.multi_reduction <add>, %366, %cst_126 [1] : vector<16x32xf32> to vector<16xf32>
    %370 = vector.shape_cast %369 : vector<16xf32> to vector<16x1xf32>
    %cst_127 = arith.constant 3.200000e+01 : f32
    %371 = vector.broadcast %cst_127 : f32 to vector<16x1xf32>
    %372 = arith.divf %370, %371 : vector<16x1xf32>
    %373 = vector.broadcast %372 : vector<16x1xf32> to vector<16x32xf32>
    %374 = arith.subf %366, %373 : vector<16x32xf32>
    %375 = arith.mulf %374, %374 : vector<16x32xf32>
    %cst_128 = arith.constant dense<0.000000e+00> : vector<16xf32>
    %376 = vector.multi_reduction <add>, %375, %cst_128 [1] : vector<16x32xf32> to vector<16xf32>
    %377 = vector.shape_cast %376 : vector<16xf32> to vector<16x1xf32>
    %cst_129 = arith.constant 3.200000e+01 : f32
    %378 = vector.broadcast %cst_129 : f32 to vector<16x1xf32>
    %379 = arith.divf %377, %378 : vector<16x1xf32>
    %380 = vector.broadcast %372 : vector<16x1xf32> to vector<16x32xf32>
    %381 = arith.subf %366, %380 : vector<16x32xf32>
    %cst_130 = arith.constant 9.99999974E-6 : f32
    %382 = vector.broadcast %cst_130 : f32 to vector<16x1xf32>
    %383 = arith.addf %379, %382 : vector<16x1xf32>
    %384 = math.rsqrt %383 : vector<16x1xf32>
    %385 = vector.broadcast %384 : vector<16x1xf32> to vector<16x32xf32>
    %386 = arith.mulf %381, %385 : vector<16x32xf32>
    %387 = vector.broadcast %367 : vector<1x32xf32> to vector<16x32xf32>
    %388 = arith.mulf %386, %387 : vector<16x32xf32>
    %389 = vector.broadcast %368 : vector<1x32xf32> to vector<16x32xf32>
    %390 = arith.addf %388, %389 : vector<16x32xf32>
    %c2_131 = arith.constant 2 : index
    %c0_132 = arith.constant 0 : index
    %c0_133 = arith.constant 0 : index
    %391 = vector.load %arg4[%c2_131, %c0_132, %c0_133] : memref<4x32x64xf32, #tpu.memory_space<vmem>>, vector<1x32x64xf32>
    %392 = vector.shape_cast %391 : vector<1x32x64xf32> to vector<32x64xf32>
    %cst_134 = arith.constant dense<0.000000e+00> : vector<16x64xf32>
    %393 = tpu.matmul %390, %392, %cst_134 {dimension_numbers = #tpu.dot_dimension_numbers<[1], [0], [0], [1], [0, 0, 1, 1], [], []>} : vector<16x32xf32>, vector<32x64xf32>, vector<16x64xf32> -> vector<16x64xf32>
    %c118 = arith.constant 118 : index
    %c0_135 = arith.constant 0 : index
    %394 = vector.load %arg6[%c118, %c0_135] : memref<160x128xf32, #tpu.memory_space<vmem>>, vector<1x64xf32>
    %395 = vector.broadcast %394 : vector<1x64xf32> to vector<16x64xf32>
    %396 = arith.addf %393, %395 : vector<16x64xf32>
    %cst_136 = arith.constant 0.000000e+00 : f32
    %397 = vector.broadcast %cst_136 : f32 to vector<16x64xf32>
    %398 = arith.maximumf %396, %397 : vector<16x64xf32>
    %c2_137 = arith.constant 2 : index
    %c0_138 = arith.constant 0 : index
    %c0_139 = arith.constant 0 : index
    %399 = vector.load %arg5[%c2_137, %c0_138, %c0_139] : memref<4x64x32xf32, #tpu.memory_space<vmem>>, vector<1x64x32xf32>
    %400 = vector.shape_cast %399 : vector<1x64x32xf32> to vector<64x32xf32>
    %cst_140 = arith.constant dense<0.000000e+00> : vector<16x32xf32>
    %401 = tpu.matmul %398, %400, %cst_140 {dimension_numbers = #tpu.dot_dimension_numbers<[1], [0], [0], [1], [0, 0, 1, 1], [], []>} : vector<16x64xf32>, vector<64x32xf32>, vector<16x32xf32> -> vector<16x32xf32>
    %c133 = arith.constant 133 : index
    %c0_141 = arith.constant 0 : index
    %402 = vector.load %arg6[%c133, %c0_141] : memref<160x128xf32, #tpu.memory_space<vmem>>, vector<1x32xf32>
    %403 = vector.broadcast %402 : vector<1x32xf32> to vector<16x32xf32>
    %404 = arith.addf %401, %403 : vector<16x32xf32>
    %405 = arith.addf %390, %404 : vector<16x32xf32>
    %c136 = arith.constant 136 : index
    %c0_142 = arith.constant 0 : index
    %406 = vector.load %arg6[%c136, %c0_142] : memref<160x128xf32, #tpu.memory_space<vmem>>, vector<1x32xf32>
    %c137 = arith.constant 137 : index
    %c0_143 = arith.constant 0 : index
    %407 = vector.load %arg6[%c137, %c0_143] : memref<160x128xf32, #tpu.memory_space<vmem>>, vector<1x32xf32>
    %cst_144 = arith.constant dense<0.000000e+00> : vector<16xf32>
    %408 = vector.multi_reduction <add>, %405, %cst_144 [1] : vector<16x32xf32> to vector<16xf32>
    %409 = vector.shape_cast %408 : vector<16xf32> to vector<16x1xf32>
    %cst_145 = arith.constant 3.200000e+01 : f32
    %410 = vector.broadcast %cst_145 : f32 to vector<16x1xf32>
    %411 = arith.divf %409, %410 : vector<16x1xf32>
    %412 = vector.broadcast %411 : vector<16x1xf32> to vector<16x32xf32>
    %413 = arith.subf %405, %412 : vector<16x32xf32>
    %414 = arith.mulf %413, %413 : vector<16x32xf32>
    %cst_146 = arith.constant dense<0.000000e+00> : vector<16xf32>
    %415 = vector.multi_reduction <add>, %414, %cst_146 [1] : vector<16x32xf32> to vector<16xf32>
    %416 = vector.shape_cast %415 : vector<16xf32> to vector<16x1xf32>
    %cst_147 = arith.constant 3.200000e+01 : f32
    %417 = vector.broadcast %cst_147 : f32 to vector<16x1xf32>
    %418 = arith.divf %416, %417 : vector<16x1xf32>
    %419 = vector.broadcast %411 : vector<16x1xf32> to vector<16x32xf32>
    %420 = arith.subf %405, %419 : vector<16x32xf32>
    %cst_148 = arith.constant 9.99999974E-6 : f32
    %421 = vector.broadcast %cst_148 : f32 to vector<16x1xf32>
    %422 = arith.addf %418, %421 : vector<16x1xf32>
    %423 = math.rsqrt %422 : vector<16x1xf32>
    %424 = vector.broadcast %423 : vector<16x1xf32> to vector<16x32xf32>
    %425 = arith.mulf %420, %424 : vector<16x32xf32>
    %426 = vector.broadcast %406 : vector<1x32xf32> to vector<16x32xf32>
    %427 = arith.mulf %425, %426 : vector<16x32xf32>
    %428 = vector.broadcast %407 : vector<1x32xf32> to vector<16x32xf32>
    %429 = arith.addf %427, %428 : vector<16x32xf32>
    %c3 = arith.constant 3 : index
    %c0_149 = arith.constant 0 : index
    %c0_150 = arith.constant 0 : index
    %430 = vector.load %arg2[%c3, %c0_149, %c0_150] : memref<4x32x96xf32, #tpu.memory_space<vmem>>, vector<1x32x96xf32>
    %431 = vector.shape_cast %430 : vector<1x32x96xf32> to vector<32x96xf32>
    %cst_151 = arith.constant dense<0.000000e+00> : vector<16x96xf32>
    %432 = tpu.matmul %429, %431, %cst_151 {dimension_numbers = #tpu.dot_dimension_numbers<[1], [0], [0], [1], [0, 0, 1, 1], [], []>} : vector<16x32xf32>, vector<32x96xf32>, vector<16x96xf32> -> vector<16x96xf32>
    %c115 = arith.constant 115 : index
    %c0_152 = arith.constant 0 : index
    %433 = vector.load %arg6[%c115, %c0_152] : memref<160x128xf32, #tpu.memory_space<vmem>>, vector<1x96xf32>
    %434 = vector.broadcast %433 : vector<1x96xf32> to vector<16x96xf32>
    %435 = arith.addf %432, %434 : vector<16x96xf32>
    %436 = vector.shape_cast %435 : vector<16x96xf32> to vector<2x8x96xf32>
    %437 = vector.extract_strided_slice %436 {offsets = [0, 0, 0], sizes = [2, 8, 8], strides = [1, 1, 1]} : vector<2x8x96xf32> to vector<2x8x8xf32>
    %438 = vector.extract_strided_slice %436 {offsets = [0, 0, 8], sizes = [2, 8, 8], strides = [1, 1, 1]} : vector<2x8x96xf32> to vector<2x8x8xf32>
    %439 = vector.extract_strided_slice %436 {offsets = [0, 0, 16], sizes = [2, 8, 8], strides = [1, 1, 1]} : vector<2x8x96xf32> to vector<2x8x8xf32>
    %440 = vector.extract_strided_slice %436 {offsets = [0, 0, 24], sizes = [2, 8, 8], strides = [1, 1, 1]} : vector<2x8x96xf32> to vector<2x8x8xf32>
    %441 = tpu.concatenate %437, %438, %439, %440 in 0 : vector<2x8x8xf32>, vector<2x8x8xf32>, vector<2x8x8xf32>, vector<2x8x8xf32> -> vector<8x8x8xf32>
    %442 = vector.extract_strided_slice %436 {offsets = [0, 0, 32], sizes = [2, 8, 8], strides = [1, 1, 1]} : vector<2x8x96xf32> to vector<2x8x8xf32>
    %443 = vector.extract_strided_slice %436 {offsets = [0, 0, 40], sizes = [2, 8, 8], strides = [1, 1, 1]} : vector<2x8x96xf32> to vector<2x8x8xf32>
    %444 = vector.extract_strided_slice %436 {offsets = [0, 0, 48], sizes = [2, 8, 8], strides = [1, 1, 1]} : vector<2x8x96xf32> to vector<2x8x8xf32>
    %445 = vector.extract_strided_slice %436 {offsets = [0, 0, 56], sizes = [2, 8, 8], strides = [1, 1, 1]} : vector<2x8x96xf32> to vector<2x8x8xf32>
    %446 = tpu.concatenate %442, %443, %444, %445 in 0 : vector<2x8x8xf32>, vector<2x8x8xf32>, vector<2x8x8xf32>, vector<2x8x8xf32> -> vector<8x8x8xf32>
    %447 = vector.extract_strided_slice %436 {offsets = [0, 0, 64], sizes = [2, 8, 8], strides = [1, 1, 1]} : vector<2x8x96xf32> to vector<2x8x8xf32>
    %448 = vector.extract_strided_slice %436 {offsets = [0, 0, 72], sizes = [2, 8, 8], strides = [1, 1, 1]} : vector<2x8x96xf32> to vector<2x8x8xf32>
    %449 = vector.extract_strided_slice %436 {offsets = [0, 0, 80], sizes = [2, 8, 8], strides = [1, 1, 1]} : vector<2x8x96xf32> to vector<2x8x8xf32>
    %450 = vector.extract_strided_slice %436 {offsets = [0, 0, 88], sizes = [2, 8, 8], strides = [1, 1, 1]} : vector<2x8x96xf32> to vector<2x8x8xf32>
    %451 = tpu.concatenate %447, %448, %449, %450 in 0 : vector<2x8x8xf32>, vector<2x8x8xf32>, vector<2x8x8xf32>, vector<2x8x8xf32> -> vector<8x8x8xf32>
    "tpu.trace_start"() <{level = 10 : i32, message = "znd,zmd->znm"}> : () -> ()
    %cst_153 = arith.constant dense<0.000000e+00> : vector<8x8x8xf32>
    %452 = tpu.matmul %441, %446, %cst_153 {dimension_numbers = #tpu.dot_dimension_numbers<[2], [2], [1], [1], [0, 0, 0, 1, 1, 1], [0], [0]>} : vector<8x8x8xf32>, vector<8x8x8xf32>, vector<8x8x8xf32> -> vector<8x8x8xf32>
    "tpu.trace_stop"() : () -> ()
    %453 = arith.addf %452, %21 : vector<8x8x8xf32>
    %cst_154 = arith.constant dense<0xFF800000> : vector<8x8xf32>
    %454 = vector.multi_reduction <maximumf>, %453, %cst_154 [2] : vector<8x8x8xf32> to vector<8x8xf32>
    %455 = vector.shape_cast %454 : vector<8x8xf32> to vector<8x8x1xf32>
    %456 = vector.broadcast %455 : vector<8x8x1xf32> to vector<8x8x8xf32>
    %457 = arith.subf %453, %456 : vector<8x8x8xf32>
    %458 = math.exp %457 : vector<8x8x8xf32>
    %cst_155 = arith.constant dense<0.000000e+00> : vector<8x8xf32>
    %459 = vector.multi_reduction <add>, %458, %cst_155 [2] : vector<8x8x8xf32> to vector<8x8xf32>
    %460 = vector.shape_cast %459 : vector<8x8xf32> to vector<8x8x1xf32>
    %461 = vector.broadcast %460 : vector<8x8x1xf32> to vector<8x8x8xf32>
    %462 = arith.divf %458, %461 : vector<8x8x8xf32>
    "tpu.trace_start"() <{level = 10 : i32, message = "znm,zmd->znd"}> : () -> ()
    %cst_156 = arith.constant dense<0.000000e+00> : vector<8x8x8xf32>
    %463 = tpu.matmul %462, %451, %cst_156 {dimension_numbers = #tpu.dot_dimension_numbers<[2], [1], [1], [2], [0, 0, 0, 1, 1, 2], [0], [0]>} : vector<8x8x8xf32>, vector<8x8x8xf32>, vector<8x8x8xf32> -> vector<8x8x8xf32>
    "tpu.trace_stop"() : () -> ()
    %464 = vector.extract_strided_slice %463 {offsets = [0, 0, 0], sizes = [2, 8, 8], strides = [1, 1, 1]} : vector<8x8x8xf32> to vector<2x8x8xf32>
    %465 = vector.shape_cast %464 : vector<2x8x8xf32> to vector<16x8xf32>
    %466 = vector.extract_strided_slice %463 {offsets = [2, 0, 0], sizes = [2, 8, 8], strides = [1, 1, 1]} : vector<8x8x8xf32> to vector<2x8x8xf32>
    %467 = vector.shape_cast %466 : vector<2x8x8xf32> to vector<16x8xf32>
    %468 = vector.extract_strided_slice %463 {offsets = [4, 0, 0], sizes = [2, 8, 8], strides = [1, 1, 1]} : vector<8x8x8xf32> to vector<2x8x8xf32>
    %469 = vector.shape_cast %468 : vector<2x8x8xf32> to vector<16x8xf32>
    %470 = vector.extract_strided_slice %463 {offsets = [6, 0, 0], sizes = [2, 8, 8], strides = [1, 1, 1]} : vector<8x8x8xf32> to vector<2x8x8xf32>
    %471 = vector.shape_cast %470 : vector<2x8x8xf32> to vector<16x8xf32>
    %472 = tpu.concatenate %465, %467, %469, %471 in 1 : vector<16x8xf32>, vector<16x8xf32>, vector<16x8xf32>, vector<16x8xf32> -> vector<16x32xf32>
    %c3_157 = arith.constant 3 : index
    %c0_158 = arith.constant 0 : index
    %c0_159 = arith.constant 0 : index
    %473 = vector.load %arg3[%c3_157, %c0_158, %c0_159] : memref<4x32x32xf32, #tpu.memory_space<vmem>>, vector<1x32x32xf32>
    %474 = vector.shape_cast %473 : vector<1x32x32xf32> to vector<32x32xf32>
    %cst_160 = arith.constant dense<0.000000e+00> : vector<16x32xf32>
    %475 = tpu.matmul %472, %474, %cst_160 {dimension_numbers = #tpu.dot_dimension_numbers<[1], [0], [0], [1], [0, 0, 1, 1], [], []>} : vector<16x32xf32>, vector<32x32xf32>, vector<16x32xf32> -> vector<16x32xf32>
    %c138 = arith.constant 138 : index
    %c0_161 = arith.constant 0 : index
    %476 = vector.load %arg6[%c138, %c0_161] : memref<160x128xf32, #tpu.memory_space<vmem>>, vector<1x32xf32>
    %477 = vector.broadcast %476 : vector<1x32xf32> to vector<16x32xf32>
    %478 = arith.addf %475, %477 : vector<16x32xf32>
    %479 = arith.addf %429, %478 : vector<16x32xf32>
    %c140 = arith.constant 140 : index
    %c0_162 = arith.constant 0 : index
    %480 = vector.load %arg6[%c140, %c0_162] : memref<160x128xf32, #tpu.memory_space<vmem>>, vector<1x32xf32>
    %c141 = arith.constant 141 : index
    %c0_163 = arith.constant 0 : index
    %481 = vector.load %arg6[%c141, %c0_163] : memref<160x128xf32, #tpu.memory_space<vmem>>, vector<1x32xf32>
    %cst_164 = arith.constant dense<0.000000e+00> : vector<16xf32>
    %482 = vector.multi_reduction <add>, %479, %cst_164 [1] : vector<16x32xf32> to vector<16xf32>
    %483 = vector.shape_cast %482 : vector<16xf32> to vector<16x1xf32>
    %cst_165 = arith.constant 3.200000e+01 : f32
    %484 = vector.broadcast %cst_165 : f32 to vector<16x1xf32>
    %485 = arith.divf %483, %484 : vector<16x1xf32>
    %486 = vector.broadcast %485 : vector<16x1xf32> to vector<16x32xf32>
    %487 = arith.subf %479, %486 : vector<16x32xf32>
    %488 = arith.mulf %487, %487 : vector<16x32xf32>
    %cst_166 = arith.constant dense<0.000000e+00> : vector<16xf32>
    %489 = vector.multi_reduction <add>, %488, %cst_166 [1] : vector<16x32xf32> to vector<16xf32>
    %490 = vector.shape_cast %489 : vector<16xf32> to vector<16x1xf32>
    %cst_167 = arith.constant 3.200000e+01 : f32
    %491 = vector.broadcast %cst_167 : f32 to vector<16x1xf32>
    %492 = arith.divf %490, %491 : vector<16x1xf32>
    %493 = vector.broadcast %485 : vector<16x1xf32> to vector<16x32xf32>
    %494 = arith.subf %479, %493 : vector<16x32xf32>
    %cst_168 = arith.constant 9.99999974E-6 : f32
    %495 = vector.broadcast %cst_168 : f32 to vector<16x1xf32>
    %496 = arith.addf %492, %495 : vector<16x1xf32>
    %497 = math.rsqrt %496 : vector<16x1xf32>
    %498 = vector.broadcast %497 : vector<16x1xf32> to vector<16x32xf32>
    %499 = arith.mulf %494, %498 : vector<16x32xf32>
    %500 = vector.broadcast %480 : vector<1x32xf32> to vector<16x32xf32>
    %501 = arith.mulf %499, %500 : vector<16x32xf32>
    %502 = vector.broadcast %481 : vector<1x32xf32> to vector<16x32xf32>
    %503 = arith.addf %501, %502 : vector<16x32xf32>
    %c3_169 = arith.constant 3 : index
    %c0_170 = arith.constant 0 : index
    %c0_171 = arith.constant 0 : index
    %504 = vector.load %arg4[%c3_169, %c0_170, %c0_171] : memref<4x32x64xf32, #tpu.memory_space<vmem>>, vector<1x32x64xf32>
    %505 = vector.shape_cast %504 : vector<1x32x64xf32> to vector<32x64xf32>
    %cst_172 = arith.constant dense<0.000000e+00> : vector<16x64xf32>
    %506 = tpu.matmul %503, %505, %cst_172 {dimension_numbers = #tpu.dot_dimension_numbers<[1], [0], [0], [1], [0, 0, 1, 1], [], []>} : vector<16x32xf32>, vector<32x64xf32>, vector<16x64xf32> -> vector<16x64xf32>
    %c119 = arith.constant 119 : index
    %c0_173 = arith.constant 0 : index
    %507 = vector.load %arg6[%c119, %c0_173] : memref<160x128xf32, #tpu.memory_space<vmem>>, vector<1x64xf32>
    %508 = vector.broadcast %507 : vector<1x64xf32> to vector<16x64xf32>
    %509 = arith.addf %506, %508 : vector<16x64xf32>
    %cst_174 = arith.constant 0.000000e+00 : f32
    %510 = vector.broadcast %cst_174 : f32 to vector<16x64xf32>
    %511 = arith.maximumf %509, %510 : vector<16x64xf32>
    %c3_175 = arith.constant 3 : index
    %c0_176 = arith.constant 0 : index
    %c0_177 = arith.constant 0 : index
    %512 = vector.load %arg5[%c3_175, %c0_176, %c0_177] : memref<4x64x32xf32, #tpu.memory_space<vmem>>, vector<1x64x32xf32>
    %513 = vector.shape_cast %512 : vector<1x64x32xf32> to vector<64x32xf32>
    %cst_178 = arith.constant dense<0.000000e+00> : vector<16x32xf32>
    %514 = tpu.matmul %511, %513, %cst_178 {dimension_numbers = #tpu.dot_dimension_numbers<[1], [0], [0], [1], [0, 0, 1, 1], [], []>} : vector<16x64xf32>, vector<64x32xf32>, vector<16x32xf32> -> vector<16x32xf32>
    %c139 = arith.constant 139 : index
    %c0_179 = arith.constant 0 : index
    %515 = vector.load %arg6[%c139, %c0_179] : memref<160x128xf32, #tpu.memory_space<vmem>>, vector<1x32xf32>
    %516 = vector.broadcast %515 : vector<1x32xf32> to vector<16x32xf32>
    %517 = arith.addf %514, %516 : vector<16x32xf32>
    %518 = arith.addf %503, %517 : vector<16x32xf32>
    %c142 = arith.constant 142 : index
    %c0_180 = arith.constant 0 : index
    %519 = vector.load %arg6[%c142, %c0_180] : memref<160x128xf32, #tpu.memory_space<vmem>>, vector<1x32xf32>
    %c143 = arith.constant 143 : index
    %c0_181 = arith.constant 0 : index
    %520 = vector.load %arg6[%c143, %c0_181] : memref<160x128xf32, #tpu.memory_space<vmem>>, vector<1x32xf32>
    %cst_182 = arith.constant dense<0.000000e+00> : vector<16xf32>
    %521 = vector.multi_reduction <add>, %518, %cst_182 [1] : vector<16x32xf32> to vector<16xf32>
    %522 = vector.shape_cast %521 : vector<16xf32> to vector<16x1xf32>
    %cst_183 = arith.constant 3.200000e+01 : f32
    %523 = vector.broadcast %cst_183 : f32 to vector<16x1xf32>
    %524 = arith.divf %522, %523 : vector<16x1xf32>
    %525 = vector.broadcast %524 : vector<16x1xf32> to vector<16x32xf32>
    %526 = arith.subf %518, %525 : vector<16x32xf32>
    %527 = arith.mulf %526, %526 : vector<16x32xf32>
    %cst_184 = arith.constant dense<0.000000e+00> : vector<16xf32>
    %528 = vector.multi_reduction <add>, %527, %cst_184 [1] : vector<16x32xf32> to vector<16xf32>
    %529 = vector.shape_cast %528 : vector<16xf32> to vector<16x1xf32>
    %cst_185 = arith.constant 3.200000e+01 : f32
    %530 = vector.broadcast %cst_185 : f32 to vector<16x1xf32>
    %531 = arith.divf %529, %530 : vector<16x1xf32>
    %532 = vector.broadcast %524 : vector<16x1xf32> to vector<16x32xf32>
    %533 = arith.subf %518, %532 : vector<16x32xf32>
    %cst_186 = arith.constant 9.99999974E-6 : f32
    %534 = vector.broadcast %cst_186 : f32 to vector<16x1xf32>
    %535 = arith.addf %531, %534 : vector<16x1xf32>
    %536 = math.rsqrt %535 : vector<16x1xf32>
    %537 = vector.broadcast %536 : vector<16x1xf32> to vector<16x32xf32>
    %538 = arith.mulf %533, %537 : vector<16x32xf32>
    %539 = vector.broadcast %519 : vector<1x32xf32> to vector<16x32xf32>
    %540 = arith.mulf %538, %539 : vector<16x32xf32>
    %541 = vector.broadcast %520 : vector<1x32xf32> to vector<16x32xf32>
    %542 = arith.addf %540, %541 : vector<16x32xf32>
    %c48 = arith.constant 48 : index
    %c0_187 = arith.constant 0 : index
    %543 = vector.load %arg6[%c48, %c0_187] : memref<160x128xf32, #tpu.memory_space<vmem>>, vector<32x16xf32>
    %cst_188 = arith.constant dense<0.000000e+00> : vector<16x16xf32>
    %544 = tpu.matmul %542, %543, %cst_188 {dimension_numbers = #tpu.dot_dimension_numbers<[1], [0], [0], [1], [0, 0, 1, 1], [], []>} : vector<16x32xf32>, vector<32x16xf32>, vector<16x16xf32> -> vector<16x16xf32>
    %c156 = arith.constant 156 : index
    %c0_189 = arith.constant 0 : index
    %545 = vector.load %arg6[%c156, %c0_189] : memref<160x128xf32, #tpu.memory_space<vmem>>, vector<1x16xf32>
    %c157 = arith.constant 157 : index
    %c0_190 = arith.constant 0 : index
    %546 = vector.load %arg6[%c157, %c0_190] : memref<160x128xf32, #tpu.memory_space<vmem>>, vector<1x16xf32>
    %cst_191 = arith.constant dense<0.000000e+00> : vector<16xf32>
    %547 = vector.multi_reduction <add>, %544, %cst_191 [1] : vector<16x16xf32> to vector<16xf32>
    %548 = vector.shape_cast %547 : vector<16xf32> to vector<16x1xf32>
    %cst_192 = arith.constant 1.600000e+01 : f32
    %549 = vector.broadcast %cst_192 : f32 to vector<16x1xf32>
    %550 = arith.divf %548, %549 : vector<16x1xf32>
    %551 = vector.broadcast %550 : vector<16x1xf32> to vector<16x16xf32>
    %552 = arith.subf %544, %551 : vector<16x16xf32>
    %553 = arith.mulf %552, %552 : vector<16x16xf32>
    %cst_193 = arith.constant dense<0.000000e+00> : vector<16xf32>
    %554 = vector.multi_reduction <add>, %553, %cst_193 [1] : vector<16x16xf32> to vector<16xf32>
    %555 = vector.shape_cast %554 : vector<16xf32> to vector<16x1xf32>
    %cst_194 = arith.constant 1.600000e+01 : f32
    %556 = vector.broadcast %cst_194 : f32 to vector<16x1xf32>
    %557 = arith.divf %555, %556 : vector<16x1xf32>
    %558 = vector.broadcast %550 : vector<16x1xf32> to vector<16x16xf32>
    %559 = arith.subf %544, %558 : vector<16x16xf32>
    %cst_195 = arith.constant 9.99999974E-6 : f32
    %560 = vector.broadcast %cst_195 : f32 to vector<16x1xf32>
    %561 = arith.addf %557, %560 : vector<16x1xf32>
    %562 = math.rsqrt %561 : vector<16x1xf32>
    %563 = vector.broadcast %562 : vector<16x1xf32> to vector<16x16xf32>
    %564 = arith.mulf %559, %563 : vector<16x16xf32>
    %565 = vector.broadcast %545 : vector<1x16xf32> to vector<16x16xf32>
    %566 = arith.mulf %564, %565 : vector<16x16xf32>
    %567 = vector.broadcast %546 : vector<1x16xf32> to vector<16x16xf32>
    %568 = arith.addf %566, %567 : vector<16x16xf32>
    %cst_196 = arith.constant 0.000000e+00 : f32
    %569 = vector.broadcast %cst_196 : f32 to vector<2x12xf32>
    %570 = tpu.concatenate %294, %295, %298, %306, %307, %569 in 1 : vector<2x32xf32>, vector<2x32xf32>, vector<2x32xf32>, vector<2x2xf32>, vector<2x2xf32>, vector<2x12xf32> -> vector<2x112xf32>
    %571 = vector.shape_cast %570 : vector<2x112xf32> to vector<2x1x112xf32>
    %cst_197 = arith.constant 0.000000e+00 : f32
    %572 = vector.broadcast %cst_197 : f32 to vector<2x7x112xf32>
    %573 = tpu.concatenate %571, %572 in 1 : vector<2x1x112xf32>, vector<2x7x112xf32> -> vector<2x8x112xf32>
    %574 = vector.shape_cast %568 : vector<16x16xf32> to vector<2x8x16xf32>
    %575 = tpu.concatenate %574, %573 in 2 : vector<2x8x16xf32>, vector<2x8x112xf32> -> vector<2x8x128xf32>
    %c0_198 = arith.constant 0 : index
    %c0_199 = arith.constant 0 : index
    %c0_200 = arith.constant 0 : index
    %576 = vector.load %arg7[%c0_198, %c0_199, %c0_200] : memref<2x8x128xf32, #tpu.memory_space<vmem>>, vector<2x8x128xf32>
    tpu.vector_store %arg7[%c0_198, %c0_199, %c0_200], %575 {strides = array<i32>} : memref<2x8x128xf32, #tpu.memory_space<vmem>>, vector<2x8x128xf32>,
    return
  }
}

</mosaic_0001>

<bundles_post_ra>
// kernel: mcsfd_forward.1
= control target key start
LH: loop header
LB: loop body
LE: loop exit
PB: predicated region body
PF: predicated region fallthrough
CT: control target
= control target key end

     0   :  { %12 = vsyncpa [#allocation3], 0  ;;  %s10503_s0 = inlined_call_operand.vmem [shape: f32[2,8,16], index: 0, kind: input, shape index: {}]   ;;  %s10504_s1 = inlined_call_operand.vmem [shape: f32[2,8,8], index: 1, kind: input, shape index: {}]   ;;  %s10505_s2 = inlined_call_operand.vmem [shape: f32[4,32,96], index: 2, kind: input, shape index: {}]   ;;  %s10506_s3 = inlined_call_operand.hbm [shape: f32[4,32,32], index: 3, kind: input, shape index: {}]   ;;  %s10507_s4 = inlined_call_operand.hbm [shape: f32[4,32,64], index: 4, kind: input, shape index: {}]   ;;  %s10508_s5 = inlined_call_operand.vmem [shape: f32[4,64,32], index: 5, kind: input, shape index: {}]   ;;  %s10509_s6 = inlined_call_operand.vmem [shape: f32[160,128], index: 6, kind: input, shape index: {}]   ;;  %s10510_s7 = inlined_call_operand.vmem [shape: f32[2,8,128], index: 7, kind: output, shape index: {}]  }
   0x1   :  { %13 = vsyncpa [#allocation5], 0  ;;  %s9167_s24 = smov [#allocation2]  }
   0x2   :  { %s25_s25 = sshll.u32 %s9167_s24, 4  ;;  %s26_s25 = int_to_ptr.vmem [resolvable:$true] %s25_s25 }
   0x3   :  { %s9131_s26 = scalar_lea.vmem %s26_s25, 2048  ;;  %p9136_p1 = scmp.lt.s32.totalorder %s26_s25, %s26_s25 }
   0x4   :  { %p9132_p0 = scmp.ne.s32.totalorder %s26_s25, %s9131_s26  ;;  %p9137_p2 = scmp.lt.s32.totalorder %s9131_s26, %s9131_s26 }
   0x6   :  { %p9138_p3 = por %p9137_p2, %p9136_p1 }
   0x8   :  { %p9139_p4 = pnand %p9138_p3, %p9132_p0 }
   0xa   :  { %9142 = shalt.err (!%p9139_p4)
}
   0xb   :  { %s9168_s27 = smov 128   ;;  %s9169_s28 = smov 8  }
   0xc   :  { %31 = dma.hbm_to_vmem [thread:$0]  %s10506_s3, 2048, %s26_s25, [#allocation3], %s9168_s27, %s9168_s27, %s9169_s28  }
   0xd   :  { %s9170_s8 = smov [#allocation4]  }
   0xe   :  { %s37_s9 = sshll.u32 %s9170_s8, 4  ;;  %s38_s9 = int_to_ptr.vmem [resolvable:$true] %s37_s9 }
   0xf   :  { %s9151_s10 = scalar_lea.vmem %s38_s9, 2048  ;;  %p9156_p6 = scmp.lt.s32.totalorder %s38_s9, %s38_s9 }
  0x10   :  { %p9152_p5 = scmp.ne.s32.totalorder %s38_s9, %s9151_s10  ;;  %p9157_p7 = scmp.lt.s32.totalorder %s9151_s10, %s9151_s10 }
  0x12   :  { %p9158_p8 = por %p9157_p7, %p9156_p6 }
  0x14   :  { %p9159_p9 = pnand %p9158_p8, %p9152_p5 }
  0x16   :  { %9162 = shalt.err (!%p9159_p9)
}
  0x17   :  { %43 = dma.hbm_to_vmem [thread:$0]  %s10507_s4, 2048, %s38_s9, [#allocation5], %s9168_s27, %s9168_s27, %s9169_s28  }
  0x18   :  { %9163 = dma.done.wait [#allocation3], 2048  }
  0x19   :  { %9164 = vsyncadd [#allocation3], 4294965248 }
  0x1a   :  { %9165 = dma.done.wait [#allocation5], 2048  }
  0x1b   :  { %9166 = vsyncadd [#allocation5], 4294965248  ;;  %vm58_vm0 = vcmask 130048   ;;  %v57_v0 = vld [vmem:[%s10509_s6 + $0x8] sm:$0xff]  ;;  %v56_v1 = vld [vmem:[%s10509_s6] sm:$0xff]  ;;  %vm146_vm3 = vcmask 261120  }
  0x1c   :  { %v54_v2 = vld [vmem:[%s10503_s0] sm:$0xff]  ;;  %8360 = vmatprep.subr.mxu0 %v57_v0  ;;  %v168_v3 = vld [vmem:[%s10505_s2 + $0x18] sm:$0xff]  ;;  %v55_v4 = vld [vmem:[%s10503_s0 + $0x8] sm:$0xff]  ;;  %v9171_v15 = vmov 0.0   ;;  %s9172_s29 = smov 112   ;;  %s9173_s30 = smov 120  }
  0x1d   :  { %8364 = vmatprep.mubr.msk.f32.mxu0 %vm58_vm0, %v54_v2  ;;  %8361 = vmatpush3.msra.mxu0 %v57_v0  ;;  %v167_v5 = vld [vmem:[%s10505_s2 + $0x10] sm:$0xff]  ;;  %v166_v6 = vld [vmem:[%s10505_s2 + $0x8] sm:$0xff]  ;;  %v165_v7 = vld [vmem:[%s10505_s2] sm:$0xff]  ;;  %vm9174_vm4 = vmmov 0   ;;  %s9175_s8 = smov 104   ;;  %s9176_s9 = smov 96  }
  0x1e   :  { %8367 = vmatprep.subr.mxu1 %v168_v3  ;;  %8362 = vmatprep.subr.mxu0 %v56_v1  ;;  %v7894_v16 = vld [vmem:[%s10509_s6 + $0x70] ss:$0 sm:$0xff]  ;;  %vm271_vm5 = vcmask 64512   ;;  %v159_v34 = vld [vmem:[%s10504_s1] sm:$0xff]  ;;  %v160_v35 = vld [vmem:[%s10504_s1 + $0x8] sm:$0xff]  ;;  %s9178_s1 = smov 64  }
  0x1f   :  { %8368 = vmatpush3.msra.mxu1 %v168_v3  ;;  %8363 = vmatpush3.msra.mxu0 %v56_v1  ;;  %vm161_vm6 = vcmp.gt.f32.partialorder %v159_v34, 0.0  ;;  %v9177_v36 = vmov -1e+09   ;;  %vm162_vm7 = vcmp.gt.f32.partialorder %v160_v35, 0.0  ;;  %s9179_s13 = smov 16   ;;  %s9180_s14 = smov 24  }
  0x20   :  { %8365 = vmatmul.mubr.msk.f32.vlgmr.msra.gmra.mxu0 %vm58_vm0, %v55_v4  ;;  %8369 = vmatprep.subr.mxu1 %v167_v5  ;;  %v9373_v37 = vsel %vm161_vm6, 0.0, %v9177_v36  ;;  %v9376_v41 = vsel %vm162_vm7, 0.0, %v9177_v36  ;;  %vm1602_vm8 = vcmask 195584   ;;  %vm1843_vm9 = vcmask 523264   ;;  %s9182_s15 = smov 32  }
  0x21   :  { %8370 = vmatpush3.msra.mxu1 %v167_v5  ;;  %8378 = vmatprep.subr.mxu0 %v9171_v15  ;;  %vm3872_vm14 = vcmask 1041409   ;;  %vm3976_vm15 = vcmask 1043459   ;;  %vm7869_vm6 = vcmask 1040384  }
  0x22   :  { %8371 = vmatprep.subr.mxu1 %v166_v6  ;;  %8380 = vmatprep.mubr.msk.f32.mxu0 %vm9174_vm4, %v9171_v15 }
  0x23   :  { %8372 = vmatpush3.msra.mxu1 %v166_v6 }
  0x24   :  { %8373 = vmatprep.subr.mxu1 %v165_v7 }
  0x25   :  { %8374 = vmatpush3.msra.mxu1 %v165_v7 }
  0x26   :  { %8388 = vmatprep.subr.mxu1 %v9171_v15 }
  0xe0   :  { %v8366_v8 = vpop.f32.mrf.mxu0 }
  0xe1   :  { %v143_v9 = vmul.f32 0.01, %v8366_v8  ;;  %vm141_vm1 = vcmp.gt.f32.partialorder %v8366_v8, 0.0 }
  0xe2   :  { %v131_v10 = vpop.f32.mrf.mxu0 }
  0xe3   :  { %vm140_vm2 = vcmp.gt.f32.partialorder %v131_v10, 0.0  ;;  %v142_v11 = vmul.f32 0.01, %v131_v10  ;;  %v9262_v13 = vsel %vm141_vm1, %v8366_v8, %v143_v9  ;;  %vm3979_vm1 = vcmask 1041408  }
  0xe5   :  { %v9258_v12 = vsel %vm140_vm2, %v131_v10, %v142_v11  ;;  %vm7838_vm2 = vcmask 785408  }
  0xe6   :  { %8375 = vmatprep.mubr.msk.f32.mxu1 %vm146_vm3, %v9258_v12 }
  0xe7   :  { %8376 = vmatmul.mubr.msk.f32.vlgmr.msra.gmra.mxu1 %vm146_vm3, %v9262_v13 }
  0xe8   :  { %8390 = vmatprep.mubr.msk.f32.mxu1 %vm9174_vm4, %v9171_v15 }
 0x1a7   :  { %v8377_v14 = vpop.f32.mrf.mxu1 }
 0x1a8   :  { %v9281_v19 = vadd.f32 %v8377_v14, %v7894_v16 }
 0x1a9   :  { %v246_v17 = vpop.f32.mrf.mxu1 }
 0x1aa   :  { %v9271_v18 = vadd.f32 %v7894_v16, %v246_v17 }
 0x1ac   :  { %261 = vrot.lane.b32.xlu1 %v9271_v18, %s9172_s29  ;;  %257 = vrot.lane.b32.xlu0 %v9271_v18, %s9173_s30 }
 0x1b0   :  { %263 = vrot.lane.b32.xlu1 %v9281_v19, %s9172_s29  ;;  %259 = vrot.lane.b32.xlu0 %v9281_v19, %s9173_s30 }
 0x1b4   :  { %267 = vrot.lane.b32.xlu1 %v9281_v19, %s9175_s8  ;;  %265 = vrot.lane.b32.xlu0 %v9271_v18, %s9175_s8 }
 0x1b8   :  { %346 = vrot.lane.b32.xlu1 %v9281_v19, %s9176_s9  ;;  %269 = vrot.lane.b32.xlu0 %v9271_v18, %s9176_s9 }
 0x21e   :  { %v9295_v20 = vpop.permute.xlu1 %261  ;;  %v9297_v21 = vpop.permute.xlu0 %257 }
 0x21f   :  { %422 = vrot.lane.b32.xlu0 %v9297_v21, %s9176_s9 }
 0x222   :  { %v9301_v22 = vpop.permute.xlu1 %263  ;;  %v9303_v23 = vpop.permute.xlu0 %259 }
 0x223   :  { %574 = vrot.lane.b32.xlu0 %v9295_v20, %s9176_s9  ;;  %498 = vrot.lane.b32.xlu1 %v9303_v23, %s9176_s9 }
 0x226   :  { %v9309_v24 = vpop.permute.xlu0 %265  ;;  %v9315_v25 = vpop.permute.xlu1 %267 }
 0x227   :  { %650 = vrot.lane.b32.xlu1 %v9301_v22, %s9176_s9  ;;  %726 = vrot.lane.b32.xlu0 %v9309_v24, %s9176_s9 }
 0x22a   :  { %v270_v26 = vpop.permute.xlu0 %269  ;;  %v347_v27 = vpop.permute.xlu1 %346 }
 0x22b   :  { %802 = vrot.lane.b32.xlu1 %v9315_v25, %s9176_s9  ;;  %8379 = vmatpush3.xpose.msk.msra.mxu0 %vm271_vm5, %v270_v26 }
 0x22c   :  { %8383 = vmatprep.subr.mxu0 %v9171_v15 }
 0x22e   :  { %8381 = vmatmul.mubr.msk.f32.vlgmr.msra.gmra.mxu0 %vm271_vm5, %v9271_v18 }
 0x22f   :  { %8384 = vmatpush3.xpose.msk.msra.mxu0 %vm271_vm5, %v347_v27  ;;  %8385 = vmatprep.mubr.msk.f32.mxu0 %vm9174_vm4, %v9171_v15 }
 0x230   :  { %8393 = vmatprep.subr.mxu0 %v9171_v15 }
 0x232   :  { %8386 = vmatmul.mubr.msk.f32.vlgmr.msra.gmra.mxu0 %vm271_vm5, %v9281_v19 }
 0x233   :  { %8395 = vmatprep.mubr.msk.f32.mxu0 %vm9174_vm4, %v9171_v15 }
 0x291   :  { %v423_v28 = vpop.permute.xlu0 %422 }
 0x292   :  { %8389 = vmatpush3.xpose.msk.msra.mxu1 %vm271_vm5, %v423_v28 }
 0x293   :  { %8398 = vmatprep.subr.mxu1 %v9171_v15 }
 0x295   :  { %v499_v29 = vpop.permute.xlu1 %498  ;;  %8391 = vmatmul.mubr.msk.f32.vlgmr.msra.gmra.mxu1 %vm271_vm5, %v9297_v21  ;;  %v575_v30 = vpop.permute.xlu0 %574 }
 0x296   :  { %8394 = vmatpush3.xpose.msk.msra.mxu0 %vm271_vm5, %v499_v29  ;;  %8399 = vmatpush3.xpose.msk.msra.mxu1 %vm271_vm5, %v575_v30 }
 0x297   :  { %8400 = vmatprep.mubr.msk.f32.mxu1 %vm9174_vm4, %v9171_v15  ;;  %8403 = vmatprep.subr.mxu0 %v9171_v15 }
 0x298   :  { %8408 = vmatprep.subr.mxu1 %v9171_v15 }
 0x299   :  { %v651_v31 = vpop.permute.xlu1 %650  ;;  %8396 = vmatmul.mubr.msk.f32.vlgmr.msra.gmra.mxu0 %vm271_vm5, %v9303_v23  ;;  %8401 = vmatmul.mubr.msk.f32.vlgmr.msra.gmra.mxu1 %vm271_vm5, %v9295_v20  ;;  %v727_v32 = vpop.permute.xlu0 %726 }
 0x29a   :  { %8404 = vmatpush3.xpose.msk.msra.mxu0 %vm271_vm5, %v651_v31  ;;  %8409 = vmatpush3.xpose.msk.msra.mxu1 %vm271_vm5, %v727_v32 }
 0x29b   :  { %8405 = vmatprep.mubr.msk.f32.mxu0 %vm9174_vm4, %v9171_v15  ;;  %8410 = vmatprep.mubr.msk.f32.mxu1 %vm9174_vm4, %v9171_v15 }
 0x29c   :  { %8413 = vmatprep.subr.mxu0 %v9171_v15  ;;  %8418 = vmatprep.subr.mxu1 %v9171_v15 }
 0x29d   :  { %v803_v33 = vpop.permute.xlu1 %802  ;;  %8406 = vmatmul.mubr.msk.f32.vlgmr.msra.gmra.mxu0 %vm271_vm5, %v9301_v22  ;;  %8411 = vmatmul.mubr.msk.f32.vlgmr.msra.gmra.mxu1 %vm271_vm5, %v9309_v24 }
 0x29e   :  { %8414 = vmatpush3.xpose.msk.msra.mxu0 %vm271_vm5, %v803_v33  ;;  %8415 = vmatprep.mubr.msk.f32.mxu0 %vm9174_vm4, %v9171_v15 }
 0x29f   :  { %8423 = vmatprep.subr.mxu0 %v9171_v15  ;;  %8420 = vmatprep.mubr.msk.f32.mxu1 %vm9174_vm4, %v9171_v15 }
 0x2a1   :  { %8416 = vmatmul.mubr.msk.f32.vlgmr.msra.gmra.mxu0 %vm271_vm5, %v9315_v25 }
 0x2a2   :  { %8425 = vmatprep.mubr.msk.f32.mxu0 %vm9174_vm4, %v9171_v15 }
 0x2ee   :  { %v342_v38 = vpop.f32.mrf.mxu0 }
 0x2ef   :  { %v343_v39 = vadd.f32 %v342_v38, %v9373_v37 }
 0x2f0   :  { %v8382_v40 = vpop.f32.mrf.mxu0 }
 0x2f1   :  { %v878_v42 = vsel %vm271_vm5, %v343_v39, -inf }
 0x2f2   :  { %879 = vmax.xlane.f32.xlu0 %v878_v42  ;;  %v418_v43 = vpop.f32.mrf.mxu0 }
 0x2f3   :  { %v419_v44 = vadd.f32 %v418_v43, %v9376_v41 }
 0x2f4   :  { %v8387_v45 = vpop.f32.mrf.mxu0 }
 0x2f5   :  { %v881_v46 = vsel %vm271_vm5, %v419_v44, -inf }
 0x2f6   :  { %882 = vmax.xlane.f32.xlu1 %v881_v46 }
 0x355   :  { %v494_v47 = vpop.f32.mrf.mxu1 }
 0x356   :  { %v495_v48 = vadd.f32 %v494_v47, %v9373_v37 }
 0x357   :  { %v8392_v49 = vpop.f32.mrf.mxu1 }
 0x358   :  { %v884_v50 = vsel %vm271_vm5, %v495_v48, -inf }
 0x359   :  { %v570_v51 = vpop.f32.mrf.mxu0  ;;  %885 = vmax.xlane.f32.xlu0 %v884_v50  ;;  %v646_v52 = vpop.f32.mrf.mxu1 }
 0x35a   :  { %v571_v53 = vadd.f32 %v570_v51, %v9376_v41  ;;  %v647_v54 = vadd.f32 %v646_v52, %v9373_v37 }
 0x35b   :  { %v8397_v55 = vpop.f32.mrf.mxu0  ;;  %v8402_v56 = vpop.f32.mrf.mxu1 }
 0x35c   :  { %v887_v57 = vsel %vm271_vm5, %v571_v53, -inf  ;;  %v890_v58 = vsel %vm271_vm5, %v647_v54, -inf }
 0x35d   :  { %v722_v59 = vpop.f32.mrf.mxu0  ;;  %888 = vmax.xlane.f32.xlu0 %v887_v57  ;;  %891 = vmax.xlane.f32.xlu1 %v890_v58  ;;  %v798_v60 = vpop.f32.mrf.mxu1 }
 0x35e   :  { %v723_v61 = vadd.f32 %v722_v59, %v9376_v41  ;;  %v799_v62 = vadd.f32 %v798_v60, %v9373_v37 }
 0x35f   :  { %v8407_v63 = vpop.f32.mrf.mxu0  ;;  %v8412_v0 = vpop.f32.mrf.mxu1 }
 0x360   :  { %v893_v1 = vsel %vm271_vm5, %v723_v61, -inf  ;;  %v896_v2 = vsel %vm271_vm5, %v799_v62, -inf }
 0x361   :  { %v874_v3 = vpop.f32.mrf.mxu0  ;;  %894 = vmax.xlane.f32.xlu0 %v893_v1  ;;  %897 = vmax.xlane.f32.xlu1 %v896_v2 }
 0x362   :  { %v875_v4 = vadd.f32 %v874_v3, %v9376_v41 }
 0x363   :  { %v8417_v5 = vpop.f32.mrf.mxu0 }
 0x364   :  { %v899_v6 = vsel %vm271_vm5, %v875_v4, -inf }
 0x365   :  { %900 = vmax.xlane.f32.xlu0 %v899_v6 }
 0x372   :  { %966 = vrot.lane.b32.xlu1 %v9271_v18, %s9178_s1 }
 0x376   :  { %1118 = vrot.lane.b32.xlu1 %v9297_v21, %s9178_s1 }
 0x37a   :  { %1194 = vrot.lane.b32.xlu1 %v9303_v23, %s9178_s1 }
 0x37b   :  { %1042 = vrot.lane.b32.xlu0 %v9281_v19, %s9178_s1  ;;  %v880_v9 = vpop.xlane.xlu0 %879 }
 0x37c   :  { %v902_v10 = vsub.f32 %v343_v39, %v880_v9 }
 0x37e   :  { %1346 = vrot.lane.b32.xlu1 %v9301_v22, %s9178_s1  ;;  %v910_v14 = vmul.f32 1.442695, %v902_v10 }
 0x37f   :  { %1270 = vrot.lane.b32.xlu0 %v9295_v20, %s9178_s1  ;;  %v883_v7 = vpop.xlane.xlu1 %882 }
 0x380   :  { %v903_v8 = vsub.f32 %v419_v44, %v883_v7 }
 0x382   :  { %v912_v11 = vmul.f32 1.442695, %v903_v8 }
 0x384   :  { %8947 = vpow2.f32 %v912_v11 }
 0x385   :  { %8949 = vpow2.f32 %v910_v14 }
 0x391   :  { %v9405_v16 = vpop.eup %8947 }
 0x392   :  { %v929_v17 = vsel %vm271_vm5, %v9405_v16, 0.0  ;;  %v9409_v18 = vpop.eup %8949 }
 0x393   :  { %v926_v19 = vsel %vm271_vm5, %v9409_v18, 0.0 }
 0x39e   :  { %930 = vadd.xlane.f32.xlu0 %v929_v17 }
 0x3a2   :  { %927 = vadd.xlane.f32.xlu1 %v926_v19 }
 0x3e2   :  { %v886_v20 = vpop.xlane.xlu0 %885 }
 0x3e3   :  { %v904_v21 = vsub.f32 %v495_v48, %v886_v20 }
 0x3e5   :  { %v914_v22 = vmul.f32 1.442695, %v904_v21 }
 0x3e6   :  { %v892_v23 = vpop.xlane.xlu1 %891  ;;  %v889_v26 = vpop.xlane.xlu0 %888 }
 0x3e7   :  { %8951 = vpow2.f32 %v914_v22  ;;  %v906_v27 = vsub.f32 %v647_v54, %v892_v23  ;;  %v905_v28 = vsub.f32 %v571_v53, %v889_v26 }
 0x3e9   :  { %v918_v29 = vmul.f32 1.442695, %v906_v27  ;;  %v916_v30 = vmul.f32 1.442695, %v905_v28 }
 0x3ea   :  { %v898_v31 = vpop.xlane.xlu1 %897  ;;  %v895_v32 = vpop.xlane.xlu0 %894 }
 0x3eb   :  { %8953 = vpow2.f32 %v918_v29  ;;  %v908_v33 = vsub.f32 %v799_v62, %v898_v31  ;;  %v907_v34 = vsub.f32 %v723_v61, %v895_v32  ;;  %v1608_v29 = vld [vmem:[#allocation2 + $0x18] sm:$0xff]  ;;  %v1606_v31 = vld [vmem:[#allocation2 + $0x8] sm:$0xff] }
 0x3ec   :  { %8955 = vpow2.f32 %v916_v30  ;;  %v1607_v30 = vld [vmem:[#allocation2 + $0x10] sm:$0xff] }
 0x3ed   :  { %v922_v35 = vmul.f32 1.442695, %v908_v33  ;;  %v920_v36 = vmul.f32 1.442695, %v907_v34  ;;  %v1605_v33 = vld [vmem:[#allocation2] sm:$0xff] }
 0x3ee   :  { %v967_v38 = vpop.permute.xlu1 %966  ;;  %v901_v39 = vpop.xlane.xlu0 %900 }
 0x3ef   :  { %8957 = vpow2.f32 %v922_v35  ;;  %v909_v40 = vsub.f32 %v875_v4, %v901_v39  ;;  %8419 = vmatpush3.msra.mxu1 %v967_v38 }
 0x3f0   :  { %8959 = vpow2.f32 %v920_v36  ;;  %8428 = vmatprep.subr.mxu1 %v9171_v15 }
 0x3f1   :  { %v924_v42 = vmul.f32 1.442695, %v909_v40 }
 0x3f2   :  { %v1043_v43 = vpop.permute.xlu0 %1042  ;;  %v1119_v56 = vpop.permute.xlu1 %1118 }
 0x3f3   :  { %8961 = vpow2.f32 %v924_v42  ;;  %8424 = vmatpush3.msra.mxu0 %v1043_v43 }
 0x3f4   :  { %v8952_v44 = vpop.eup %8951  ;;  %8433 = vmatprep.subr.mxu0 %v9171_v15 }
 0x3f5   :  { %v932_v45 = vsel %vm271_vm5, %v8952_v44, 0.0 }
 0x3f6   :  { %933 = vadd.xlane.f32.xlu1 %v932_v45  ;;  %v1195_v57 = vpop.permute.xlu1 %1194  ;;  %v1271_v58 = vpop.permute.xlu0 %1270 }
 0x3f8   :  { %v8954_v46 = vpop.eup %8953 }
 0x3f9   :  { %v8956_v47 = vpop.eup %8955  ;;  %v938_v48 = vsel %vm271_vm5, %v8954_v46, 0.0 }
 0x3fa   :  { %939 = vadd.xlane.f32.xlu1 %v938_v48  ;;  %v935_v49 = vsel %vm271_vm5, %v8956_v47, 0.0  ;;  %v1347_v59 = vpop.permute.xlu1 %1346 }
 0x3fb   :  { %936 = vadd.xlane.f32.xlu0 %v935_v49 }
 0x3fc   :  { %v8958_v50 = vpop.eup %8957 }
 0x3fd   :  { %v9418_v51 = vpop.eup %8959  ;;  %v944_v52 = vsel %vm271_vm5, %v8958_v50, 0.0 }
 0x3fe   :  { %945 = vadd.xlane.f32.xlu1 %v944_v52  ;;  %v941_v53 = vsel %vm271_vm5, %v9418_v51, 0.0 }
 0x3ff   :  { %942 = vadd.xlane.f32.xlu0 %v941_v53 }
 0x400   :  { %v9423_v54 = vpop.eup %8961 }
 0x401   :  { %v947_v55 = vsel %vm271_vm5, %v9423_v54, 0.0 }
 0x403   :  { %948 = vadd.xlane.f32.xlu0 %v947_v55 }
 0x40f   :  { %1498 = vrot.lane.b32.xlu1 %v9315_v25, %s9178_s1 }
 0x419   :  { %1422 = vrot.lane.b32.xlu0 %v9309_v24, %s9178_s1 }
 0x427   :  { %v931_v60 = vpop.xlane.xlu0 %930 }
 0x428   :  { %8963 = vrcp.f32 %v931_v60 }
 0x42b   :  { %v928_v61 = vpop.xlane.xlu1 %927 }
 0x42c   :  { %8965 = vrcp.f32 %v928_v61 }
 0x435   :  { %v8964_v62 = vpop.eup %8963 }
 0x436   :  { %v953_v63 = vmul.f32 %v8964_v62, %v9405_v16 }
 0x438   :  { %8426 = vmatmul.mubr.msk.f32.vlgmr.msra.gmra.mxu0 %vm271_vm5, %v953_v63 }
 0x439   :  { %v8966_v0 = vpop.eup %8965  ;;  %8434 = vmatpush3.msra.mxu0 %v1195_v57  ;;  %8435 = vmatprep.mubr.msk.f32.mxu0 %vm9174_vm4, %v9171_v15 }
 0x43a   :  { %v951_v24 = vmul.f32 %v8966_v0, %v9409_v18  ;;  %8443 = vmatprep.subr.mxu0 %v9171_v15 }
 0x43c   :  { %8421 = vmatmul.mubr.msk.f32.vlgmr.msra.gmra.mxu1 %vm271_vm5, %v951_v24 }
 0x43d   :  { %8429 = vmatpush3.msra.mxu1 %v1119_v56  ;;  %8430 = vmatprep.mubr.msk.f32.mxu1 %vm9174_vm4, %v9171_v15 }
 0x43e   :  { %8438 = vmatprep.subr.mxu1 %v9171_v15 }
 0x47f   :  { %v934_v25 = vpop.xlane.xlu1 %933 }
 0x480   :  { %8967 = vrcp.f32 %v934_v25 }
 0x483   :  { %v940_v1 = vpop.xlane.xlu1 %939 }
 0x484   :  { %8969 = vrcp.f32 %v940_v1  ;;  %v937_v2 = vpop.xlane.xlu0 %936 }
 0x485   :  { %8971 = vrcp.f32 %v937_v2 }
 0x487   :  { %v946_v3 = vpop.xlane.xlu1 %945 }
 0x488   :  { %8973 = vrcp.f32 %v946_v3  ;;  %v943_v4 = vpop.xlane.xlu0 %942 }
 0x489   :  { %8975 = vrcp.f32 %v943_v4 }
 0x48b   :  { %v1499_v20 = vpop.permute.xlu1 %1498 }
 0x48c   :  { %v949_v5 = vpop.xlane.xlu0 %948 }
 0x48d   :  { %v8968_v6 = vpop.eup %8967  ;;  %8977 = vrcp.f32 %v949_v5 }
 0x48e   :  { %v955_v7 = vmul.f32 %v8968_v6, %v8952_v44 }
 0x490   :  { %8431 = vmatmul.mubr.msk.f32.vlgmr.msra.gmra.mxu1 %vm271_vm5, %v955_v7  ;;  %v1423_v14 = vpop.permute.xlu0 %1422 }
 0x491   :  { %v8970_v8 = vpop.eup %8969  ;;  %8439 = vmatpush3.msra.mxu1 %v1271_v58  ;;  %8440 = vmatprep.mubr.msk.f32.mxu1 %vm9174_vm4, %v9171_v15 }
 0x492   :  { %v8972_v9 = vpop.eup %8971  ;;  %8448 = vmatprep.subr.mxu1 %v9171_v15  ;;  %v959_v10 = vmul.f32 %v8970_v8, %v8954_v46 }
 0x493   :  { %v957_v11 = vmul.f32 %v8972_v9, %v8956_v47 }
 0x494   :  { %8441 = vmatmul.mubr.msk.f32.vlgmr.msra.gmra.mxu1 %vm271_vm5, %v959_v10 }
 0x495   :  { %v8974_v16 = vpop.eup %8973  ;;  %8436 = vmatmul.mubr.msk.f32.vlgmr.msra.gmra.mxu0 %vm271_vm5, %v957_v11  ;;  %8449 = vmatpush3.msra.mxu1 %v1423_v14  ;;  %v1741_v14 = vld [vmem:[#allocation4 + $0x18] sm:$0xff] }
 0x496   :  { %v8976_v17 = vpop.eup %8975  ;;  %8444 = vmatpush3.msra.mxu0 %v1347_v59  ;;  %8445 = vmatprep.mubr.msk.f32.mxu0 %vm9174_vm4, %v9171_v15  ;;  %v963_v18 = vmul.f32 %v8974_v16, %v8958_v50  ;;  %v7921_v59 = vld [vmem:[%s10509_s6 + $0x78] ss:$0 sm:$0xff]  ;;  %v1740_v16 = vld [vmem:[#allocation4 + $0x10] sm:$0xff] }
 0x497   :  { %8450 = vmatprep.mubr.msk.f32.mxu1 %vm9174_vm4, %v9171_v15  ;;  %8453 = vmatprep.subr.mxu0 %v9171_v15  ;;  %v961_v19 = vmul.f32 %v8976_v17, %v9418_v51  ;;  %v1739_v17 = vld [vmem:[#allocation4 + $0x8] sm:$0xff] }
 0x498   :  { %8451 = vmatmul.mubr.msk.f32.vlgmr.msra.gmra.mxu1 %vm271_vm5, %v963_v18  ;;  %8458 = vmatprep.subr.mxu1 %v1608_v29  ;;  %v1738_v18 = vld [vmem:[#allocation4] sm:$0xff] }
 0x499   :  { %8446 = vmatmul.mubr.msk.f32.vlgmr.msra.gmra.mxu0 %vm271_vm5, %v961_v19  ;;  %8459 = vmatpush3.msra.mxu1 %v1608_v29  ;;  %v1837_v19 = vld [vmem:[%s10508_s5 + $0x38] sm:$0xff] }
 0x49a   :  { %v8978_v21 = vpop.eup %8977  ;;  %8454 = vmatpush3.msra.mxu0 %v1499_v20  ;;  %8455 = vmatprep.mubr.msk.f32.mxu0 %vm9174_vm4, %v9171_v15  ;;  %v1836_v20 = vld [vmem:[%s10508_s5 + $0x30] sm:$0xff] }
 0x49b   :  { %v965_v22 = vmul.f32 %v8978_v21, %v9423_v54  ;;  %8460 = vmatprep.subr.mxu1 %v1607_v30  ;;  %8469 = vmatprep.subr.mxu0 %v1741_v14  ;;  %v1835_v21 = vld [vmem:[%s10508_s5 + $0x28] sm:$0xff] }
 0x49c   :  { %8461 = vmatpush3.msra.mxu1 %v1607_v30 }
 0x49d   :  { %8456 = vmatmul.mubr.msk.f32.vlgmr.msra.gmra.mxu0 %vm271_vm5, %v965_v22  ;;  %8462 = vmatprep.subr.mxu1 %v1606_v31  ;;  %v1834_v22 = vld [vmem:[%s10508_s5 + $0x20] sm:$0xff] }
 0x49e   :  { %8463 = vmatpush3.msra.mxu1 %v1606_v31  ;;  %8470 = vmatpush3.msra.mxu0 %v1741_v14 }
 0x49f   :  { %8464 = vmatprep.subr.mxu1 %v1605_v33  ;;  %8471 = vmatprep.subr.mxu0 %v1740_v16 }
 0x4a0   :  { %8465 = vmatpush3.msra.mxu1 %v1605_v33  ;;  %8472 = vmatpush3.msra.mxu0 %v1740_v16 }
 0x4a1   :  { %8473 = vmatprep.subr.mxu0 %v1739_v17  ;;  %8480 = vmatprep.subr.mxu1 %v1837_v19 }
 0x4a2   :  { %8474 = vmatpush3.msra.mxu0 %v1739_v17 }
 0x4a3   :  { %8475 = vmatprep.subr.mxu0 %v1738_v18 }
 0x4a4   :  { %8476 = vmatpush3.msra.mxu0 %v1738_v18 }
 0x4f8   :  { %v1114_v23 = vpop.f32.mrf.mxu0 }
 0x4fa   :  { %v8427_v26 = vpop.f32.mrf.mxu0 }
 0x4fc   :  { %v1038_v27 = vpop.f32.mrf.mxu1 }
 0x4fe   :  { %v8422_v28 = vpop.f32.mrf.mxu1 }
 0x550   :  { %v1190_v32 = vpop.f32.mrf.mxu1 }
 0x551   :  { %1576 = vrot.lane.b32.xlu0 %v1190_v32, %s9169_s28  ;;  %v7924_v32 = vld [vmem:[%s10509_s6 + $0x7a] ss:$0 sm:$0xff] }
 0x552   :  { %v8432_v34 = vpop.f32.mrf.mxu1 }
 0x553   :  { %v7925_v34 = vld [vmem:[%s10509_s6 + $0x7b] ss:$0 sm:$0xff] }
 0x554   :  { %v1342_v35 = vpop.f32.mrf.mxu1 }
 0x555   :  { %v1266_v36 = vpop.f32.mrf.mxu0  ;;  %1584 = vrot.lane.b32.xlu0 %v1342_v35, %s9179_s13 }
 0x556   :  { %1578 = vrot.lane.b32.xlu1 %v1266_v36, %s9169_s28  ;;  %v8442_v38 = vpop.f32.mrf.mxu1 }
 0x557   :  { %v8437_v39 = vpop.f32.mrf.mxu0 }
 0x558   :  { %v1494_v40 = vpop.f32.mrf.mxu1 }
 0x559   :  { %v1418_v42 = vpop.f32.mrf.mxu0  ;;  %1592 = vrot.lane.b32.xlu0 %v1494_v40, %s9180_s14 }
 0x55a   :  { %1586 = vrot.lane.b32.xlu1 %v1418_v42, %s9179_s13  ;;  %v8452_v43 = vpop.f32.mrf.mxu1 }
 0x55b   :  { %v8447_v44 = vpop.f32.mrf.mxu0  ;;  %v1833_v43 = vld [vmem:[%s10508_s5 + $0x18] sm:$0xff] }
 0x55c   :  { %v1832_v44 = vld [vmem:[%s10508_s5 + $0x10] sm:$0xff] }
 0x55d   :  { %v1570_v45 = vpop.f32.mrf.mxu0 }
 0x55e   :  { %1594 = vrot.lane.b32.xlu1 %v1570_v45, %s9180_s14  ;;  %v1831_v45 = vld [vmem:[%s10508_s5 + $0x8] sm:$0xff] }
 0x55f   :  { %v8457_v46 = vpop.f32.mrf.mxu0 }
 0x560   :  { %v1830_v46 = vld [vmem:[%s10508_s5] sm:$0xff] }
 0x5c3   :  { %v1577_v47 = vpop.permute.xlu0 %1576 }
 0x5c4   :  { %v1598_v50 = vsel %vm271_vm5, %v1038_v27, %v1577_v47  ;;  %v7926_v47 = vld [vmem:[%s10509_s6 + $0x74] ss:$0 sm:$0xff] }
 0x5c7   :  { %v1585_v48 = vpop.permute.xlu0 %1584 }
 0x5c8   :  { %v1579_v49 = vpop.permute.xlu1 %1578  ;;  %v1600_v51 = vsel %vm58_vm0, %v1598_v50, %v1585_v48 }
 0x5c9   :  { %v1599_v55 = vsel %vm271_vm5, %v1114_v23, %v1579_v49 }
 0x5cb   :  { %v1593_v52 = vpop.permute.xlu0 %1592 }
 0x5cc   :  { %v1587_v53 = vpop.permute.xlu1 %1586  ;;  %v1603_v54 = vsel %vm1602_vm8, %v1600_v51, %v1593_v52 }
 0x5cd   :  { %8466 = vmatprep.mubr.msk.f32.mxu1 %vm146_vm3, %v1603_v54  ;;  %v1601_v56 = vsel %vm58_vm0, %v1599_v55, %v1587_v53  ;;  %v7929_v54 = vld [vmem:[%s10509_s6 + $0x79] ss:$0 sm:$0xff] }
 0x5d0   :  { %v1595_v57 = vpop.permute.xlu1 %1594 }
 0x5d1   :  { %v1604_v58 = vsel %vm1602_vm8, %v1601_v56, %v1595_v57 }
 0x5d2   :  { %8467 = vmatmul.mubr.msk.f32.vlgmr.msra.gmra.mxu1 %vm146_vm3, %v1604_v58 }
 0x5d3   :  { %8481 = vmatpush3.msra.mxu1 %v1837_v19 }
 0x5d4   :  { %8482 = vmatprep.subr.mxu1 %v1836_v20 }
 0x5d5   :  { %8483 = vmatpush3.msra.mxu1 %v1836_v20 }
 0x5d6   :  { %8484 = vmatprep.subr.mxu1 %v1835_v21 }
 0x5d7   :  { %8485 = vmatpush3.msra.mxu1 %v1835_v21  ;;  %v7932_v21 = vld [vmem:[%s10509_s6 + $0x7c] ss:$0 sm:$0xff] }
 0x5d8   :  { %8486 = vmatprep.subr.mxu1 %v1834_v22 }
 0x5d9   :  { %8487 = vmatpush3.msra.mxu1 %v1834_v22 }
 0x5da   :  { %8488 = vmatprep.subr.mxu1 %v1833_v43 }
 0x5db   :  { %8489 = vmatpush3.msra.mxu1 %v1833_v43 }
 0x5dc   :  { %8490 = vmatprep.subr.mxu1 %v1832_v44 }
 0x5dd   :  { %8491 = vmatpush3.msra.mxu1 %v1832_v44 }
 0x5de   :  { %8492 = vmatprep.subr.mxu1 %v1831_v45 }
 0x5df   :  { %8493 = vmatpush3.msra.mxu1 %v1831_v45 }
 0x5e0   :  { %8494 = vmatprep.subr.mxu1 %v1830_v46 }
 0x5e1   :  { %8495 = vmatpush3.msra.mxu1 %v1830_v46 }
 0x5e2   :  { %8520 = vmatprep.subr.mxu1 %v9171_v15 }
 0x692   :  { %v8468_v60 = vpop.f32.mrf.mxu1 }
 0x693   :  { %v1692_v61 = vadd.f32 %v8468_v60, %v7921_v59 }
 0x694   :  { %v1686_v62 = vpop.f32.mrf.mxu1 }
 0x695   :  { %v1687_v63 = vadd.f32 %v7921_v59, %v1686_v62  ;;  %v1696_v0 = vadd.f32 %v1692_v61, %v9262_v13 }
 0x697   :  { %v1702_v24 = vsel %vm146_vm3, %v1696_v0, 0.0  ;;  %v1695_v25 = vadd.f32 %v1687_v63, %v9258_v12 }
 0x698   :  { %1703 = vadd.xlane.f32.xlu1 %v1702_v24 }
 0x699   :  { %v1699_v1 = vsel %vm146_vm3, %v1695_v25, 0.0 }
 0x69a   :  { %1700 = vadd.xlane.f32.xlu0 %v1699_v1 }
 0x721   :  { %v1704_v2 = vpop.xlane.xlu1 %1703 }
 0x722   :  { %v1707_v3 = vmul.f32 0.03125, %v1704_v2 }
 0x723   :  { %v1701_v4 = vpop.xlane.xlu0 %1700 }
 0x724   :  { %v1706_v5 = vmul.f32 0.03125, %v1701_v4  ;;  %v1709_v6 = vsub.f32 %v1696_v0, %v1707_v3 }
 0x726   :  { %v1708_v7 = vsub.f32 %v1695_v25, %v1706_v5  ;;  %v1711_v10 = vmul.f32 %v1709_v6, %v1709_v6 }
 0x728   :  { %v1710_v8 = vmul.f32 %v1708_v7, %v1708_v7  ;;  %v1715_v11 = vsel %vm146_vm3, %v1711_v10, 0.0  ;;  %v7934_v10 = vld [vmem:[%s10505_s2 + $0x20] sm:$0xff] }
 0x72a   :  { %v1712_v9 = vsel %vm146_vm3, %v1710_v8, 0.0  ;;  %v7936_v8 = vld [vmem:[%s10505_s2 + $0x30] sm:$0xff] }
 0x72b   :  { %1713 = vadd.xlane.f32.xlu0 %v1712_v9  ;;  %v7935_v9 = vld [vmem:[%s10505_s2 + $0x28] sm:$0xff] }
 0x72f   :  { %1716 = vadd.xlane.f32.xlu0 %v1715_v11 }
 0x7b4   :  { %v1714_v23 = vpop.xlane.xlu0 %1713 }
 0x7b5   :  { %v1718_v26 = vmul.f32 0.03125, %v1714_v23 }
 0x7b7   :  { %v1720_v27 = vadd.f32 1e-05, %v1718_v26 }
 0x7b8   :  { %v1717_v28 = vpop.xlane.xlu0 %1716 }
 0x7b9   :  { %8979 = vrsqrt.f32 %v1720_v27  ;;  %v1719_v29 = vmul.f32 0.03125, %v1717_v28  ;;  %v7933_v28 = vld [vmem:[%s10509_s6 + $0x7d] ss:$0 sm:$0xff] }
 0x7bb   :  { %v1721_v30 = vadd.f32 1e-05, %v1719_v29 }
 0x7bd   :  { %8981 = vrsqrt.f32 %v1721_v30 }
 0x7c6   :  { %v8980_v31 = vpop.eup %8979 }
 0x7c7   :  { %v1724_v33 = vmul.f32 %v8980_v31, %v1708_v7  ;;  %v7937_v7 = vld [vmem:[%s10505_s2 + $0x38] sm:$0xff] }
 0x7c8   :  { %8499 = vmatprep.subr.mxu0 %v7937_v7 }
 0x7c9   :  { %v1730_v35 = vmul.f32 %v7924_v32, %v1724_v33 }
 0x7ca   :  { %v8982_v36 = vpop.eup %8981 }
 0x7cb   :  { %v1725_v38 = vmul.f32 %v8982_v36, %v1709_v6  ;;  %v1736_v39 = vadd.f32 %v7925_v34, %v1730_v35 }
 0x7cd   :  { %v1731_v40 = vmul.f32 %v7924_v32, %v1725_v38  ;;  %8477 = vmatprep.mubr.msk.f32.mxu0 %vm146_vm3, %v1736_v39  ;;  %v7938_v32 = vld [vmem:[%s10509_s6 + $0x71] ss:$0 sm:$0xff] }
 0x7cf   :  { %v1737_v42 = vadd.f32 %v7925_v34, %v1731_v40 }
 0x7d1   :  { %8478 = vmatmul.mubr.msk.f32.vlgmr.msra.gmra.mxu0 %vm146_vm3, %v1737_v42 }
 0x7d2   :  { %8500 = vmatpush3.msra.mxu0 %v7937_v7 }
 0x7d3   :  { %8501 = vmatprep.subr.mxu0 %v7936_v8 }
 0x7d4   :  { %8502 = vmatpush3.msra.mxu0 %v7936_v8 }
 0x7d5   :  { %8503 = vmatprep.subr.mxu0 %v7935_v9 }
 0x7d6   :  { %8504 = vmatpush3.msra.mxu0 %v7935_v9 }
 0x7d7   :  { %8505 = vmatprep.subr.mxu0 %v7934_v10 }
 0x7d8   :  { %8506 = vmatpush3.msra.mxu0 %v7934_v10 }
 0x7d9   :  { %8510 = vmatprep.subr.mxu0 %v9171_v15 }
 0x891   :  { %v8479_v48 = vpop.f32.mrf.mxu0 }
 0x892   :  { %v1825_v49 = vadd.f32 %v8479_v48, %v7926_v47 }
 0x893   :  { %v1819_v50 = vpop.f32.mrf.mxu0 }
 0x894   :  { %v1820_v51 = vadd.f32 %v7926_v47, %v1819_v50  ;;  %v1829_v53 = vmax.f32 %v1825_v49, 0.0 }
 0x896   :  { %v1828_v52 = vmax.f32 %v1820_v51, 0.0 }
 0x898   :  { %8496 = vmatprep.mubr.msk.f32.mxu1 %vm1843_vm9, %v1828_v52 }
 0x899   :  { %8497 = vmatmul.mubr.msk.f32.vlgmr.msra.gmra.mxu1 %vm1843_vm9, %v1829_v53 }
 0x89a   :  { %8522 = vmatprep.mubr.msk.f32.mxu1 %vm9174_vm4, %v9171_v15 }
 0x959   :  { %v8498_v55 = vpop.f32.mrf.mxu1 }
 0x95a   :  { %v1922_v56 = vadd.f32 %v8498_v55, %v7929_v54 }
 0x95b   :  { %v1916_v57 = vpop.f32.mrf.mxu1 }
 0x95c   :  { %v1917_v58 = vadd.f32 %v7929_v54, %v1916_v57  ;;  %v1926_v59 = vadd.f32 %v1922_v56, %v1737_v42 }
 0x95e   :  { %v1932_v60 = vsel %vm146_vm3, %v1926_v59, 0.0  ;;  %v1925_v61 = vadd.f32 %v1917_v58, %v1736_v39 }
 0x95f   :  { %1933 = vadd.xlane.f32.xlu0 %v1932_v60 }
 0x960   :  { %v1929_v62 = vsel %vm146_vm3, %v1925_v61, 0.0 }
 0x961   :  { %1930 = vadd.xlane.f32.xlu1 %v1929_v62 }
 0x9e8   :  { %v1934_v63 = vpop.xlane.xlu0 %1933 }
 0x9e9   :  { %v1936_v0 = vmul.f32 0.03125, %v1934_v63 }
 0x9ea   :  { %v1931_v24 = vpop.xlane.xlu1 %1930 }
 0x9eb   :  { %v1938_v25 = vsub.f32 %v1926_v59, %v1936_v0  ;;  %v1935_v1 = vmul.f32 0.03125, %v1931_v24 }
 0x9ed   :  { %v1937_v2 = vsub.f32 %v1925_v61, %v1935_v1  ;;  %v1940_v3 = vmul.f32 %v1938_v25, %v1938_v25 }
 0x9ef   :  { %v1944_v4 = vsel %vm146_vm3, %v1940_v3, 0.0  ;;  %v1939_v5 = vmul.f32 %v1937_v2, %v1937_v2 }
 0x9f0   :  { %1945 = vadd.xlane.f32.xlu0 %v1944_v4 }
 0x9f1   :  { %v1941_v6 = vsel %vm146_vm3, %v1939_v5, 0.0 }
 0x9f2   :  { %1942 = vadd.xlane.f32.xlu1 %v1941_v6 }
 0xa79   :  { %v1946_v11 = vpop.xlane.xlu0 %1945 }
 0xa7a   :  { %v1948_v14 = vmul.f32 0.03125, %v1946_v11 }
 0xa7b   :  { %v1943_v16 = vpop.xlane.xlu1 %1942 }
 0xa7c   :  { %v1950_v17 = vadd.f32 1e-05, %v1948_v14  ;;  %v1947_v18 = vmul.f32 0.03125, %v1943_v16 }
 0xa7e   :  { %8983 = vrsqrt.f32 %v1950_v17  ;;  %v1949_v19 = vadd.f32 1e-05, %v1947_v18 }
 0xa80   :  { %8985 = vrsqrt.f32 %v1949_v19 }
 0xa8b   :  { %v8984_v20 = vpop.eup %8983 }
 0xa8c   :  { %v1954_v22 = vmul.f32 %v8984_v20, %v1938_v25 }
 0xa8d   :  { %v8986_v23 = vpop.eup %8985 }
 0xa8e   :  { %v1953_v26 = vmul.f32 %v8986_v23, %v1937_v2  ;;  %v1960_v27 = vmul.f32 %v7932_v21, %v1954_v22 }
 0xa90   :  { %v1959_v29 = vmul.f32 %v7932_v21, %v1953_v26  ;;  %v9550_v31 = vadd.f32 %v7933_v28, %v1960_v27 }
 0xa92   :  { %v9548_v30 = vadd.f32 %v7933_v28, %v1959_v29 }
 0xa94   :  { %8507 = vmatprep.mubr.msk.f32.mxu0 %vm146_vm3, %v9548_v30 }
 0xa95   :  { %8508 = vmatmul.mubr.msk.f32.vlgmr.msra.gmra.mxu0 %vm146_vm3, %v9550_v31 }
 0xa96   :  { %8512 = vmatprep.mubr.msk.f32.mxu0 %vm9174_vm4, %v9171_v15 }
 0xb55   :  { %v8509_v33 = vpop.f32.mrf.mxu0 }
 0xb56   :  { %v9561_v34 = vadd.f32 %v8509_v33, %v7938_v32 }
 0xb57   :  { %v2049_v35 = vpop.f32.mrf.mxu0 }
 0xb58   :  { %v9563_v36 = vadd.f32 %v7938_v32, %v2049_v35  ;;  %2062 = vrot.lane.b32.xlu0 %v9561_v34, %s9173_s30 }
 0xb5a   :  { %2060 = vrot.lane.b32.xlu1 %v9563_v36, %s9173_s30 }
 0xb5c   :  { %2068 = vrot.lane.b32.xlu0 %v9563_v36, %s9175_s8 }
 0xb5e   :  { %2064 = vrot.lane.b32.xlu1 %v9563_v36, %s9172_s29 }
 0xb60   :  { %2072 = vrot.lane.b32.xlu0 %v9563_v36, %s9176_s9 }
 0xb62   :  { %2066 = vrot.lane.b32.xlu1 %v9561_v34, %s9172_s29 }
 0xb66   :  { %2070 = vrot.lane.b32.xlu1 %v9561_v34, %s9175_s8 }
 0xb6a   :  { %2148 = vrot.lane.b32.xlu1 %v9561_v34, %s9176_s9 }
 0xbca   :  { %v9581_v38 = vpop.permute.xlu0 %2062 }
 0xbcb   :  { %2300 = vrot.lane.b32.xlu1 %v9581_v38, %s9176_s9 }
 0xbcc   :  { %v9585_v39 = vpop.permute.xlu1 %2060 }
 0xbcd   :  { %2224 = vrot.lane.b32.xlu0 %v9585_v39, %s9176_s9 }
 0xbce   :  { %v9589_v40 = vpop.permute.xlu0 %2068 }
 0xbd0   :  { %v9591_v42 = vpop.permute.xlu1 %2064 }
 0xbd1   :  { %2376 = vrot.lane.b32.xlu0 %v9591_v42, %s9176_s9 }
 0xbd2   :  { %v2073_v43 = vpop.permute.xlu0 %2072 }
 0xbd3   :  { %8511 = vmatpush3.xpose.msk.msra.mxu0 %vm271_vm5, %v2073_v43 }
 0xbd4   :  { %v9596_v44 = vpop.permute.xlu1 %2066  ;;  %8515 = vmatprep.subr.mxu0 %v9171_v15 }
 0xbd5   :  { %2528 = vrot.lane.b32.xlu0 %v9589_v40, %s9176_s9  ;;  %2452 = vrot.lane.b32.xlu1 %v9596_v44, %s9176_s9 }
 0xbd6   :  { %8513 = vmatmul.mubr.msk.f32.vlgmr.msra.gmra.mxu0 %vm271_vm5, %v9563_v36 }
 0xbd7   :  { %8517 = vmatprep.mubr.msk.f32.mxu0 %vm9174_vm4, %v9171_v15 }
 0xbd8   :  { %v9607_v45 = vpop.permute.xlu1 %2070 }
 0xbd9   :  { %2604 = vrot.lane.b32.xlu1 %v9607_v45, %s9176_s9 }
 0xbdc   :  { %v2149_v46 = vpop.permute.xlu1 %2148 }
 0xbdd   :  { %8516 = vmatpush3.xpose.msk.msra.mxu0 %vm271_vm5, %v2149_v46 }
 0xbde   :  { %8525 = vmatprep.subr.mxu0 %v9171_v15 }
 0xbe0   :  { %8518 = vmatmul.mubr.msk.f32.vlgmr.msra.gmra.mxu0 %vm271_vm5, %v9561_v34 }
 0xbe1   :  { %8527 = vmatprep.mubr.msk.f32.mxu0 %vm9174_vm4, %v9171_v15 }
 0xc3d   :  { %v2301_v47 = vpop.permute.xlu1 %2300 }
 0xc3e   :  { %8526 = vmatpush3.xpose.msk.msra.mxu0 %vm271_vm5, %v2301_v47 }
 0xc3f   :  { %v2225_v48 = vpop.permute.xlu0 %2224  ;;  %8535 = vmatprep.subr.mxu0 %v9171_v15 }
 0xc40   :  { %8521 = vmatpush3.xpose.msk.msra.mxu1 %vm271_vm5, %v2225_v48 }
 0xc41   :  { %8528 = vmatmul.mubr.msk.f32.vlgmr.msra.gmra.mxu0 %vm271_vm5, %v9581_v38  ;;  %8530 = vmatprep.subr.mxu1 %v9171_v15 }
 0xc42   :  { %8537 = vmatprep.mubr.msk.f32.mxu0 %vm9174_vm4, %v9171_v15 }
 0xc43   :  { %8523 = vmatmul.mubr.msk.f32.vlgmr.msra.gmra.mxu1 %vm271_vm5, %v9585_v39  ;;  %v2377_v49 = vpop.permute.xlu0 %2376 }
 0xc44   :  { %8531 = vmatpush3.xpose.msk.msra.mxu1 %vm271_vm5, %v2377_v49  ;;  %8532 = vmatprep.mubr.msk.f32.mxu1 %vm9174_vm4, %v9171_v15 }
 0xc45   :  { %8540 = vmatprep.subr.mxu1 %v9171_v15 }
 0xc47   :  { %8533 = vmatmul.mubr.msk.f32.vlgmr.msra.gmra.mxu1 %vm271_vm5, %v9591_v42  ;;  %v2529_v50 = vpop.permute.xlu0 %2528  ;;  %v2453_v51 = vpop.permute.xlu1 %2452 }
 0xc48   :  { %8536 = vmatpush3.xpose.msk.msra.mxu0 %vm271_vm5, %v2453_v51  ;;  %8541 = vmatpush3.xpose.msk.msra.mxu1 %vm271_vm5, %v2529_v50 }
 0xc49   :  { %8542 = vmatprep.mubr.msk.f32.mxu1 %vm9174_vm4, %v9171_v15  ;;  %8545 = vmatprep.subr.mxu0 %v9171_v15 }
 0xc4a   :  { %8550 = vmatprep.subr.mxu1 %v9171_v15 }
 0xc4b   :  { %8538 = vmatmul.mubr.msk.f32.vlgmr.msra.gmra.mxu0 %vm271_vm5, %v9596_v44  ;;  %8543 = vmatmul.mubr.msk.f32.vlgmr.msra.gmra.mxu1 %vm271_vm5, %v9589_v40  ;;  %v2605_v52 = vpop.permute.xlu1 %2604 }
 0xc4c   :  { %8546 = vmatpush3.xpose.msk.msra.mxu0 %vm271_vm5, %v2605_v52  ;;  %8547 = vmatprep.mubr.msk.f32.mxu0 %vm9174_vm4, %v9171_v15 }
 0xc4d   :  { %8555 = vmatprep.subr.mxu0 %v9171_v15  ;;  %8552 = vmatprep.mubr.msk.f32.mxu1 %vm9174_vm4, %v9171_v15 }
 0xc4f   :  { %8548 = vmatmul.mubr.msk.f32.vlgmr.msra.gmra.mxu0 %vm271_vm5, %v9607_v45 }
 0xc50   :  { %8557 = vmatprep.mubr.msk.f32.mxu0 %vm9174_vm4, %v9171_v15 }
 0xc96   :  { %v2144_v53 = vpop.f32.mrf.mxu0 }
 0xc97   :  { %v2145_v54 = vadd.f32 %v2144_v53, %v9373_v37 }
 0xc98   :  { %v8514_v55 = vpop.f32.mrf.mxu0 }
 0xc99   :  { %v2680_v56 = vsel %vm271_vm5, %v2145_v54, -inf }
 0xc9a   :  { %2681 = vmax.xlane.f32.xlu0 %v2680_v56 }
 0xca0   :  { %v2220_v57 = vpop.f32.mrf.mxu0 }
 0xca1   :  { %v2221_v58 = vadd.f32 %v2220_v57, %v9376_v41 }
 0xca2   :  { %v8519_v59 = vpop.f32.mrf.mxu0 }
 0xca3   :  { %v2683_v60 = vsel %vm271_vm5, %v2221_v58, -inf }
 0xca4   :  { %2684 = vmax.xlane.f32.xlu1 %v2683_v60 }
 0xd01   :  { %v2372_v61 = vpop.f32.mrf.mxu0 }
 0xd02   :  { %v2373_v25 = vadd.f32 %v2372_v61, %v9376_v41 }
 0xd03   :  { %v2296_v62 = vpop.f32.mrf.mxu1  ;;  %v8529_v63 = vpop.f32.mrf.mxu0 }
 0xd04   :  { %v2297_v0 = vadd.f32 %v2296_v62, %v9373_v37  ;;  %v2689_v6 = vsel %vm271_vm5, %v2373_v25, -inf }
 0xd05   :  { %v8524_v24 = vpop.f32.mrf.mxu1 }
 0xd06   :  { %v2686_v1 = vsel %vm271_vm5, %v2297_v0, -inf }
 0xd07   :  { %2687 = vmax.xlane.f32.xlu0 %v2686_v1  ;;  %v2448_v2 = vpop.f32.mrf.mxu1 }
 0xd08   :  { %v2449_v3 = vadd.f32 %v2448_v2, %v9373_v37 }
 0xd09   :  { %v8534_v4 = vpop.f32.mrf.mxu1 }
 0xd0a   :  { %v2692_v5 = vsel %vm271_vm5, %v2449_v3, -inf }
 0xd0b   :  { %v2600_v7 = vpop.f32.mrf.mxu1  ;;  %2693 = vmax.xlane.f32.xlu1 %v2692_v5  ;;  %2690 = vmax.xlane.f32.xlu0 %v2689_v6  ;;  %v2524_v8 = vpop.f32.mrf.mxu0 }
 0xd0c   :  { %v2601_v9 = vadd.f32 %v2600_v7, %v9373_v37  ;;  %v2525_v10 = vadd.f32 %v2524_v8, %v9376_v41 }
 0xd0d   :  { %v8539_v11 = vpop.f32.mrf.mxu0  ;;  %v8544_v14 = vpop.f32.mrf.mxu1 }
 0xd0e   :  { %v2698_v16 = vsel %vm271_vm5, %v2601_v9, -inf  ;;  %v2695_v17 = vsel %vm271_vm5, %v2525_v10, -inf }
 0xd0f   :  { %2699 = vmax.xlane.f32.xlu1 %v2698_v16  ;;  %2696 = vmax.xlane.f32.xlu0 %v2695_v17  ;;  %v2676_v18 = vpop.f32.mrf.mxu0 }
 0xd10   :  { %v2677_v19 = vadd.f32 %v2676_v18, %v9376_v41 }
 0xd11   :  { %v8549_v20 = vpop.f32.mrf.mxu0 }
 0xd12   :  { %v2701_v21 = vsel %vm271_vm5, %v2677_v19, -inf }
 0xd13   :  { %2702 = vmax.xlane.f32.xlu0 %v2701_v21 }
 0xd20   :  { %2768 = vrot.lane.b32.xlu1 %v9563_v36, %s9178_s1 }
 0xd23   :  { %v2682_v26 = vpop.xlane.xlu0 %2681 }
 0xd24   :  { %2920 = vrot.lane.b32.xlu1 %v9585_v39, %s9178_s1  ;;  %v2704_v27 = vsub.f32 %v2145_v54, %v2682_v26 }
 0xd26   :  { %v2712_v29 = vmul.f32 1.442695, %v2704_v27 }
 0xd28   :  { %2996 = vrot.lane.b32.xlu1 %v9581_v38, %s9178_s1 }
 0xd29   :  { %2844 = vrot.lane.b32.xlu0 %v9561_v34, %s9178_s1 }
 0xd2c   :  { %3148 = vrot.lane.b32.xlu1 %v9596_v44, %s9178_s1 }
 0xd2d   :  { %3072 = vrot.lane.b32.xlu0 %v9591_v42, %s9178_s1  ;;  %v2685_v22 = vpop.xlane.xlu1 %2684 }
 0xd2e   :  { %v2705_v23 = vsub.f32 %v2221_v58, %v2685_v22 }
 0xd30   :  { %v2714_v28 = vmul.f32 1.442695, %v2705_v23 }
 0xd32   :  { %8987 = vpow2.f32 %v2714_v28 }
 0xd33   :  { %8989 = vpow2.f32 %v2712_v29 }
 0xd3f   :  { %v9681_v32 = vpop.eup %8987 }
 0xd40   :  { %v2731_v33 = vsel %vm271_vm5, %v9681_v32, 0.0  ;;  %v9685_v34 = vpop.eup %8989 }
 0xd41   :  { %v2728_v35 = vsel %vm271_vm5, %v9685_v34, 0.0 }
 0xd4c   :  { %2732 = vadd.xlane.f32.xlu0 %v2731_v33 }
 0xd50   :  { %2729 = vadd.xlane.f32.xlu1 %v2728_v35 }
 0xd90   :  { %v2688_v36 = vpop.xlane.xlu0 %2687 }
 0xd91   :  { %v2706_v38 = vsub.f32 %v2297_v0, %v2688_v36 }
 0xd93   :  { %v2716_v39 = vmul.f32 1.442695, %v2706_v38 }
 0xd94   :  { %v2691_v42 = vpop.xlane.xlu0 %2690  ;;  %v2694_v43 = vpop.xlane.xlu1 %2693 }
 0xd95   :  { %8991 = vpow2.f32 %v2716_v39  ;;  %v2707_v44 = vsub.f32 %v2373_v25, %v2691_v42  ;;  %v2708_v46 = vsub.f32 %v2449_v3, %v2694_v43 }
 0xd97   :  { %v2718_v47 = vmul.f32 1.442695, %v2707_v44  ;;  %v2720_v48 = vmul.f32 1.442695, %v2708_v46 }
 0xd98   :  { %v2697_v49 = vpop.xlane.xlu0 %2696  ;;  %v2700_v50 = vpop.xlane.xlu1 %2699 }
 0xd99   :  { %8993 = vpow2.f32 %v2718_v47  ;;  %v2709_v51 = vsub.f32 %v2525_v10, %v2697_v49  ;;  %v2710_v52 = vsub.f32 %v2601_v9, %v2700_v50  ;;  %v3410_v49 = vld [vmem:[#allocation2 + $0x38] sm:$0xff]  ;;  %v3409_v50 = vld [vmem:[#allocation2 + $0x30] sm:$0xff] }
 0xd9a   :  { %8995 = vpow2.f32 %v2720_v48 }
 0xd9b   :  { %v2722_v53 = vmul.f32 1.442695, %v2709_v51  ;;  %v2724_v54 = vmul.f32 1.442695, %v2710_v52  ;;  %v3408_v51 = vld [vmem:[#allocation2 + $0x28] sm:$0xff]  ;;  %v3407_v52 = vld [vmem:[#allocation2 + $0x20] sm:$0xff] }
 0xd9c   :  { %v2703_v55 = vpop.xlane.xlu0 %2702  ;;  %v2769_v56 = vpop.permute.xlu1 %2768 }
 0xd9d   :  { %8997 = vpow2.f32 %v2722_v53  ;;  %v2711_v57 = vsub.f32 %v2677_v19, %v2703_v55  ;;  %8551 = vmatpush3.msra.mxu1 %v2769_v56 }
 0xd9e   :  { %8999 = vpow2.f32 %v2724_v54  ;;  %8560 = vmatprep.subr.mxu1 %v9171_v15 }
 0xd9f   :  { %v2726_v58 = vmul.f32 1.442695, %v2711_v57 }
 0xda0   :  { %v2845_v59 = vpop.permute.xlu0 %2844  ;;  %v2921_v6 = vpop.permute.xlu1 %2920 }
 0xda1   :  { %9001 = vpow2.f32 %v2726_v58  ;;  %8556 = vmatpush3.msra.mxu0 %v2845_v59 }
 0xda2   :  { %v8992_v60 = vpop.eup %8991  ;;  %8565 = vmatprep.subr.mxu0 %v9171_v15 }
 0xda3   :  { %v2734_v61 = vsel %vm271_vm5, %v8992_v60, 0.0 }
 0xda4   :  { %2735 = vadd.xlane.f32.xlu1 %v2734_v61  ;;  %v2997_v7 = vpop.permute.xlu1 %2996  ;;  %v3073_v8 = vpop.permute.xlu0 %3072 }
 0xda6   :  { %v8994_v62 = vpop.eup %8993 }
 0xda7   :  { %v8996_v63 = vpop.eup %8995  ;;  %v2737_v0 = vsel %vm271_vm5, %v8994_v62, 0.0 }
 0xda8   :  { %2738 = vadd.xlane.f32.xlu0 %v2737_v0  ;;  %v2740_v24 = vsel %vm271_vm5, %v8996_v63, 0.0  ;;  %v3149_v9 = vpop.permute.xlu1 %3148 }
 0xda9   :  { %2741 = vadd.xlane.f32.xlu1 %v2740_v24 }
 0xdaa   :  { %v8998_v25 = vpop.eup %8997 }
 0xdab   :  { %v9694_v1 = vpop.eup %8999  ;;  %v2743_v2 = vsel %vm271_vm5, %v8998_v25, 0.0 }
 0xdac   :  { %2744 = vadd.xlane.f32.xlu0 %v2743_v2  ;;  %v2746_v3 = vsel %vm271_vm5, %v9694_v1, 0.0 }
 0xdad   :  { %2747 = vadd.xlane.f32.xlu1 %v2746_v3 }
 0xdae   :  { %v9699_v4 = vpop.eup %9001 }
 0xdaf   :  { %v2749_v5 = vsel %vm271_vm5, %v9699_v4, 0.0 }
 0xdb0   :  { %2750 = vadd.xlane.f32.xlu0 %v2749_v5 }
 0xdbe   :  { %3300 = vrot.lane.b32.xlu1 %v9607_v45, %s9178_s1 }
 0xdc6   :  { %3224 = vrot.lane.b32.xlu0 %v9589_v40, %s9178_s1 }
 0xdd5   :  { %v2733_v10 = vpop.xlane.xlu0 %2732 }
 0xdd6   :  { %9003 = vrcp.f32 %v2733_v10 }
 0xdd9   :  { %v2730_v11 = vpop.xlane.xlu1 %2729 }
 0xdda   :  { %9005 = vrcp.f32 %v2730_v11  ;;  %v7965_v11 = vld [vmem:[%s10509_s6 + $0x7e] ss:$0 sm:$0xff] }
 0xde3   :  { %v9004_v14 = vpop.eup %9003 }
 0xde4   :  { %v2755_v16 = vmul.f32 %v9004_v14, %v9681_v32 }
 0xde6   :  { %8558 = vmatmul.mubr.msk.f32.vlgmr.msra.gmra.mxu0 %vm271_vm5, %v2755_v16 }
 0xde7   :  { %v9006_v17 = vpop.eup %9005  ;;  %8566 = vmatpush3.msra.mxu0 %v2997_v7  ;;  %8567 = vmatprep.mubr.msk.f32.mxu0 %vm9174_vm4, %v9171_v15 }
 0xde8   :  { %v2753_v40 = vmul.f32 %v9006_v17, %v9685_v34  ;;  %8575 = vmatprep.subr.mxu0 %v9171_v15 }
 0xdea   :  { %8553 = vmatmul.mubr.msk.f32.vlgmr.msra.gmra.mxu1 %vm271_vm5, %v2753_v40 }
 0xdeb   :  { %8561 = vmatpush3.msra.mxu1 %v2921_v6  ;;  %8562 = vmatprep.mubr.msk.f32.mxu1 %vm9174_vm4, %v9171_v15 }
 0xdec   :  { %8570 = vmatprep.subr.mxu1 %v9171_v15 }
 0xe2d   :  { %v2736_v45 = vpop.xlane.xlu1 %2735 }
 0xe2e   :  { %9007 = vrcp.f32 %v2736_v45 }
 0xe31   :  { %v2739_v18 = vpop.xlane.xlu0 %2738 }
 0xe32   :  { %9009 = vrcp.f32 %v2739_v18  ;;  %v2742_v19 = vpop.xlane.xlu1 %2741 }
 0xe33   :  { %9011 = vrcp.f32 %v2742_v19 }
 0xe35   :  { %v2745_v20 = vpop.xlane.xlu0 %2744 }
 0xe36   :  { %9013 = vrcp.f32 %v2745_v20  ;;  %v2748_v21 = vpop.xlane.xlu1 %2747 }
 0xe37   :  { %9015 = vrcp.f32 %v2748_v21 }
 0xe39   :  { %v2751_v22 = vpop.xlane.xlu0 %2750 }
 0xe3a   :  { %9017 = vrcp.f32 %v2751_v22  ;;  %v3301_v39 = vpop.permute.xlu1 %3300 }
 0xe3b   :  { %v9008_v23 = vpop.eup %9007 }
 0xe3c   :  { %v2757_v26 = vmul.f32 %v9008_v23, %v8992_v60 }
 0xe3d   :  { %v3225_v34 = vpop.permute.xlu0 %3224 }
 0xe3e   :  { %8563 = vmatmul.mubr.msk.f32.vlgmr.msra.gmra.mxu1 %vm271_vm5, %v2757_v26 }
 0xe3f   :  { %v9010_v27 = vpop.eup %9009  ;;  %8571 = vmatpush3.msra.mxu1 %v3073_v8  ;;  %8572 = vmatprep.mubr.msk.f32.mxu1 %vm9174_vm4, %v9171_v15 }
 0xe40   :  { %v9012_v28 = vpop.eup %9011  ;;  %8580 = vmatprep.subr.mxu1 %v9171_v15  ;;  %v2759_v29 = vmul.f32 %v9010_v27, %v8994_v62 }
 0xe41   :  { %v2761_v32 = vmul.f32 %v9012_v28, %v8996_v63 }
 0xe42   :  { %8568 = vmatmul.mubr.msk.f32.vlgmr.msra.gmra.mxu0 %vm271_vm5, %v2759_v29 }
 0xe43   :  { %v9014_v33 = vpop.eup %9013  ;;  %8573 = vmatmul.mubr.msk.f32.vlgmr.msra.gmra.mxu1 %vm271_vm5, %v2761_v32  ;;  %8576 = vmatpush3.msra.mxu0 %v3149_v9 }
 0xe44   :  { %v9016_v35 = vpop.eup %9015  ;;  %8581 = vmatpush3.msra.mxu1 %v3225_v34  ;;  %8577 = vmatprep.mubr.msk.f32.mxu0 %vm9174_vm4, %v9171_v15  ;;  %v2763_v36 = vmul.f32 %v9014_v33, %v8998_v25  ;;  %v3543_v34 = vld [vmem:[#allocation4 + $0x38] sm:$0xff] }
 0xe45   :  { %8582 = vmatprep.mubr.msk.f32.mxu1 %vm9174_vm4, %v9171_v15  ;;  %8585 = vmatprep.subr.mxu0 %v9171_v15  ;;  %v2765_v38 = vmul.f32 %v9016_v35, %v9694_v1  ;;  %v3541_v35 = vld [vmem:[#allocation4 + $0x28] sm:$0xff] }
 0xe46   :  { %8578 = vmatmul.mubr.msk.f32.vlgmr.msra.gmra.mxu0 %vm271_vm5, %v2763_v36  ;;  %8590 = vmatprep.subr.mxu1 %v3410_v49  ;;  %v3540_v36 = vld [vmem:[#allocation4 + $0x20] sm:$0xff] }
 0xe47   :  { %v9018_v42 = vpop.eup %9017  ;;  %8583 = vmatmul.mubr.msk.f32.vlgmr.msra.gmra.mxu1 %vm271_vm5, %v2765_v38  ;;  %8586 = vmatpush3.msra.mxu0 %v3301_v39  ;;  %v7980_v38 = vld [vmem:[%s10508_s5 + $0x78] sm:$0xff]  ;;  %v7979_v39 = vld [vmem:[%s10508_s5 + $0x70] sm:$0xff] }
 0xe48   :  { %8587 = vmatprep.mubr.msk.f32.mxu0 %vm9174_vm4, %v9171_v15  ;;  %v2767_v43 = vmul.f32 %v9018_v42, %v9699_v4  ;;  %8591 = vmatpush3.msra.mxu1 %v3410_v49  ;;  %v7978_v42 = vld [vmem:[%s10508_s5 + $0x68] sm:$0xff] }
 0xe49   :  { %8592 = vmatprep.subr.mxu1 %v3409_v50  ;;  %8601 = vmatprep.subr.mxu0 %v3543_v34 }
 0xe4a   :  { %8588 = vmatmul.mubr.msk.f32.vlgmr.msra.gmra.mxu0 %vm271_vm5, %v2767_v43  ;;  %8593 = vmatpush3.msra.mxu1 %v3409_v50  ;;  %v7977_v43 = vld [vmem:[%s10508_s5 + $0x60] sm:$0xff] }
 0xe4b   :  { %8594 = vmatprep.subr.mxu1 %v3408_v51  ;;  %8602 = vmatpush3.msra.mxu0 %v3543_v34 }
 0xe4c   :  { %8595 = vmatpush3.msra.mxu1 %v3408_v51 }
 0xe4d   :  { %8596 = vmatprep.subr.mxu1 %v3407_v52 }
 0xe4e   :  { %8597 = vmatpush3.msra.mxu1 %v3407_v52  ;;  %v7968_v52 = vld [vmem:[%s10509_s6 + $0x80] ss:$0 sm:$0xff] }
 0xe4f   :  { %8612 = vmatprep.subr.mxu1 %v7980_v38 }
 0xea6   :  { %v2916_v44 = vpop.f32.mrf.mxu0 }
 0xea8   :  { %v8559_v46 = vpop.f32.mrf.mxu0 }
 0xeaa   :  { %v2840_v47 = vpop.f32.mrf.mxu1 }
 0xeac   :  { %v8554_v48 = vpop.f32.mrf.mxu1 }
 0xefe   :  { %v2992_v53 = vpop.f32.mrf.mxu1 }
 0xeff   :  { %3378 = vrot.lane.b32.xlu0 %v2992_v53, %s9169_s28 }
 0xf00   :  { %v8564_v54 = vpop.f32.mrf.mxu1 }
 0xf01   :  { %v7969_v54 = vld [vmem:[%s10509_s6 + $0x81] ss:$0 sm:$0xff] }
 0xf02   :  { %v3068_v55 = vpop.f32.mrf.mxu0 }
 0xf03   :  { %v3144_v56 = vpop.f32.mrf.mxu1  ;;  %3380 = vrot.lane.b32.xlu1 %v3068_v55, %s9169_s28 }
 0xf04   :  { %3386 = vrot.lane.b32.xlu0 %v3144_v56, %s9179_s13  ;;  %v8569_v57 = vpop.f32.mrf.mxu0 }
 0xf05   :  { %v8574_v58 = vpop.f32.mrf.mxu1 }
 0xf06   :  { %v3220_v59 = vpop.f32.mrf.mxu0 }
 0xf07   :  { %v3296_v60 = vpop.f32.mrf.mxu1  ;;  %3388 = vrot.lane.b32.xlu1 %v3220_v59, %s9179_s13 }
 0xf08   :  { %3394 = vrot.lane.b32.xlu0 %v3296_v60, %s9180_s14  ;;  %v8579_v61 = vpop.f32.mrf.mxu0 }
 0xf09   :  { %v8584_v62 = vpop.f32.mrf.mxu1  ;;  %v7976_v61 = vld [vmem:[%s10508_s5 + $0x58] sm:$0xff] }
 0xf0a   :  { %v3372_v63 = vpop.f32.mrf.mxu0  ;;  %v7975_v62 = vld [vmem:[%s10508_s5 + $0x50] sm:$0xff] }
 0xf0b   :  { %3396 = vrot.lane.b32.xlu1 %v3372_v63, %s9180_s14  ;;  %v7974_v63 = vld [vmem:[%s10508_s5 + $0x48] sm:$0xff] }
 0xf0c   :  { %v8589_v0 = vpop.f32.mrf.mxu0 }
 0xf0d   :  { %v7973_v0 = vld [vmem:[%s10508_s5 + $0x40] sm:$0xff] }
 0xf71   :  { %v3379_v24 = vpop.permute.xlu0 %3378 }
 0xf72   :  { %v3400_v2 = vsel %vm271_vm5, %v2840_v47, %v3379_v24  ;;  %v7970_v24 = vld [vmem:[%s10509_s6 + $0x75] ss:$0 sm:$0xff] }
 0xf75   :  { %v3381_v25 = vpop.permute.xlu1 %3380 }
 0xf76   :  { %v3387_v1 = vpop.permute.xlu0 %3386  ;;  %v3401_v7 = vsel %vm271_vm5, %v2916_v44, %v3381_v25 }
 0xf77   :  { %v3402_v4 = vsel %vm58_vm0, %v3400_v2, %v3387_v1 }
 0xf79   :  { %v3389_v3 = vpop.permute.xlu1 %3388 }
 0xf7a   :  { %v3395_v5 = vpop.permute.xlu0 %3394  ;;  %v3403_v8 = vsel %vm58_vm0, %v3401_v7, %v3389_v3 }
 0xf7b   :  { %v3404_v6 = vsel %vm1602_vm8, %v3402_v4, %v3395_v5 }
 0xf7c   :  { %8598 = vmatprep.mubr.msk.f32.mxu1 %vm146_vm3, %v3404_v6  ;;  %v7981_v6 = vld [vmem:[%s10509_s6 + $0x7f] ss:$0 sm:$0xff] }
 0xf7d   :  { %v3397_v9 = vpop.permute.xlu1 %3396 }
 0xf7e   :  { %v3405_v10 = vsel %vm1602_vm8, %v3403_v8, %v3397_v9 }
 0xf7f   :  { %8599 = vmatmul.mubr.msk.f32.vlgmr.msra.gmra.mxu1 %vm146_vm3, %v3405_v10 }
 0xf80   :  { %8613 = vmatpush3.msra.mxu1 %v7980_v38 }
 0xf81   :  { %8614 = vmatprep.subr.mxu1 %v7979_v39 }
 0xf82   :  { %8615 = vmatpush3.msra.mxu1 %v7979_v39 }
 0xf83   :  { %8616 = vmatprep.subr.mxu1 %v7978_v42 }
 0xf84   :  { %8617 = vmatpush3.msra.mxu1 %v7978_v42 }
 0xf85   :  { %8618 = vmatprep.subr.mxu1 %v7977_v43 }
 0xf86   :  { %8619 = vmatpush3.msra.mxu1 %v7977_v43 }
 0xf87   :  { %8620 = vmatprep.subr.mxu1 %v7976_v61 }
 0xf88   :  { %8621 = vmatpush3.msra.mxu1 %v7976_v61 }
 0xf89   :  { %8622 = vmatprep.subr.mxu1 %v7975_v62 }
 0xf8a   :  { %8623 = vmatpush3.msra.mxu1 %v7975_v62 }
 0xf8b   :  { %8624 = vmatprep.subr.mxu1 %v7974_v63 }
 0xf8c   :  { %8625 = vmatpush3.msra.mxu1 %v7974_v63 }
 0xf8d   :  { %8626 = vmatprep.subr.mxu1 %v7973_v0 }
 0xf8e   :  { %8627 = vmatpush3.msra.mxu1 %v7973_v0 }
0x103f   :  { %v8600_v14 = vpop.f32.mrf.mxu1 }
0x1040   :  { %v3494_v16 = vadd.f32 %v8600_v14, %v7965_v11 }
0x1041   :  { %v3488_v17 = vpop.f32.mrf.mxu1 }
0x1042   :  { %v3489_v40 = vadd.f32 %v7965_v11, %v3488_v17  ;;  %v3498_v45 = vadd.f32 %v3494_v16, %v9550_v31 }
0x1044   :  { %v3504_v18 = vsel %vm146_vm3, %v3498_v45, 0.0  ;;  %v3497_v19 = vadd.f32 %v3489_v40, %v9548_v30  ;;  %v3542_v30 = vld [vmem:[#allocation4 + $0x30] sm:$0xff] }
0x1045   :  { %3505 = vadd.xlane.f32.xlu1 %v3504_v18  ;;  %8603 = vmatprep.subr.mxu0 %v3542_v30 }
0x1046   :  { %v3501_v20 = vsel %vm146_vm3, %v3497_v19, 0.0  ;;  %8604 = vmatpush3.msra.mxu0 %v3542_v30 }
0x1047   :  { %3502 = vadd.xlane.f32.xlu0 %v3501_v20  ;;  %8605 = vmatprep.subr.mxu0 %v3541_v35 }
0x1048   :  { %8606 = vmatpush3.msra.mxu0 %v3541_v35 }
0x1049   :  { %8607 = vmatprep.subr.mxu0 %v3540_v36 }
0x104a   :  { %8608 = vmatpush3.msra.mxu0 %v3540_v36  ;;  %v3769_v36 = vlaneseq }
0x104b   :  { %8631 = vmatprep.subr.mxu0 %v9171_v15 }
0x104c   :  { %v9809_v38 = vshrl.u32 %v3769_v36, 7 }
0x10ce   :  { %v3506_v21 = vpop.xlane.xlu1 %3505 }
0x10cf   :  { %v3508_v22 = vmul.f32 0.03125, %v3506_v21 }
0x10d0   :  { %v3503_v23 = vpop.xlane.xlu0 %3502 }
0x10d1   :  { %v3507_v26 = vmul.f32 0.03125, %v3503_v23  ;;  %v3510_v27 = vsub.f32 %v3498_v45, %v3508_v22 }
0x10d3   :  { %v3509_v28 = vsub.f32 %v3497_v19, %v3507_v26  ;;  %v3512_v33 = vmul.f32 %v3510_v27, %v3510_v27 }
0x10d5   :  { %v3511_v29 = vmul.f32 %v3509_v28, %v3509_v28  ;;  %v3516_v31 = vsel %vm146_vm3, %v3512_v33, 0.0 }
0x10d7   :  { %v3513_v32 = vsel %vm146_vm3, %v3511_v29, 0.0  ;;  %v147_v29 = vsel %vm146_vm3, %v9258_v12, 0.0  ;;  %v7985_v12 = vld [vmem:[%s10509_s6 + $0x83] ss:$0 sm:$0xff] }
0x10d8   :  { %3514 = vadd.xlane.f32.xlu0 %v3513_v32 }
0x10dc   :  { %3517 = vadd.xlane.f32.xlu0 %v3516_v31 }
0x1161   :  { %v3515_v44 = vpop.xlane.xlu0 %3514 }
0x1162   :  { %v3519_v46 = vmul.f32 0.03125, %v3515_v44 }
0x1164   :  { %v3521_v47 = vadd.f32 1e-05, %v3519_v46 }
0x1165   :  { %v3518_v48 = vpop.xlane.xlu0 %3517 }
0x1166   :  { %9019 = vrsqrt.f32 %v3521_v47  ;;  %v3520_v49 = vmul.f32 0.03125, %v3518_v48  ;;  %v9818_v47 = vsub.s32 0, %v9809_v38 }
0x1168   :  { %v3522_v50 = vadd.f32 1e-05, %v3520_v49 }
0x116a   :  { %9021 = vrsqrt.f32 %v3522_v50  ;;  %v7986_v50 = vld [vmem:[%s10509_s6 + $0x90] ss:$0 sm:$0xff] }
0x1173   :  { %v9020_v51 = vpop.eup %9019 }
0x1174   :  { %v3525_v53 = vmul.f32 %v9020_v51, %v3509_v28  ;;  %v150_v28 = vsel %vm146_vm3, %v9262_v13, 0.0  ;;  %v7984_v13 = vld [vmem:[%s10509_s6 + $0x82] ss:$0 sm:$0xff] }
0x1176   :  { %v3531_v55 = vmul.f32 %v7968_v52, %v3525_v53 }
0x1177   :  { %v9022_v56 = vpop.eup %9021 }
0x1178   :  { %v3526_v57 = vmul.f32 %v9022_v56, %v3510_v27  ;;  %v3537_v58 = vadd.f32 %v7969_v54, %v3531_v55 }
0x117a   :  { %v3532_v59 = vmul.f32 %v7968_v52, %v3526_v57  ;;  %8609 = vmatprep.mubr.msk.f32.mxu0 %vm146_vm3, %v3537_v58  ;;  %v7987_v57 = vld [vmem:[%s10509_s6 + $0x91] ss:$0 sm:$0xff] }
0x117c   :  { %v3538_v60 = vadd.f32 %v7969_v54, %v3532_v59 }
0x117e   :  { %8610 = vmatmul.mubr.msk.f32.vlgmr.msra.gmra.mxu0 %vm146_vm3, %v3538_v60 }
0x117f   :  { %8639 = vmatprep.mubr.msk.f32.mxu0 %vm9174_vm4, %v9171_v15 }
0x123e   :  { %v8611_v25 = vpop.f32.mrf.mxu0 }
0x123f   :  { %v3627_v1 = vadd.f32 %v8611_v25, %v7970_v24 }
0x1240   :  { %v3621_v2 = vpop.f32.mrf.mxu0 }
0x1241   :  { %v3622_v3 = vadd.f32 %v7970_v24, %v3621_v2  ;;  %v3631_v5 = vmax.f32 %v3627_v1, 0.0 }
0x1243   :  { %v3630_v4 = vmax.f32 %v3622_v3, 0.0  ;;  %v9181_v3 = vmov 0  }
0x1244   :  { %8946 = vset.pattern.permute.xlu0 %v9181_v3  ;;  %8945 = vset.pattern.permute.xlu1 %v9181_v3 }
0x1245   :  { %8628 = vmatprep.mubr.msk.f32.mxu1 %vm1843_vm9, %v3630_v4  ;;  %v3864_v4 = vld [vmem:[%s10509_s6 + $0x28] sm:$0xff] }
0x1246   :  { %8629 = vmatmul.mubr.msk.f32.vlgmr.msra.gmra.mxu1 %vm1843_vm9, %v3631_v5  ;;  %v3863_v5 = vld [vmem:[%s10509_s6 + $0x20] sm:$0xff]  ;;  %8632 = vmatpush3.msra.mxu0 %v3864_v4 }
0x1247   :  { %8633 = vmatprep.subr.mxu0 %v9171_v15 }
0x1248   :  { %8634 = vmatpush3.msra.mxu0 %v3863_v5 }
0x1249   :  { %8635 = vmatprep.subr.mxu0 %v9171_v15 }
0x1306   :  { %v8630_v7 = vpop.f32.mrf.mxu1 }
0x1307   :  { %v3724_v8 = vadd.f32 %v8630_v7, %v7981_v6  ;;  %v3861_v7 = vld [vmem:[%s10509_s6 + $0x10] sm:$0xff] }
0x1308   :  { %v3718_v9 = vpop.f32.mrf.mxu1 }
0x1309   :  { %v3728_v10 = vadd.f32 %v3724_v8, %v3538_v60  ;;  %v3719_v11 = vadd.f32 %v7981_v6, %v3718_v9  ;;  %v3862_v6 = vld [vmem:[%s10509_s6 + $0x18] sm:$0xff] }
0x130a   :  { %8636 = vmatpush3.msra.mxu0 %v3862_v6 }
0x130b   :  { %v3727_v14 = vadd.f32 %v3719_v11, %v3537_v58  ;;  %v3734_v16 = vsel %vm146_vm3, %v3728_v10, 0.0  ;;  %8637 = vmatprep.subr.mxu0 %v9171_v15 }
0x130c   :  { %3735 = vadd.xlane.f32.xlu0 %v3734_v16  ;;  %8638 = vmatpush3.msra.mxu0 %v3861_v7 }
0x130d   :  { %v3731_v17 = vsel %vm146_vm3, %v3727_v14, 0.0  ;;  %8642 = vmatprep.subr.mxu0 %v9171_v15 }
0x130e   :  { %3732 = vadd.xlane.f32.xlu1 %v3731_v17 }
0x1395   :  { %v3736_v40 = vpop.xlane.xlu0 %3735 }
0x1396   :  { %v3738_v45 = vmul.f32 0.03125, %v3736_v40 }
0x1397   :  { %v3733_v18 = vpop.xlane.xlu1 %3732 }
0x1398   :  { %v3740_v19 = vsub.f32 %v3728_v10, %v3738_v45  ;;  %v3737_v20 = vmul.f32 0.03125, %v3733_v18 }
0x139a   :  { %v3739_v21 = vsub.f32 %v3727_v14, %v3737_v20  ;;  %v3742_v22 = vmul.f32 %v3740_v19, %v3740_v19 }
0x139c   :  { %v3746_v23 = vsel %vm146_vm3, %v3742_v22, 0.0  ;;  %v3741_v26 = vmul.f32 %v3739_v21, %v3739_v21 }
0x139d   :  { %3747 = vadd.xlane.f32.xlu0 %v3746_v23 }
0x139e   :  { %v3743_v27 = vsel %vm146_vm3, %v3741_v26, 0.0 }
0x139f   :  { %3744 = vadd.xlane.f32.xlu1 %v3743_v27 }
0x13a1   :  { %151 = vadd.xlane.f32.xlu0 %v150_v28 }
0x13a3   :  { %148 = vadd.xlane.f32.xlu1 %v147_v29 }
0x1426   :  { %v3748_v32 = vpop.xlane.xlu0 %3747 }
0x1427   :  { %v3750_v33 = vmul.f32 0.03125, %v3748_v32 }
0x1428   :  { %v3745_v31 = vpop.xlane.xlu1 %3744 }
0x1429   :  { %v3752_v34 = vadd.f32 1e-05, %v3750_v33  ;;  %v3749_v30 = vmul.f32 0.03125, %v3745_v31 }
0x142a   :  { %v152_v44 = vpop.xlane.xlu0 %151 }
0x142b   :  { %9023 = vrsqrt.f32 %v3752_v34  ;;  %v3751_v35 = vadd.f32 1e-05, %v3749_v30  ;;  %vm154_vm10 = vcmp.ne.f32.partialorder %v152_v44, 0.0 }
0x142c   :  { %v149_v49 = vpop.xlane.xlu1 %148  ;;  %v7893_v56 = vsel %vm154_vm10, 1.0, %v9171_v15 }
0x142d   :  { %9025 = vrsqrt.f32 %v3751_v35  ;;  %vm153_vm11 = vcmp.ne.f32.partialorder %v149_v49, 0.0 }
0x142e   :  { %v7892_v62 = vsel %vm153_vm11, 1.0, %v9171_v15 }
0x1438   :  { %v9024_v39 = vpop.eup %9023 }
0x1439   :  { %v3756_v42 = vmul.f32 %v9024_v39, %v3740_v19 }
0x143a   :  { %v9026_v43 = vpop.eup %9025 }
0x143b   :  { %v3762_v46 = vmul.f32 %v7984_v13, %v3756_v42  ;;  %v3755_v48 = vmul.f32 %v9026_v43, %v3739_v21 }
0x143d   :  { %v9823_v51 = vadd.f32 %v7985_v12, %v3762_v46  ;;  %v3761_v52 = vmul.f32 %v7984_v13, %v3755_v48 }
0x143f   :  { %v3776_v53 = vrot.slane %v9823_v51, %v9818_v47  ;;  %v9827_v54 = vadd.f32 %v7985_v12, %v3761_v52  ;;  %v3785_v55 = vmul.f32 %v7986_v50, %v9823_v51 }
0x1441   :  { %v3778_v58 = vmul.f32 %v7893_v56, %v3776_v53  ;;  %v3772_v59 = vrot.slane %v9827_v54, %v9818_v47  ;;  %v3789_v60 = vsel %vm146_vm3, %v3785_v55, 0.0  ;;  %v3784_v61 = vmul.f32 %v7986_v50, %v9827_v54  ;;  %v4063_v56 = vld [vmem:[%s10509_s6 + $0x94] sm:$0xff] }
0x1442   :  { %3790 = vadd.xlane.f32.xlu0 %v3789_v60 }
0x1443   :  { %v3777_v63 = vmul.f32 %v7892_v62, %v3772_v59  ;;  %v3786_v0 = vsel %vm146_vm3, %v3784_v61, 0.0  ;;  %v3798_v24 = vmul.f32 %v7987_v57, %v3778_v58 }
0x1444   :  { %3787 = vadd.xlane.f32.xlu1 %v3786_v0 }
0x1445   :  { %v3802_v25 = vsel %vm146_vm3, %v3798_v24, 0.0  ;;  %v3797_v1 = vmul.f32 %v7987_v57, %v3777_v63 }
0x1446   :  { %3803 = vadd.xlane.f32.xlu0 %v3802_v25 }
0x1447   :  { %v3799_v2 = vsel %vm146_vm3, %v3797_v1, 0.0 }
0x1448   :  { %3800 = vadd.xlane.f32.xlu1 %v3799_v2 }
0x14cb   :  { %v3791_v8 = vpop.xlane.xlu0 %3790 }
0x14cd   :  { %v3788_v9 = vpop.xlane.xlu1 %3787 }
0x14cf   :  { %v3804_v10 = vpop.xlane.xlu0 %3803 }
0x14d0   :  { %v3806_v11 = vadd.f32 %v3804_v10, %v3791_v8 }
0x14d1   :  { %v3801_v14 = vpop.xlane.xlu1 %3800 }
0x14d2   :  { %vm3808_vm12 = vcmp.eq.f32.partialorder %v3806_v11, 0.0  ;;  %v3805_v16 = vadd.f32 %v3801_v14, %v3788_v9  ;;  %v3984_v14 = vld [vmem:[%s10509_s6 + $0x68] sm:$0xff] }
0x14d3   :  { %v3810_v17 = vsel %vm3808_vm12, -1e+20, %v3806_v11 }
0x14d4   :  { %v3817_v40 = vrot.slane %v3810_v17, 4  ;;  %vm3807_vm13 = vcmp.eq.f32.partialorder %v3805_v16, 0.0 }
0x14d5   :  { %v3809_v45 = vsel %vm3807_vm13, -1e+20, %v3805_v16  ;;  %v7994_v16 = vld [vmem:[%s10505_s2 + $0x50] sm:$0xff] }
0x14d6   :  { %v3818_v18 = vmax.f32 %v3810_v17, %v3817_v40  ;;  %v3811_v19 = vrot.slane %v3809_v45, 4  ;;  %v7993_v40 = vld [vmem:[%s10505_s2 + $0x48] sm:$0xff] }
0x14d8   :  { %v3819_v20 = vrot.slane %v3818_v18, 2  ;;  %v3812_v21 = vmax.f32 %v3809_v45, %v3811_v19  ;;  %v3981_v19 = vld [vmem:[%s10509_s6 + $0x50] sm:$0xff] }
0x14da   :  { %v3820_v22 = vmax.f32 %v3818_v18, %v3819_v20  ;;  %v3813_v23 = vrot.slane %v3812_v21, 2  ;;  %v7992_v18 = vld [vmem:[%s10505_s2 + $0x40] sm:$0xff]  ;;  %v7988_v20 = vld [vmem:[%s10509_s6 + $0x92] ss:$0 sm:$0xff] }
0x14dc   :  { %v3821_v26 = vrot.slane %v3820_v22, 1  ;;  %v3814_v27 = vmax.f32 %v3812_v21, %v3813_v23 }
0x14de   :  { %v3822_v28 = vmax.f32 %v3820_v22, %v3821_v26  ;;  %v3815_v29 = vrot.slane %v3814_v27, 1 }
0x14e0   :  { %v3824_v32 = vsub.f32 %v3810_v17, %v3822_v28  ;;  %v3816_v33 = vmax.f32 %v3814_v27, %v3815_v29  ;;  %v3983_v17 = vld [vmem:[%s10509_s6 + $0x60] sm:$0xff] }
0x14e2   :  { %v3827_v31 = vmul.f32 1.442695, %v3824_v32  ;;  %v3823_v34 = vsub.f32 %v3809_v45, %v3816_v33  ;;  %v3982_v45 = vld [vmem:[%s10509_s6 + $0x58] sm:$0xff] }
0x14e4   :  { %9027 = vpow2.f32 %v3827_v31  ;;  %v3825_v30 = vmul.f32 1.442695, %v3823_v34 }
0x14e6   :  { %9029 = vpow2.f32 %v3825_v30 }
0x14f1   :  { %v9028_v35 = vpop.eup %9027 }
0x14f2   :  { %v3835_v36 = vrot.slane %v9028_v35, 4 }
0x14f3   :  { %v9030_v39 = vpop.eup %9029 }
0x14f4   :  { %v3836_v13 = vadd.f32 %v9028_v35, %v3835_v36  ;;  %v3829_v42 = vrot.slane %v9030_v39, 4 }
0x14f6   :  { %v3837_v43 = vrot.slane %v3836_v13, 2  ;;  %v3830_v12 = vadd.f32 %v9030_v39, %v3829_v42 }
0x14f8   :  { %v3838_v44 = vadd.f32 %v3837_v43, %v3836_v13  ;;  %v3831_v46 = vrot.slane %v3830_v12, 2 }
0x14fa   :  { %v3839_v48 = vrot.slane %v3838_v44, 1  ;;  %v3832_v49 = vadd.f32 %v3831_v46, %v3830_v12 }
0x14fc   :  { %v3840_v50 = vadd.f32 %v3839_v48, %v3838_v44  ;;  %v3833_v52 = vrot.slane %v3832_v49, 1 }
0x14fe   :  { %9031 = vrcp.f32 %v3840_v50  ;;  %v3834_v53 = vadd.f32 %v3833_v52, %v3832_v49 }
0x1500   :  { %9033 = vrcp.f32 %v3834_v53 }
0x150b   :  { %v9032_v55 = vpop.eup %9031 }
0x150c   :  { %v3844_v57 = vmul.f32 %v9032_v55, %v9028_v35 }
0x150d   :  { %v9034_v58 = vpop.eup %9033 }
0x150e   :  { %v4065_v59 = vmul.f32 %v4063_v56, %v3844_v57  ;;  %v3846_v60 = vmul.f32 %v3844_v57, %v9823_v51  ;;  %v3842_v61 = vmul.f32 %v9034_v58, %v9030_v39 }
0x1510   :  { %4073 = vperm.xlu0 %8946, %v4065_v59   ;;  %v3854_v62 = vsel %vm146_vm3, %v3846_v60, 0.0  ;;  %v4064_v63 = vmul.f32 %v4063_v56, %v3842_v61  ;;  %v3845_v0 = vmul.f32 %v3842_v61, %v9827_v54  ;;  %v7995_v54 = vld [vmem:[%s10505_s2 + $0x58] sm:$0xff] }
0x1511   :  { %v3855_v24 = vrot.slane %v3854_v62, 4  ;;  %8653 = vmatprep.subr.mxu1 %v7995_v54 }
0x1512   :  { %4068 = vperm.xlu1 %8945, %v4064_v63   ;;  %v3847_v25 = vsel %vm146_vm3, %v3845_v0, 0.0  ;;  %8654 = vmatpush3.msra.mxu1 %v7995_v54 }
0x1513   :  { %v3848_v1 = vrot.slane %v3847_v25, 4  ;;  %v3856_v2 = vadd.f32 %v3855_v24, %v3854_v62  ;;  %8655 = vmatprep.subr.mxu1 %v7994_v16 }
0x1514   :  { %8656 = vmatpush3.msra.mxu1 %v7994_v16 }
0x1515   :  { %v3849_v3 = vadd.f32 %v3848_v1, %v3847_v25  ;;  %v3857_v4 = vrot.slane %v3856_v2, 2  ;;  %8657 = vmatprep.subr.mxu1 %v7993_v40 }
0x1516   :  { %8658 = vmatpush3.msra.mxu1 %v7993_v40 }
0x1517   :  { %v3850_v5 = vrot.slane %v3849_v3, 2  ;;  %v3858_v6 = vadd.f32 %v3857_v4, %v3856_v2  ;;  %8659 = vmatprep.subr.mxu1 %v7992_v18 }
0x1518   :  { %8660 = vmatpush3.msra.mxu1 %v7992_v18 }
0x1519   :  { %v3851_v7 = vadd.f32 %v3850_v5, %v3849_v3  ;;  %v3859_v8 = vrot.slane %v3858_v6, 1  ;;  %8674 = vmatprep.subr.mxu1 %v9171_v15 }
0x151b   :  { %v3852_v51 = vrot.slane %v3851_v7, 1  ;;  %v3860_v10 = vadd.f32 %v3859_v8, %v3858_v6 }
0x151d   :  { %v3853_v9 = vadd.f32 %v3852_v51, %v3851_v7 }
0x151f   :  { %v3873_v11 = vsel %vm3872_vm14, %v3860_v10, %v3853_v9 }
0x1520   :  { %8640 = vmatmul.mubr.msk.f32.vlgmr.msra.gmra.mxu0 %vm146_vm3, %v3873_v11 }
0x1521   :  { %8650 = vmatprep.mubr.msk.f32.mxu0 %vm9174_vm4, %v9171_v15  ;;  %8643 = vmatpush3.msra.mxu0 %v3984_v14 }
0x1522   :  { %8644 = vmatprep.subr.mxu0 %v9171_v15 }
0x1523   :  { %8645 = vmatpush3.msra.mxu0 %v3983_v17 }
0x1524   :  { %8646 = vmatprep.subr.mxu0 %v9171_v15 }
0x1525   :  { %8647 = vmatpush3.msra.mxu0 %v3982_v45 }
0x1526   :  { %8648 = vmatprep.subr.mxu0 %v9171_v15 }
0x1527   :  { %8649 = vmatpush3.msra.mxu0 %v3981_v19 }
0x1528   :  { %8664 = vmatprep.subr.mxu0 %v9171_v15 }
0x158b   :  { %v4074_v56 = vpop.permute.xlu0 %4073 }
0x158d   :  { %v4069_v48 = vpop.permute.xlu1 %4068 }
0x15e0   :  { %v3942_v21 = vpop.f32.mrf.mxu0 }
0x15e1   :  { %v3943_v22 = vadd.f32 %v7988_v20, %v3942_v21 }
0x15e2   :  { %v8641_v23 = vpop.f32.mrf.mxu0 }
0x15e3   :  { %v3946_v26 = vsub.f32 0.0, %v3943_v22 }
0x15e5   :  { %v3947_v27 = vmul.f32 1.442695, %v3946_v26 }
0x15e7   :  { %9035 = vpow2.f32 %v3947_v27 }
0x15f4   :  { %v9036_v28 = vpop.eup %9035 }
0x15f5   :  { %v3949_v29 = vadd.f32 1.0, %v9036_v28 }
0x15f7   :  { %9037 = vrcp.f32 %v3949_v29 }
0x1604   :  { %v9901_v32 = vpop.eup %9037 }
0x1605   :  { %v3958_v33 = vsub.f32 1.0, %v9901_v32  ;;  %v3953_v31 = vrot.slane %v9901_v32, 1  ;;  %v3956_v34 = vmul.f32 %v9901_v32, %v3853_v9 }
0x1607   :  { %v3960_v30 = vrot.slane %v3958_v33, 1  ;;  %v3963_v35 = vmul.f32 %v3958_v33, %v3853_v9  ;;  %v3957_v36 = vmul.f32 %v3953_v31, %v3860_v10  ;;  %v3974_v53 = vrot.slane %v3956_v34, 6 }
0x1609   :  { %v3965_v39 = vadd.f32 %v3963_v35, %v3956_v34  ;;  %v3964_v13 = vmul.f32 %v3960_v30, %v3860_v10  ;;  %v7816_v42 = vrot.slane %v3957_v36, 7  ;;  %v3975_v44 = vrot.slane %v3957_v36, 5 }
0x160b   :  { %v4079_v43 = vrot.slane %v3965_v39, %v9818_v47  ;;  %v3966_v12 = vadd.f32 %v3964_v13, %v3957_v36  ;;  %v9908_v46 = vsel %vm3872_vm14, %v7816_v42, %v3956_v34  ;;  %v7823_v49 = vrot.slane %v3964_v13, 7 }
0x160c   :  { %v3977_v59 = vsel %vm3976_vm15, %v3975_v44, %v3974_v53 }
0x160d   :  { %v9910_v50 = vmul.f32 %v4079_v43, %v4069_v48  ;;  %v3969_v52 = vrot.slane %v3966_v12, 7  ;;  %v4083_v55 = vrot.slane %v3966_v12, %v9818_v47  ;;  %v9914_v57 = vsel %vm3872_vm14, %v7823_v49, %v3963_v35  ;;  %v7996_v47 = vld [vmem:[%s10509_s6 + $0x72] ss:$0 sm:$0xff] }
0x160f   :  { %8661 = vmatprep.mubr.msk.f32.mxu1 %vm146_vm3, %v9910_v50  ;;  %v3970_v58 = vsel %vm3872_vm14, %v3969_v52, %v3965_v39  ;;  %v9919_v60 = vmul.f32 %v4083_v55, %v4074_v56 }
0x1610   :  { %v3980_v61 = vsel %vm3979_vm1, %v3970_v58, %v3977_v59 }
0x1611   :  { %8651 = vmatmul.mubr.msk.f32.vlgmr.msra.gmra.mxu0 %vm146_vm3, %v3980_v61  ;;  %8662 = vmatmul.mubr.msk.f32.vlgmr.msra.gmra.mxu1 %vm146_vm3, %v9919_v60 }
0x1612   :  { %8666 = vmatprep.mubr.msk.f32.mxu0 %vm9174_vm4, %v9171_v15  ;;  %8676 = vmatprep.mubr.msk.f32.mxu1 %vm9174_vm4, %v9171_v15 }
0x16d1   :  { %v9931_v62 = vpop.f32.mrf.mxu0  ;;  %v8663_v63 = vpop.f32.mrf.mxu1 }
0x16d2   :  { %v9933_v0 = vadd.f32 %v8663_v63, %v7996_v47 }
0x16d3   :  { %v8652_v24 = vpop.f32.mrf.mxu0  ;;  %v4168_v25 = vpop.f32.mrf.mxu1 }
0x16d4   :  { %4181 = vrot.lane.b32.xlu1 %v9933_v0, %s9173_s30  ;;  %v9939_v1 = vadd.f32 %v7996_v47, %v4168_v25 }
0x16d8   :  { %4185 = vrot.lane.b32.xlu1 %v9933_v0, %s9172_s29 }
0x16dc   :  { %4179 = vrot.lane.b32.xlu1 %v9939_v1, %s9173_s30 }
0x16e0   :  { %4183 = vrot.lane.b32.xlu1 %v9939_v1, %s9172_s29 }
0x16e4   :  { %4187 = vrot.lane.b32.xlu1 %v9939_v1, %s9175_s8 }
0x16e8   :  { %4189 = vrot.lane.b32.xlu1 %v9933_v0, %s9175_s8 }
0x16ec   :  { %4191 = vrot.lane.b32.xlu1 %v9939_v1, %s9176_s9 }
0x16f0   :  { %4267 = vrot.lane.b32.xlu1 %v9933_v0, %s9176_s9 }
0x1746   :  { %v9953_v2 = vpop.permute.xlu1 %4181 }
0x1747   :  { %4419 = vrot.lane.b32.xlu1 %v9953_v2, %s9176_s9 }
0x174a   :  { %v9957_v3 = vpop.permute.xlu1 %4185 }
0x174b   :  { %4571 = vrot.lane.b32.xlu1 %v9957_v3, %s9176_s9 }
0x174e   :  { %v9961_v4 = vpop.permute.xlu1 %4179 }
0x174f   :  { %4343 = vrot.lane.b32.xlu0 %v9961_v4, %s9176_s9 }
0x1752   :  { %v9965_v5 = vpop.permute.xlu1 %4183 }
0x1753   :  { %4495 = vrot.lane.b32.xlu0 %v9965_v5, %s9176_s9 }
0x1756   :  { %v9969_v6 = vpop.permute.xlu1 %4187 }
0x1757   :  { %4647 = vrot.lane.b32.xlu0 %v9969_v6, %s9176_s9 }
0x175a   :  { %v9973_v7 = vpop.permute.xlu1 %4189 }
0x175b   :  { %4723 = vrot.lane.b32.xlu1 %v9973_v7, %s9176_s9 }
0x175e   :  { %v4192_v8 = vpop.permute.xlu1 %4191 }
0x175f   :  { %8665 = vmatpush3.xpose.msk.msra.mxu0 %vm271_vm5, %v4192_v8 }
0x1760   :  { %8669 = vmatprep.subr.mxu0 %v9171_v15 }
0x1762   :  { %v4268_v51 = vpop.permute.xlu1 %4267  ;;  %8667 = vmatmul.mubr.msk.f32.vlgmr.msra.gmra.mxu0 %vm271_vm5, %v9939_v1 }
0x1763   :  { %8670 = vmatpush3.xpose.msk.msra.mxu0 %vm271_vm5, %v4268_v51  ;;  %8671 = vmatprep.mubr.msk.f32.mxu0 %vm9174_vm4, %v9171_v15 }
0x1764   :  { %8679 = vmatprep.subr.mxu0 %v9171_v15 }
0x1766   :  { %8672 = vmatmul.mubr.msk.f32.vlgmr.msra.gmra.mxu0 %vm271_vm5, %v9933_v0 }
0x1767   :  { %8681 = vmatprep.mubr.msk.f32.mxu0 %vm9174_vm4, %v9171_v15 }
0x17b9   :  { %v4420_v9 = vpop.permute.xlu1 %4419 }
0x17ba   :  { %8680 = vmatpush3.xpose.msk.msra.mxu0 %vm271_vm5, %v4420_v9 }
0x17bb   :  { %8689 = vmatprep.subr.mxu0 %v9171_v15 }
0x17bd   :  { %v4572_v10 = vpop.permute.xlu1 %4571  ;;  %8682 = vmatmul.mubr.msk.f32.vlgmr.msra.gmra.mxu0 %vm271_vm5, %v9953_v2 }
0x17be   :  { %8690 = vmatpush3.xpose.msk.msra.mxu0 %vm271_vm5, %v4572_v10  ;;  %8691 = vmatprep.mubr.msk.f32.mxu0 %vm9174_vm4, %v9171_v15 }
0x17bf   :  { %8699 = vmatprep.subr.mxu0 %v9171_v15 }
0x17c1   :  { %v4344_v11 = vpop.permute.xlu0 %4343  ;;  %8692 = vmatmul.mubr.msk.f32.vlgmr.msra.gmra.mxu0 %vm271_vm5, %v9957_v3 }
0x17c2   :  { %8675 = vmatpush3.xpose.msk.msra.mxu1 %vm271_vm5, %v4344_v11  ;;  %8701 = vmatprep.mubr.msk.f32.mxu0 %vm9174_vm4, %v9171_v15 }
0x17c3   :  { %8684 = vmatprep.subr.mxu1 %v9171_v15 }
0x17c5   :  { %8677 = vmatmul.mubr.msk.f32.vlgmr.msra.gmra.mxu1 %vm271_vm5, %v9961_v4  ;;  %v4496_v54 = vpop.permute.xlu0 %4495 }
0x17c6   :  { %8685 = vmatpush3.xpose.msk.msra.mxu1 %vm271_vm5, %v4496_v54  ;;  %8686 = vmatprep.mubr.msk.f32.mxu1 %vm9174_vm4, %v9171_v15 }
0x17c7   :  { %8694 = vmatprep.subr.mxu1 %v9171_v15 }
0x17c9   :  { %8687 = vmatmul.mubr.msk.f32.vlgmr.msra.gmra.mxu1 %vm271_vm5, %v9965_v5  ;;  %v4648_v14 = vpop.permute.xlu0 %4647 }
0x17ca   :  { %8695 = vmatpush3.xpose.msk.msra.mxu1 %vm271_vm5, %v4648_v14  ;;  %8696 = vmatprep.mubr.msk.f32.mxu1 %vm9174_vm4, %v9171_v15 }
0x17cb   :  { %8704 = vmatprep.subr.mxu1 %v9171_v15 }
0x17cd   :  { %8697 = vmatmul.mubr.msk.f32.vlgmr.msra.gmra.mxu1 %vm271_vm5, %v9969_v6  ;;  %v4724_v16 = vpop.permute.xlu1 %4723 }
0x17ce   :  { %8700 = vmatpush3.xpose.msk.msra.mxu0 %vm271_vm5, %v4724_v16  ;;  %8706 = vmatprep.mubr.msk.f32.mxu1 %vm9174_vm4, %v9171_v15 }
0x17cf   :  { %8709 = vmatprep.subr.mxu0 %v9171_v15 }
0x17d1   :  { %8702 = vmatmul.mubr.msk.f32.vlgmr.msra.gmra.mxu0 %vm271_vm5, %v9973_v7 }
0x17d2   :  { %8711 = vmatprep.mubr.msk.f32.mxu0 %vm9174_vm4, %v9171_v15 }
0x1822   :  { %v4263_v17 = vpop.f32.mrf.mxu0 }
0x1823   :  { %v4264_v40 = vadd.f32 %v4263_v17, %v9373_v37 }
0x1824   :  { %v8668_v45 = vpop.f32.mrf.mxu0 }
0x1825   :  { %v4799_v18 = vsel %vm271_vm5, %v4264_v40, -inf }
0x1826   :  { %4800 = vmax.xlane.f32.xlu0 %v4799_v18  ;;  %v4339_v19 = vpop.f32.mrf.mxu0 }
0x1827   :  { %v4340_v20 = vadd.f32 %v4339_v19, %v9376_v41 }
0x1828   :  { %v8673_v21 = vpop.f32.mrf.mxu0 }
0x1829   :  { %v4802_v22 = vsel %vm271_vm5, %v4340_v20, -inf }
0x182a   :  { %4803 = vmax.xlane.f32.xlu1 %v4802_v22 }
0x187d   :  { %v4491_v23 = vpop.f32.mrf.mxu0 }
0x187e   :  { %v4492_v34 = vadd.f32 %v4491_v23, %v9376_v41 }
0x187f   :  { %v8683_v26 = vpop.f32.mrf.mxu0 }
0x1880   :  { %v4808_v43 = vsel %vm271_vm5, %v4492_v34, -inf }
0x1881   :  { %v4643_v27 = vpop.f32.mrf.mxu0 }
0x1882   :  { %v4644_v13 = vadd.f32 %v4643_v27, %v9376_v41 }
0x1883   :  { %v8693_v28 = vpop.f32.mrf.mxu0 }
0x1884   :  { %v4814_v52 = vsel %vm271_vm5, %v4644_v13, -inf }
0x1885   :  { %v4415_v29 = vpop.f32.mrf.mxu1 }
0x1886   :  { %v4416_v33 = vadd.f32 %v4415_v29, %v9373_v37 }
0x1887   :  { %v8678_v31 = vpop.f32.mrf.mxu1 }
0x1888   :  { %v4805_v30 = vsel %vm271_vm5, %v4416_v33, -inf }
0x1889   :  { %v4567_v35 = vpop.f32.mrf.mxu1  ;;  %4806 = vmax.xlane.f32.xlu0 %v4805_v30 }
0x188a   :  { %v4568_v36 = vadd.f32 %v4567_v35, %v9373_v37 }
0x188b   :  { %v8688_v39 = vpop.f32.mrf.mxu1 }
0x188c   :  { %v4811_v42 = vsel %vm271_vm5, %v4568_v36, -inf }
0x188d   :  { %v4719_v12 = vpop.f32.mrf.mxu1  ;;  %4812 = vmax.xlane.f32.xlu1 %v4811_v42  ;;  %4809 = vmax.xlane.f32.xlu0 %v4808_v43 }
0x188e   :  { %v4720_v44 = vadd.f32 %v4719_v12, %v9373_v37 }
0x188f   :  { %v8698_v48 = vpop.f32.mrf.mxu1 }
0x1890   :  { %v4817_v49 = vsel %vm271_vm5, %v4720_v44, -inf }
0x1891   :  { %4818 = vmax.xlane.f32.xlu1 %v4817_v49  ;;  %4815 = vmax.xlane.f32.xlu0 %v4814_v52  ;;  %v4795_v53 = vpop.f32.mrf.mxu0 }
0x1892   :  { %v4796_v55 = vadd.f32 %v4795_v53, %v9376_v41 }
0x1893   :  { %v8703_v56 = vpop.f32.mrf.mxu0 }
0x1894   :  { %v4820_v58 = vsel %vm271_vm5, %v4796_v55, -inf }
0x1895   :  { %4821 = vmax.xlane.f32.xlu0 %v4820_v58 }
0x18a2   :  { %4887 = vrot.lane.b32.xlu1 %v9939_v1, %s9178_s1 }
0x18a6   :  { %5039 = vrot.lane.b32.xlu1 %v9961_v4, %s9178_s1 }
0x18aa   :  { %5115 = vrot.lane.b32.xlu1 %v9953_v2, %s9178_s1 }
0x18ab   :  { %4963 = vrot.lane.b32.xlu0 %v9933_v0, %s9178_s1 }
0x18ae   :  { %5267 = vrot.lane.b32.xlu1 %v9957_v3, %s9178_s1 }
0x18af   :  { %5191 = vrot.lane.b32.xlu0 %v9965_v5, %s9178_s1  ;;  %v4801_v47 = vpop.xlane.xlu0 %4800 }
0x18b0   :  { %v4823_v63 = vsub.f32 %v4264_v40, %v4801_v47 }
0x18b2   :  { %v4831_v25 = vmul.f32 1.442695, %v4823_v63 }
0x18b3   :  { %v4804_v59 = vpop.xlane.xlu1 %4803 }
0x18b4   :  { %v4824_v61 = vsub.f32 %v4340_v20, %v4804_v59 }
0x18b6   :  { %v4833_v24 = vmul.f32 1.442695, %v4824_v61 }
0x18b8   :  { %9039 = vpow2.f32 %v4833_v24 }
0x18b9   :  { %9041 = vpow2.f32 %v4831_v25 }
0x18c5   :  { %v10053_v1 = vpop.eup %9039 }
0x18c6   :  { %v4850_v2 = vsel %vm271_vm5, %v10053_v1, 0.0  ;;  %v10057_v0 = vpop.eup %9041 }
0x18c7   :  { %v4847_v3 = vsel %vm271_vm5, %v10057_v0, 0.0 }
0x18ce   :  { %4851 = vadd.xlane.f32.xlu0 %v4850_v2 }
0x18d2   :  { %4848 = vadd.xlane.f32.xlu1 %v4847_v3 }
0x1912   :  { %v4807_v4 = vpop.xlane.xlu0 %4806 }
0x1913   :  { %v4825_v5 = vsub.f32 %v4416_v33, %v4807_v4 }
0x1915   :  { %v4835_v8 = vmul.f32 1.442695, %v4825_v5 }
0x1916   :  { %v4813_v51 = vpop.xlane.xlu1 %4812  ;;  %v4810_v9 = vpop.xlane.xlu0 %4809 }
0x1917   :  { %9043 = vpow2.f32 %v4835_v8  ;;  %v4827_v10 = vsub.f32 %v4568_v36, %v4813_v51  ;;  %v4826_v11 = vsub.f32 %v4492_v34, %v4810_v9 }
0x1919   :  { %v4839_v54 = vmul.f32 1.442695, %v4827_v10  ;;  %v4837_v14 = vmul.f32 1.442695, %v4826_v11 }
0x191a   :  { %v4819_v16 = vpop.xlane.xlu1 %4818  ;;  %v4816_v17 = vpop.xlane.xlu0 %4815 }
0x191b   :  { %9045 = vpow2.f32 %v4839_v54  ;;  %v4829_v40 = vsub.f32 %v4720_v44, %v4819_v16  ;;  %v4828_v45 = vsub.f32 %v4644_v13, %v4816_v17 }
0x191c   :  { %9047 = vpow2.f32 %v4837_v14 }
0x191d   :  { %v4843_v18 = vmul.f32 1.442695, %v4829_v40  ;;  %v4841_v19 = vmul.f32 1.442695, %v4828_v45  ;;  %v5529_v45 = vld [vmem:[#allocation2 + $0x58] sm:$0xff] }
0x191e   :  { %v4888_v20 = vpop.permute.xlu1 %4887  ;;  %v4822_v21 = vpop.xlane.xlu0 %4821 }
0x191f   :  { %9049 = vpow2.f32 %v4843_v18  ;;  %v4830_v22 = vsub.f32 %v4796_v55, %v4822_v21  ;;  %8705 = vmatpush3.msra.mxu1 %v4888_v20  ;;  %v5528_v18 = vld [vmem:[#allocation2 + $0x50] sm:$0xff]  ;;  %v5526_v20 = vld [vmem:[#allocation2 + $0x40] sm:$0xff] }
0x1920   :  { %9051 = vpow2.f32 %v4841_v19  ;;  %8714 = vmatprep.subr.mxu1 %v9171_v15  ;;  %v5527_v19 = vld [vmem:[#allocation2 + $0x48] sm:$0xff] }
0x1921   :  { %v4845_v23 = vmul.f32 1.442695, %v4830_v22 }
0x1922   :  { %v4964_v26 = vpop.permute.xlu0 %4963  ;;  %v5040_v43 = vpop.permute.xlu1 %5039 }
0x1923   :  { %9053 = vpow2.f32 %v4845_v23  ;;  %8710 = vmatpush3.msra.mxu0 %v4964_v26 }
0x1924   :  { %v9044_v27 = vpop.eup %9043  ;;  %8719 = vmatprep.subr.mxu0 %v9171_v15 }
0x1925   :  { %v4853_v28 = vsel %vm271_vm5, %v9044_v27, 0.0 }
0x1926   :  { %4854 = vadd.xlane.f32.xlu1 %v4853_v28  ;;  %v5116_v12 = vpop.permute.xlu1 %5115  ;;  %v5192_v44 = vpop.permute.xlu0 %5191 }
0x1928   :  { %v9046_v29 = vpop.eup %9045 }
0x1929   :  { %v9048_v33 = vpop.eup %9047  ;;  %v4859_v31 = vsel %vm271_vm5, %v9046_v29, 0.0 }
0x192a   :  { %4860 = vadd.xlane.f32.xlu1 %v4859_v31  ;;  %v4856_v34 = vsel %vm271_vm5, %v9048_v33, 0.0  ;;  %v5268_v48 = vpop.permute.xlu1 %5267 }
0x192b   :  { %4857 = vadd.xlane.f32.xlu0 %v4856_v34 }
0x192c   :  { %v9050_v30 = vpop.eup %9049 }
0x192d   :  { %v10066_v35 = vpop.eup %9051  ;;  %v4865_v36 = vsel %vm271_vm5, %v9050_v30, 0.0 }
0x192e   :  { %4866 = vadd.xlane.f32.xlu1 %v4865_v36  ;;  %v4862_v39 = vsel %vm271_vm5, %v10066_v35, 0.0 }
0x192f   :  { %4863 = vadd.xlane.f32.xlu0 %v4862_v39 }
0x1930   :  { %v10071_v13 = vpop.eup %9053 }
0x1931   :  { %v4868_v42 = vsel %vm271_vm5, %v10071_v13, 0.0 }
0x1933   :  { %4869 = vadd.xlane.f32.xlu0 %v4868_v42 }
0x193f   :  { %5419 = vrot.lane.b32.xlu1 %v9973_v7, %s9178_s1 }
0x1949   :  { %5343 = vrot.lane.b32.xlu0 %v9969_v6, %s9178_s1 }
0x1957   :  { %v4852_v49 = vpop.xlane.xlu0 %4851 }
0x1958   :  { %9055 = vrcp.f32 %v4852_v49 }
0x195b   :  { %v4849_v52 = vpop.xlane.xlu1 %4848 }
0x195c   :  { %9057 = vrcp.f32 %v4849_v52 }
0x1965   :  { %v9056_v53 = vpop.eup %9055 }
0x1966   :  { %v4874_v55 = vmul.f32 %v9056_v53, %v10053_v1 }
0x1968   :  { %8712 = vmatmul.mubr.msk.f32.vlgmr.msra.gmra.mxu0 %vm271_vm5, %v4874_v55 }
0x1969   :  { %v9058_v56 = vpop.eup %9057  ;;  %8720 = vmatpush3.msra.mxu0 %v5116_v12  ;;  %8721 = vmatprep.mubr.msk.f32.mxu0 %vm9174_vm4, %v9171_v15 }
0x196a   :  { %v4872_v6 = vmul.f32 %v9058_v56, %v10057_v0  ;;  %8729 = vmatprep.subr.mxu0 %v9171_v15  ;;  %v8023_v56 = vld [vmem:[%s10509_s6 + $0x84] ss:$0 sm:$0xff] }
0x196c   :  { %8707 = vmatmul.mubr.msk.f32.vlgmr.msra.gmra.mxu1 %vm271_vm5, %v4872_v6 }
0x196d   :  { %8715 = vmatpush3.msra.mxu1 %v5040_v43  ;;  %8716 = vmatprep.mubr.msk.f32.mxu1 %vm9174_vm4, %v9171_v15 }
0x196e   :  { %8724 = vmatprep.subr.mxu1 %v9171_v15 }
0x19af   :  { %v4855_v7 = vpop.xlane.xlu1 %4854 }
0x19b0   :  { %9059 = vrcp.f32 %v4855_v7 }
0x19b3   :  { %v4861_v58 = vpop.xlane.xlu1 %4860 }
0x19b4   :  { %9061 = vrcp.f32 %v4861_v58  ;;  %v4858_v59 = vpop.xlane.xlu0 %4857 }
0x19b5   :  { %9063 = vrcp.f32 %v4858_v59 }
0x19b7   :  { %v4867_v61 = vpop.xlane.xlu1 %4866 }
0x19b8   :  { %9065 = vrcp.f32 %v4867_v61  ;;  %v4864_v47 = vpop.xlane.xlu0 %4863 }
0x19b9   :  { %9067 = vrcp.f32 %v4864_v47 }
0x19bb   :  { %v5420_v10 = vpop.permute.xlu1 %5419 }
0x19bc   :  { %v4870_v63 = vpop.xlane.xlu0 %4869 }
0x19bd   :  { %v9060_v24 = vpop.eup %9059  ;;  %9069 = vrcp.f32 %v4870_v63 }
0x19be   :  { %v4876_v25 = vmul.f32 %v9060_v24, %v9044_v27 }
0x19c0   :  { %8717 = vmatmul.mubr.msk.f32.vlgmr.msra.gmra.mxu1 %vm271_vm5, %v4876_v25  ;;  %v5344_v4 = vpop.permute.xlu0 %5343 }
0x19c1   :  { %v9062_v1 = vpop.eup %9061  ;;  %8725 = vmatpush3.msra.mxu1 %v5192_v44  ;;  %8726 = vmatprep.mubr.msk.f32.mxu1 %vm9174_vm4, %v9171_v15 }
0x19c2   :  { %v9064_v2 = vpop.eup %9063  ;;  %8734 = vmatprep.subr.mxu1 %v9171_v15  ;;  %v4880_v0 = vmul.f32 %v9062_v1, %v9046_v29 }
0x19c3   :  { %v4878_v3 = vmul.f32 %v9064_v2, %v9048_v33 }
0x19c4   :  { %8727 = vmatmul.mubr.msk.f32.vlgmr.msra.gmra.mxu1 %vm271_vm5, %v4880_v0 }
0x19c5   :  { %v9066_v5 = vpop.eup %9065  ;;  %8722 = vmatmul.mubr.msk.f32.vlgmr.msra.gmra.mxu0 %vm271_vm5, %v4878_v3  ;;  %8735 = vmatpush3.msra.mxu1 %v5344_v4 }
0x19c6   :  { %v9068_v8 = vpop.eup %9067  ;;  %8730 = vmatpush3.msra.mxu0 %v5268_v48  ;;  %8731 = vmatprep.mubr.msk.f32.mxu0 %vm9174_vm4, %v9171_v15  ;;  %v4884_v51 = vmul.f32 %v9066_v5, %v9050_v30 }
0x19c7   :  { %8736 = vmatprep.mubr.msk.f32.mxu1 %vm9174_vm4, %v9171_v15  ;;  %8739 = vmatprep.subr.mxu0 %v9171_v15  ;;  %v4882_v9 = vmul.f32 %v9068_v8, %v10066_v35 }
0x19c8   :  { %8737 = vmatmul.mubr.msk.f32.vlgmr.msra.gmra.mxu1 %vm271_vm5, %v4884_v51  ;;  %8744 = vmatprep.subr.mxu1 %v5529_v45 }
0x19c9   :  { %8732 = vmatmul.mubr.msk.f32.vlgmr.msra.gmra.mxu0 %vm271_vm5, %v4882_v9  ;;  %8745 = vmatpush3.msra.mxu1 %v5529_v45  ;;  %v5661_v9 = vld [vmem:[#allocation4 + $0x50] sm:$0xff] }
0x19ca   :  { %v9070_v11 = vpop.eup %9069  ;;  %8740 = vmatpush3.msra.mxu0 %v5420_v10  ;;  %8741 = vmatprep.mubr.msk.f32.mxu0 %vm9174_vm4, %v9171_v15  ;;  %v5660_v10 = vld [vmem:[#allocation4 + $0x48] sm:$0xff] }
0x19cb   :  { %v4886_v54 = vmul.f32 %v9070_v11, %v10071_v13  ;;  %8746 = vmatprep.subr.mxu1 %v5528_v18  ;;  %v5659_v11 = vld [vmem:[#allocation4 + $0x40] sm:$0xff] }
0x19cc   :  { %8747 = vmatpush3.msra.mxu1 %v5528_v18 }
0x19cd   :  { %8742 = vmatmul.mubr.msk.f32.vlgmr.msra.gmra.mxu0 %vm271_vm5, %v4886_v54  ;;  %8748 = vmatprep.subr.mxu1 %v5527_v19  ;;  %v8038_v54 = vld [vmem:[%s10508_s5 + $0xb8] sm:$0xff] }
0x19ce   :  { %8749 = vmatpush3.msra.mxu1 %v5527_v19 }
0x19cf   :  { %8750 = vmatprep.subr.mxu1 %v5526_v20 }
0x19d0   :  { %8751 = vmatpush3.msra.mxu1 %v5526_v20 }
0x19d1   :  { %8766 = vmatprep.subr.mxu1 %v8038_v54 }
0x1a28   :  { %v5035_v14 = vpop.f32.mrf.mxu0 }
0x1a2a   :  { %v8713_v16 = vpop.f32.mrf.mxu0 }
0x1a2b   :  { %v8036_v16 = vld [vmem:[%s10508_s5 + $0xa8] sm:$0xff] }
0x1a2c   :  { %v4959_v17 = vpop.f32.mrf.mxu1 }
0x1a2e   :  { %v8708_v40 = vpop.f32.mrf.mxu1 }
0x1a80   :  { %v5111_v21 = vpop.f32.mrf.mxu1 }
0x1a81   :  { %5497 = vrot.lane.b32.xlu0 %v5111_v21, %s9169_s28 }
0x1a82   :  { %v8718_v22 = vpop.f32.mrf.mxu1 }
0x1a84   :  { %v5263_v23 = vpop.f32.mrf.mxu1 }
0x1a85   :  { %v5187_v26 = vpop.f32.mrf.mxu0  ;;  %5505 = vrot.lane.b32.xlu0 %v5263_v23, %s9179_s13  ;;  %v8026_v23 = vld [vmem:[%s10509_s6 + $0x86] ss:$0 sm:$0xff] }
0x1a86   :  { %5499 = vrot.lane.b32.xlu1 %v5187_v26, %s9169_s28  ;;  %v8728_v27 = vpop.f32.mrf.mxu1 }
0x1a87   :  { %v8723_v28 = vpop.f32.mrf.mxu0  ;;  %v8027_v27 = vld [vmem:[%s10509_s6 + $0x87] ss:$0 sm:$0xff] }
0x1a88   :  { %v5415_v29 = vpop.f32.mrf.mxu1 }
0x1a89   :  { %v5339_v33 = vpop.f32.mrf.mxu0  ;;  %5513 = vrot.lane.b32.xlu0 %v5415_v29, %s9180_s14 }
0x1a8a   :  { %5507 = vrot.lane.b32.xlu1 %v5339_v33, %s9179_s13  ;;  %v8738_v31 = vpop.f32.mrf.mxu1 }
0x1a8b   :  { %v8733_v34 = vpop.f32.mrf.mxu0 }
0x1a8d   :  { %v5491_v30 = vpop.f32.mrf.mxu0 }
0x1a8e   :  { %5515 = vrot.lane.b32.xlu1 %v5491_v30, %s9180_s14 }
0x1a8f   :  { %v8743_v35 = vpop.f32.mrf.mxu0 }
0x1a90   :  { %v8034_v35 = vld [vmem:[%s10508_s5 + $0x98] sm:$0xff] }
0x1af3   :  { %v5498_v36 = vpop.permute.xlu0 %5497 }
0x1af4   :  { %v5519_v42 = vsel %vm271_vm5, %v4959_v17, %v5498_v36  ;;  %v8035_v17 = vld [vmem:[%s10508_s5 + $0xa0] sm:$0xff]  ;;  %v8033_v36 = vld [vmem:[%s10508_s5 + $0x90] sm:$0xff] }
0x1af7   :  { %v5506_v39 = vpop.permute.xlu0 %5505 }
0x1af8   :  { %v5500_v13 = vpop.permute.xlu1 %5499  ;;  %v5521_v43 = vsel %vm58_vm0, %v5519_v42, %v5506_v39  ;;  %v8032_v39 = vld [vmem:[%s10508_s5 + $0x88] sm:$0xff]  ;;  %v8028_v42 = vld [vmem:[%s10509_s6 + $0x76] ss:$0 sm:$0xff] }
0x1af9   :  { %v5520_v49 = vsel %vm271_vm5, %v5035_v14, %v5500_v13  ;;  %v8037_v14 = vld [vmem:[%s10508_s5 + $0xb0] sm:$0xff]  ;;  %v8031_v13 = vld [vmem:[%s10508_s5 + $0x80] sm:$0xff] }
0x1afb   :  { %v5514_v12 = vpop.permute.xlu0 %5513 }
0x1afc   :  { %v5523_v44 = vsel %vm1602_vm8, %v5521_v43, %v5514_v12  ;;  %v5508_v48 = vpop.permute.xlu1 %5507 }
0x1afd   :  { %8752 = vmatprep.mubr.msk.f32.mxu1 %vm146_vm3, %v5523_v44  ;;  %v5522_v52 = vsel %vm58_vm0, %v5520_v49, %v5508_v48 }
0x1b00   :  { %v5516_v53 = vpop.permute.xlu1 %5515 }
0x1b01   :  { %v5524_v55 = vsel %vm1602_vm8, %v5522_v52, %v5516_v53  ;;  %v8039_v53 = vld [vmem:[%s10509_s6 + $0x85] ss:$0 sm:$0xff] }
0x1b02   :  { %8753 = vmatmul.mubr.msk.f32.vlgmr.msra.gmra.mxu1 %vm146_vm3, %v5524_v55 }
0x1b03   :  { %8767 = vmatpush3.msra.mxu1 %v8038_v54 }
0x1b04   :  { %8768 = vmatprep.subr.mxu1 %v8037_v14 }
0x1b05   :  { %8769 = vmatpush3.msra.mxu1 %v8037_v14 }
0x1b06   :  { %8770 = vmatprep.subr.mxu1 %v8036_v16 }
0x1b07   :  { %8771 = vmatpush3.msra.mxu1 %v8036_v16 }
0x1b08   :  { %8772 = vmatprep.subr.mxu1 %v8035_v17 }
0x1b09   :  { %8773 = vmatpush3.msra.mxu1 %v8035_v17 }
0x1b0a   :  { %8774 = vmatprep.subr.mxu1 %v8034_v35 }
0x1b0b   :  { %8775 = vmatpush3.msra.mxu1 %v8034_v35 }
0x1b0c   :  { %8776 = vmatprep.subr.mxu1 %v8033_v36 }
0x1b0d   :  { %8777 = vmatpush3.msra.mxu1 %v8033_v36 }
0x1b0e   :  { %8778 = vmatprep.subr.mxu1 %v8032_v39 }
0x1b0f   :  { %8779 = vmatpush3.msra.mxu1 %v8032_v39 }
0x1b10   :  { %8780 = vmatprep.subr.mxu1 %v8031_v13 }
0x1b11   :  { %8781 = vmatpush3.msra.mxu1 %v8031_v13 }
0x1b12   :  { %8806 = vmatprep.subr.mxu1 %v9171_v15 }
0x1bc2   :  { %v8754_v6 = vpop.f32.mrf.mxu1 }
0x1bc3   :  { %v5613_v7 = vadd.f32 %v8754_v6, %v8023_v56 }
0x1bc4   :  { %v5607_v58 = vpop.f32.mrf.mxu1 }
0x1bc5   :  { %v5617_v59 = vadd.f32 %v5613_v7, %v9919_v60  ;;  %v5608_v61 = vadd.f32 %v8023_v56, %v5607_v58 }
0x1bc7   :  { %v5616_v47 = vadd.f32 %v5608_v61, %v9910_v50  ;;  %v5623_v63 = vsel %vm146_vm3, %v5617_v59, 0.0  ;;  %v5662_v50 = vld [vmem:[#allocation4 + $0x58] sm:$0xff] }
0x1bc8   :  { %5624 = vadd.xlane.f32.xlu1 %v5623_v63  ;;  %8755 = vmatprep.subr.mxu0 %v5662_v50 }
0x1bc9   :  { %v5620_v24 = vsel %vm146_vm3, %v5616_v47, 0.0  ;;  %8756 = vmatpush3.msra.mxu0 %v5662_v50  ;;  %v8045_v50 = vld [vmem:[%s10505_s2 + $0x68] sm:$0xff] }
0x1bca   :  { %5621 = vadd.xlane.f32.xlu0 %v5620_v24  ;;  %8757 = vmatprep.subr.mxu0 %v5661_v9 }
0x1bcb   :  { %8758 = vmatpush3.msra.mxu0 %v5661_v9  ;;  %v8044_v9 = vld [vmem:[%s10505_s2 + $0x60] sm:$0xff] }
0x1bcc   :  { %8759 = vmatprep.subr.mxu0 %v5660_v10 }
0x1bcd   :  { %8760 = vmatpush3.msra.mxu0 %v5660_v10 }
0x1bce   :  { %8761 = vmatprep.subr.mxu0 %v5659_v11 }
0x1bcf   :  { %8762 = vmatpush3.msra.mxu0 %v5659_v11 }
0x1c51   :  { %v5625_v25 = vpop.xlane.xlu1 %5624 }
0x1c52   :  { %v5627_v1 = vmul.f32 0.03125, %v5625_v25 }
0x1c53   :  { %v5622_v2 = vpop.xlane.xlu0 %5621 }
0x1c54   :  { %v5626_v0 = vmul.f32 0.03125, %v5622_v2  ;;  %v5629_v3 = vsub.f32 %v5617_v59, %v5627_v1 }
0x1c56   :  { %v5628_v4 = vsub.f32 %v5616_v47, %v5626_v0  ;;  %v5631_v51 = vmul.f32 %v5629_v3, %v5629_v3 }
0x1c58   :  { %v5630_v5 = vmul.f32 %v5628_v4, %v5628_v4  ;;  %v5635_v60 = vsel %vm146_vm3, %v5631_v51, 0.0  ;;  %v8047_v51 = vld [vmem:[%s10505_s2 + $0x78] sm:$0xff] }
0x1c59   :  { %8785 = vmatprep.subr.mxu0 %v8047_v51 }
0x1c5a   :  { %v5632_v8 = vsel %vm146_vm3, %v5630_v5, 0.0 }
0x1c5b   :  { %5633 = vadd.xlane.f32.xlu0 %v5632_v8 }
0x1c5f   :  { %5636 = vadd.xlane.f32.xlu0 %v5635_v60  ;;  %v8046_v60 = vld [vmem:[%s10505_s2 + $0x70] sm:$0xff] }
0x1ce4   :  { %v5634_v40 = vpop.xlane.xlu0 %5633 }
0x1ce5   :  { %v5638_v45 = vmul.f32 0.03125, %v5634_v40 }
0x1ce7   :  { %v5640_v18 = vadd.f32 1e-05, %v5638_v45  ;;  %v8042_v45 = vld [vmem:[%s10509_s6 + $0x88] ss:$0 sm:$0xff] }
0x1ce8   :  { %v5637_v19 = vpop.xlane.xlu0 %5636 }
0x1ce9   :  { %9071 = vrsqrt.f32 %v5640_v18  ;;  %v5639_v20 = vmul.f32 0.03125, %v5637_v19 }
0x1ceb   :  { %v5641_v21 = vadd.f32 1e-05, %v5639_v20 }
0x1ced   :  { %9073 = vrsqrt.f32 %v5641_v21 }
0x1cf6   :  { %v9072_v22 = vpop.eup %9071 }
0x1cf7   :  { %v5644_v26 = vmul.f32 %v9072_v22, %v5628_v4  ;;  %v8043_v22 = vld [vmem:[%s10509_s6 + $0x89] ss:$0 sm:$0xff] }
0x1cf9   :  { %v5650_v28 = vmul.f32 %v8026_v23, %v5644_v26 }
0x1cfa   :  { %v9074_v29 = vpop.eup %9073 }
0x1cfb   :  { %v5645_v33 = vmul.f32 %v9074_v29, %v5629_v3  ;;  %v5656_v31 = vadd.f32 %v8027_v27, %v5650_v28  ;;  %v8048_v28 = vld [vmem:[%s10509_s6 + $0x73] ss:$0 sm:$0xff] }
0x1cfd   :  { %v5651_v34 = vmul.f32 %v8026_v23, %v5645_v33  ;;  %8763 = vmatprep.mubr.msk.f32.mxu0 %vm146_vm3, %v5656_v31 }
0x1cff   :  { %v5657_v30 = vadd.f32 %v8027_v27, %v5651_v34 }
0x1d01   :  { %8764 = vmatmul.mubr.msk.f32.vlgmr.msra.gmra.mxu0 %vm146_vm3, %v5657_v30 }
0x1d02   :  { %8786 = vmatpush3.msra.mxu0 %v8047_v51 }
0x1d03   :  { %8787 = vmatprep.subr.mxu0 %v8046_v60 }
0x1d04   :  { %8788 = vmatpush3.msra.mxu0 %v8046_v60 }
0x1d05   :  { %8789 = vmatprep.subr.mxu0 %v8045_v50 }
0x1d06   :  { %8790 = vmatpush3.msra.mxu0 %v8045_v50 }
0x1d07   :  { %8791 = vmatprep.subr.mxu0 %v8044_v9 }
0x1d08   :  { %8792 = vmatpush3.msra.mxu0 %v8044_v9 }
0x1d09   :  { %8796 = vmatprep.subr.mxu0 %v9171_v15 }
0x1dc1   :  { %v8765_v43 = vpop.f32.mrf.mxu0 }
0x1dc2   :  { %v5746_v12 = vadd.f32 %v8765_v43, %v8028_v42 }
0x1dc3   :  { %v5740_v44 = vpop.f32.mrf.mxu0 }
0x1dc4   :  { %v5741_v48 = vadd.f32 %v8028_v42, %v5740_v44  ;;  %v5750_v52 = vmax.f32 %v5746_v12, 0.0 }
0x1dc6   :  { %v5749_v49 = vmax.f32 %v5741_v48, 0.0 }
0x1dc8   :  { %8782 = vmatprep.mubr.msk.f32.mxu1 %vm1843_vm9, %v5749_v49 }
0x1dc9   :  { %8783 = vmatmul.mubr.msk.f32.vlgmr.msra.gmra.mxu1 %vm1843_vm9, %v5750_v52 }
0x1dca   :  { %8808 = vmatprep.mubr.msk.f32.mxu1 %vm9174_vm4, %v9171_v15 }
0x1e89   :  { %v8784_v55 = vpop.f32.mrf.mxu1 }
0x1e8a   :  { %v5843_v56 = vadd.f32 %v8784_v55, %v8039_v53 }
0x1e8b   :  { %v5837_v6 = vpop.f32.mrf.mxu1 }
0x1e8c   :  { %v5847_v7 = vadd.f32 %v5843_v56, %v5657_v30  ;;  %v5838_v58 = vadd.f32 %v8039_v53, %v5837_v6 }
0x1e8e   :  { %v5846_v59 = vadd.f32 %v5838_v58, %v5656_v31  ;;  %v5853_v61 = vsel %vm146_vm3, %v5847_v7, 0.0 }
0x1e8f   :  { %5854 = vadd.xlane.f32.xlu0 %v5853_v61 }
0x1e90   :  { %v5850_v47 = vsel %vm146_vm3, %v5846_v59, 0.0 }
0x1e91   :  { %5851 = vadd.xlane.f32.xlu1 %v5850_v47 }
0x1f18   :  { %v5855_v63 = vpop.xlane.xlu0 %5854 }
0x1f19   :  { %v5857_v24 = vmul.f32 0.03125, %v5855_v63 }
0x1f1a   :  { %v5852_v25 = vpop.xlane.xlu1 %5851 }
0x1f1b   :  { %v5859_v1 = vsub.f32 %v5847_v7, %v5857_v24  ;;  %v5856_v2 = vmul.f32 0.03125, %v5852_v25 }
0x1f1d   :  { %v5858_v0 = vsub.f32 %v5846_v59, %v5856_v2  ;;  %v5861_v3 = vmul.f32 %v5859_v1, %v5859_v1 }
0x1f1f   :  { %v5865_v4 = vsel %vm146_vm3, %v5861_v3, 0.0  ;;  %v5860_v5 = vmul.f32 %v5858_v0, %v5858_v0 }
0x1f20   :  { %5866 = vadd.xlane.f32.xlu0 %v5865_v4 }
0x1f21   :  { %v5862_v8 = vsel %vm146_vm3, %v5860_v5, 0.0 }
0x1f22   :  { %5863 = vadd.xlane.f32.xlu1 %v5862_v8 }
0x1fa9   :  { %v5867_v10 = vpop.xlane.xlu0 %5866 }
0x1faa   :  { %v5869_v11 = vmul.f32 0.03125, %v5867_v10 }
0x1fab   :  { %v5864_v54 = vpop.xlane.xlu1 %5863 }
0x1fac   :  { %v5871_v14 = vadd.f32 1e-05, %v5869_v11  ;;  %v5868_v16 = vmul.f32 0.03125, %v5864_v54 }
0x1fae   :  { %9075 = vrsqrt.f32 %v5871_v14  ;;  %v5870_v17 = vadd.f32 1e-05, %v5868_v16 }
0x1fb0   :  { %9077 = vrsqrt.f32 %v5870_v17 }
0x1fbb   :  { %v9076_v40 = vpop.eup %9075 }
0x1fbc   :  { %v5875_v18 = vmul.f32 %v9076_v40, %v5859_v1 }
0x1fbd   :  { %v9078_v19 = vpop.eup %9077 }
0x1fbe   :  { %v5874_v20 = vmul.f32 %v9078_v19, %v5858_v0  ;;  %v5881_v21 = vmul.f32 %v8042_v45, %v5875_v18 }
0x1fc0   :  { %v5880_v23 = vmul.f32 %v8042_v45, %v5874_v20  ;;  %v10198_v27 = vadd.f32 %v8043_v22, %v5881_v21 }
0x1fc2   :  { %v10196_v26 = vadd.f32 %v8043_v22, %v5880_v23 }
0x1fc4   :  { %8793 = vmatprep.mubr.msk.f32.mxu0 %vm146_vm3, %v10196_v26 }
0x1fc5   :  { %8794 = vmatmul.mubr.msk.f32.vlgmr.msra.gmra.mxu0 %vm146_vm3, %v10198_v27 }
0x1fc6   :  { %8798 = vmatprep.mubr.msk.f32.mxu0 %vm9174_vm4, %v9171_v15 }
0x2085   :  { %v8795_v29 = vpop.f32.mrf.mxu0 }
0x2086   :  { %v10209_v33 = vadd.f32 %v8795_v29, %v8048_v28 }
0x2087   :  { %v5970_v31 = vpop.f32.mrf.mxu0 }
0x2088   :  { %v10211_v34 = vadd.f32 %v8048_v28, %v5970_v31  ;;  %5983 = vrot.lane.b32.xlu0 %v10209_v33, %s9173_s30 }
0x208a   :  { %5981 = vrot.lane.b32.xlu1 %v10211_v34, %s9173_s30 }
0x208c   :  { %5989 = vrot.lane.b32.xlu0 %v10211_v34, %s9175_s8 }
0x208e   :  { %5985 = vrot.lane.b32.xlu1 %v10211_v34, %s9172_s29 }
0x2090   :  { %5993 = vrot.lane.b32.xlu0 %v10211_v34, %s9176_s9 }
0x2092   :  { %5987 = vrot.lane.b32.xlu1 %v10209_v33, %s9172_s29 }
0x2096   :  { %5991 = vrot.lane.b32.xlu1 %v10209_v33, %s9175_s8 }
0x209a   :  { %6069 = vrot.lane.b32.xlu1 %v10209_v33, %s9176_s9 }
0x20fa   :  { %v10229_v30 = vpop.permute.xlu0 %5983 }
0x20fb   :  { %6221 = vrot.lane.b32.xlu1 %v10229_v30, %s9176_s9 }
0x20fc   :  { %v10233_v35 = vpop.permute.xlu1 %5981 }
0x20fd   :  { %6145 = vrot.lane.b32.xlu0 %v10233_v35, %s9176_s9 }
0x20fe   :  { %v10237_v36 = vpop.permute.xlu0 %5989 }
0x2100   :  { %v10239_v39 = vpop.permute.xlu1 %5985 }
0x2101   :  { %6297 = vrot.lane.b32.xlu0 %v10239_v39, %s9176_s9 }
0x2102   :  { %v5994_v13 = vpop.permute.xlu0 %5993 }
0x2103   :  { %8797 = vmatpush3.xpose.msk.msra.mxu0 %vm271_vm5, %v5994_v13 }
0x2104   :  { %v10244_v42 = vpop.permute.xlu1 %5987  ;;  %8801 = vmatprep.subr.mxu0 %v9171_v15 }
0x2105   :  { %6449 = vrot.lane.b32.xlu0 %v10237_v36, %s9176_s9  ;;  %6373 = vrot.lane.b32.xlu1 %v10244_v42, %s9176_s9 }
0x2106   :  { %8799 = vmatmul.mubr.msk.f32.vlgmr.msra.gmra.mxu0 %vm271_vm5, %v10211_v34 }
0x2107   :  { %8803 = vmatprep.mubr.msk.f32.mxu0 %vm9174_vm4, %v9171_v15 }
0x2108   :  { %v10255_v43 = vpop.permute.xlu1 %5991 }
0x2109   :  { %6525 = vrot.lane.b32.xlu1 %v10255_v43, %s9176_s9 }
0x210c   :  { %v6070_v12 = vpop.permute.xlu1 %6069 }
0x210d   :  { %8802 = vmatpush3.xpose.msk.msra.mxu0 %vm271_vm5, %v6070_v12 }
0x210e   :  { %8811 = vmatprep.subr.mxu0 %v9171_v15 }
0x2110   :  { %8804 = vmatmul.mubr.msk.f32.vlgmr.msra.gmra.mxu0 %vm271_vm5, %v10209_v33 }
0x2111   :  { %8813 = vmatprep.mubr.msk.f32.mxu0 %vm9174_vm4, %v9171_v15 }
0x216d   :  { %v6222_v44 = vpop.permute.xlu1 %6221 }
0x216e   :  { %8812 = vmatpush3.xpose.msk.msra.mxu0 %vm271_vm5, %v6222_v44 }
0x216f   :  { %v6146_v48 = vpop.permute.xlu0 %6145  ;;  %8821 = vmatprep.subr.mxu0 %v9171_v15 }
0x2170   :  { %8807 = vmatpush3.xpose.msk.msra.mxu1 %vm271_vm5, %v6146_v48 }
0x2171   :  { %8814 = vmatmul.mubr.msk.f32.vlgmr.msra.gmra.mxu0 %vm271_vm5, %v10229_v30  ;;  %8816 = vmatprep.subr.mxu1 %v9171_v15 }
0x2172   :  { %8823 = vmatprep.mubr.msk.f32.mxu0 %vm9174_vm4, %v9171_v15 }
0x2173   :  { %8809 = vmatmul.mubr.msk.f32.vlgmr.msra.gmra.mxu1 %vm271_vm5, %v10233_v35  ;;  %v6298_v49 = vpop.permute.xlu0 %6297 }
0x2174   :  { %8817 = vmatpush3.xpose.msk.msra.mxu1 %vm271_vm5, %v6298_v49  ;;  %8818 = vmatprep.mubr.msk.f32.mxu1 %vm9174_vm4, %v9171_v15 }
0x2175   :  { %8826 = vmatprep.subr.mxu1 %v9171_v15 }
0x2177   :  { %8819 = vmatmul.mubr.msk.f32.vlgmr.msra.gmra.mxu1 %vm271_vm5, %v10239_v39  ;;  %v6450_v52 = vpop.permute.xlu0 %6449  ;;  %v6374_v53 = vpop.permute.xlu1 %6373 }
0x2178   :  { %8822 = vmatpush3.xpose.msk.msra.mxu0 %vm271_vm5, %v6374_v53  ;;  %8827 = vmatpush3.xpose.msk.msra.mxu1 %vm271_vm5, %v6450_v52 }
0x2179   :  { %8828 = vmatprep.mubr.msk.f32.mxu1 %vm9174_vm4, %v9171_v15  ;;  %8831 = vmatprep.subr.mxu0 %v9171_v15 }
0x217a   :  { %8836 = vmatprep.subr.mxu1 %v9171_v15 }
0x217b   :  { %8824 = vmatmul.mubr.msk.f32.vlgmr.msra.gmra.mxu0 %vm271_vm5, %v10244_v42  ;;  %8829 = vmatmul.mubr.msk.f32.vlgmr.msra.gmra.mxu1 %vm271_vm5, %v10237_v36  ;;  %v6526_v55 = vpop.permute.xlu1 %6525 }
0x217c   :  { %8832 = vmatpush3.xpose.msk.msra.mxu0 %vm271_vm5, %v6526_v55  ;;  %8833 = vmatprep.mubr.msk.f32.mxu0 %vm9174_vm4, %v9171_v15 }
0x217d   :  { %8841 = vmatprep.subr.mxu0 %v9171_v15  ;;  %8838 = vmatprep.mubr.msk.f32.mxu1 %vm9174_vm4, %v9171_v15 }
0x217f   :  { %8834 = vmatmul.mubr.msk.f32.vlgmr.msra.gmra.mxu0 %vm271_vm5, %v10255_v43 }
0x2180   :  { %8843 = vmatprep.mubr.msk.f32.mxu0 %vm9174_vm4, %v9171_v15 }
0x21c6   :  { %v6065_v56 = vpop.f32.mrf.mxu0 }
0x21c7   :  { %v6066_v6 = vadd.f32 %v6065_v56, %v9373_v37 }
0x21c8   :  { %v8800_v7 = vpop.f32.mrf.mxu0 }
0x21c9   :  { %v6601_v58 = vsel %vm271_vm5, %v6066_v6, -inf }
0x21ca   :  { %6602 = vmax.xlane.f32.xlu0 %v6601_v58 }
0x21d0   :  { %v6141_v59 = vpop.f32.mrf.mxu0 }
0x21d1   :  { %v6142_v61 = vadd.f32 %v6141_v59, %v9376_v41 }
0x21d2   :  { %v8805_v47 = vpop.f32.mrf.mxu0 }
0x21d3   :  { %v6604_v63 = vsel %vm271_vm5, %v6142_v61, -inf }
0x21d4   :  { %6605 = vmax.xlane.f32.xlu1 %v6604_v63 }
0x2231   :  { %v6293_v24 = vpop.f32.mrf.mxu0 }
0x2232   :  { %v6294_v3 = vadd.f32 %v6293_v24, %v9376_v41 }
0x2233   :  { %v6217_v25 = vpop.f32.mrf.mxu1  ;;  %v8815_v1 = vpop.f32.mrf.mxu0 }
0x2234   :  { %v6218_v2 = vadd.f32 %v6217_v25, %v9373_v37  ;;  %v6610_v50 = vsel %vm271_vm5, %v6294_v3, -inf }
0x2235   :  { %v8810_v0 = vpop.f32.mrf.mxu1 }
0x2236   :  { %v6607_v4 = vsel %vm271_vm5, %v6218_v2, -inf }
0x2237   :  { %6608 = vmax.xlane.f32.xlu0 %v6607_v4  ;;  %v6369_v5 = vpop.f32.mrf.mxu1 }
0x2238   :  { %v6370_v8 = vadd.f32 %v6369_v5, %v9373_v37 }
0x2239   :  { %v8820_v51 = vpop.f32.mrf.mxu1 }
0x223a   :  { %v6613_v60 = vsel %vm271_vm5, %v6370_v8, -inf }
0x223b   :  { %v6521_v9 = vpop.f32.mrf.mxu1  ;;  %6614 = vmax.xlane.f32.xlu1 %v6613_v60  ;;  %6611 = vmax.xlane.f32.xlu0 %v6610_v50  ;;  %v6445_v10 = vpop.f32.mrf.mxu0 }
0x223c   :  { %v6522_v11 = vadd.f32 %v6521_v9, %v9373_v37  ;;  %v6446_v54 = vadd.f32 %v6445_v10, %v9376_v41 }
0x223d   :  { %v8825_v14 = vpop.f32.mrf.mxu0  ;;  %v8830_v16 = vpop.f32.mrf.mxu1 }
0x223e   :  { %v6619_v17 = vsel %vm271_vm5, %v6522_v11, -inf  ;;  %v6616_v40 = vsel %vm271_vm5, %v6446_v54, -inf }
0x223f   :  { %6620 = vmax.xlane.f32.xlu1 %v6619_v17  ;;  %6617 = vmax.xlane.f32.xlu0 %v6616_v40  ;;  %v6597_v45 = vpop.f32.mrf.mxu0 }
0x2240   :  { %v6598_v18 = vadd.f32 %v6597_v45, %v9376_v41 }
0x2241   :  { %v8835_v19 = vpop.f32.mrf.mxu0 }
0x2242   :  { %v6622_v20 = vsel %vm271_vm5, %v6598_v18, -inf }
0x2243   :  { %6623 = vmax.xlane.f32.xlu0 %v6622_v20 }
0x2250   :  { %6689 = vrot.lane.b32.xlu1 %v10211_v34, %s9178_s1 }
0x2253   :  { %v6603_v21 = vpop.xlane.xlu0 %6602 }
0x2254   :  { %6841 = vrot.lane.b32.xlu1 %v10233_v35, %s9178_s1  ;;  %v6625_v22 = vsub.f32 %v6066_v6, %v6603_v21 }
0x2256   :  { %v6633_v28 = vmul.f32 1.442695, %v6625_v22 }
0x2258   :  { %6917 = vrot.lane.b32.xlu1 %v10229_v30, %s9178_s1 }
0x2259   :  { %6765 = vrot.lane.b32.xlu0 %v10209_v33, %s9178_s1 }
0x225c   :  { %7069 = vrot.lane.b32.xlu1 %v10244_v42, %s9178_s1 }
0x225d   :  { %6993 = vrot.lane.b32.xlu0 %v10239_v39, %s9178_s1  ;;  %v6606_v37 = vpop.xlane.xlu1 %6605 }
0x225e   :  { %v6626_v41 = vsub.f32 %v6142_v61, %v6606_v37 }
0x2260   :  { %v6635_v23 = vmul.f32 1.442695, %v6626_v41 }
0x2262   :  { %9079 = vpow2.f32 %v6635_v23 }
0x2263   :  { %9081 = vpow2.f32 %v6633_v28 }
0x226f   :  { %v10329_v29 = vpop.eup %9079 }
0x2270   :  { %v6652_v31 = vsel %vm271_vm5, %v10329_v29, 0.0  ;;  %v10333_v33 = vpop.eup %9081 }
0x2271   :  { %v6649_v34 = vsel %vm271_vm5, %v10333_v33, 0.0 }
0x227c   :  { %6653 = vadd.xlane.f32.xlu0 %v6652_v31 }
0x2280   :  { %6650 = vadd.xlane.f32.xlu1 %v6649_v34 }
0x22c0   :  { %v6609_v30 = vpop.xlane.xlu0 %6608 }
0x22c1   :  { %v6627_v35 = vsub.f32 %v6218_v2, %v6609_v30 }
0x22c3   :  { %v6637_v39 = vmul.f32 1.442695, %v6627_v35 }
0x22c4   :  { %v6612_v13 = vpop.xlane.xlu0 %6611  ;;  %v6615_v42 = vpop.xlane.xlu1 %6614 }
0x22c5   :  { %9083 = vpow2.f32 %v6637_v39  ;;  %v6628_v12 = vsub.f32 %v6294_v3, %v6612_v13  ;;  %v6629_v44 = vsub.f32 %v6370_v8, %v6615_v42 }
0x22c7   :  { %v6639_v48 = vmul.f32 1.442695, %v6628_v12  ;;  %v6641_v49 = vmul.f32 1.442695, %v6629_v44 }
0x22c8   :  { %v6618_v52 = vpop.xlane.xlu0 %6617  ;;  %v6621_v53 = vpop.xlane.xlu1 %6620 }
0x22c9   :  { %9085 = vpow2.f32 %v6639_v48  ;;  %v6630_v55 = vsub.f32 %v6446_v54, %v6618_v52  ;;  %v6631_v56 = vsub.f32 %v6522_v11, %v6621_v53  ;;  %v7331_v53 = vld [vmem:[#allocation2 + $0x78] sm:$0xff] }
0x22ca   :  { %9087 = vpow2.f32 %v6641_v49 }
0x22cb   :  { %v6643_v6 = vmul.f32 1.442695, %v6630_v55  ;;  %v6645_v7 = vmul.f32 1.442695, %v6631_v56  ;;  %v7330_v55 = vld [vmem:[#allocation2 + $0x70] sm:$0xff]  ;;  %v7329_v56 = vld [vmem:[#allocation2 + $0x68] sm:$0xff] }
0x22cc   :  { %v6624_v58 = vpop.xlane.xlu0 %6623  ;;  %v6690_v59 = vpop.permute.xlu1 %6689 }
0x22cd   :  { %9089 = vpow2.f32 %v6643_v6  ;;  %v6632_v61 = vsub.f32 %v6598_v18, %v6624_v58  ;;  %8837 = vmatpush3.msra.mxu1 %v6690_v59  ;;  %v7328_v6 = vld [vmem:[#allocation2 + $0x60] sm:$0xff] }
0x22ce   :  { %9091 = vpow2.f32 %v6645_v7  ;;  %8846 = vmatprep.subr.mxu1 %v9171_v15 }
0x22cf   :  { %v6647_v47 = vmul.f32 1.442695, %v6632_v61 }
0x22d0   :  { %v6766_v63 = vpop.permute.xlu0 %6765  ;;  %v6842_v9 = vpop.permute.xlu1 %6841 }
0x22d1   :  { %9093 = vpow2.f32 %v6647_v47  ;;  %8842 = vmatpush3.msra.mxu0 %v6766_v63 }
0x22d2   :  { %v9084_v24 = vpop.eup %9083  ;;  %8851 = vmatprep.subr.mxu0 %v9171_v15 }
0x22d3   :  { %v6655_v25 = vsel %vm271_vm5, %v9084_v24, 0.0 }
0x22d4   :  { %6656 = vadd.xlane.f32.xlu1 %v6655_v25  ;;  %v6918_v10 = vpop.permute.xlu1 %6917  ;;  %v6994_v11 = vpop.permute.xlu0 %6993 }
0x22d6   :  { %v9086_v1 = vpop.eup %9085 }
0x22d7   :  { %v9088_v2 = vpop.eup %9087  ;;  %v6658_v0 = vsel %vm271_vm5, %v9086_v1, 0.0 }
0x22d8   :  { %6659 = vadd.xlane.f32.xlu0 %v6658_v0  ;;  %v6661_v3 = vsel %vm271_vm5, %v9088_v2, 0.0  ;;  %v7070_v54 = vpop.permute.xlu1 %7069 }
0x22d9   :  { %6662 = vadd.xlane.f32.xlu1 %v6661_v3 }
0x22da   :  { %v9090_v4 = vpop.eup %9089 }
0x22db   :  { %v10342_v5 = vpop.eup %9091  ;;  %v6664_v8 = vsel %vm271_vm5, %v9090_v4, 0.0 }
0x22dc   :  { %6665 = vadd.xlane.f32.xlu0 %v6664_v8  ;;  %v6667_v51 = vsel %vm271_vm5, %v10342_v5, 0.0 }
0x22dd   :  { %6668 = vadd.xlane.f32.xlu1 %v6667_v51 }
0x22de   :  { %v10347_v60 = vpop.eup %9093 }
0x22df   :  { %v6670_v50 = vsel %vm271_vm5, %v10347_v60, 0.0 }
0x22e0   :  { %6671 = vadd.xlane.f32.xlu0 %v6670_v50 }
0x22ee   :  { %7221 = vrot.lane.b32.xlu1 %v10255_v43, %s9178_s1 }
0x22f6   :  { %7145 = vrot.lane.b32.xlu0 %v10237_v36, %s9178_s1 }
0x2305   :  { %v6654_v14 = vpop.xlane.xlu0 %6653 }
0x2306   :  { %9095 = vrcp.f32 %v6654_v14 }
0x2309   :  { %v6651_v16 = vpop.xlane.xlu1 %6650 }
0x230a   :  { %9097 = vrcp.f32 %v6651_v16  ;;  %v8075_v16 = vld [vmem:[%s10509_s6 + $0x8a] ss:$0 sm:$0xff] }
0x2313   :  { %v9096_v17 = vpop.eup %9095 }
0x2314   :  { %v6676_v40 = vmul.f32 %v9096_v17, %v10329_v29 }
0x2316   :  { %8844 = vmatmul.mubr.msk.f32.vlgmr.msra.gmra.mxu0 %vm271_vm5, %v6676_v40 }
0x2317   :  { %v9098_v45 = vpop.eup %9097  ;;  %8852 = vmatpush3.msra.mxu0 %v6918_v10  ;;  %8853 = vmatprep.mubr.msk.f32.mxu0 %vm9174_vm4, %v9171_v15 }
0x2318   :  { %v6674_v36 = vmul.f32 %v9098_v45, %v10333_v33  ;;  %8861 = vmatprep.subr.mxu0 %v9171_v15 }
0x231a   :  { %8839 = vmatmul.mubr.msk.f32.vlgmr.msra.gmra.mxu1 %vm271_vm5, %v6674_v36 }
0x231b   :  { %8847 = vmatpush3.msra.mxu1 %v6842_v9  ;;  %8848 = vmatprep.mubr.msk.f32.mxu1 %vm9174_vm4, %v9171_v15 }
0x231c   :  { %8856 = vmatprep.subr.mxu1 %v9171_v15 }
0x235d   :  { %v6657_v43 = vpop.xlane.xlu1 %6656 }
0x235e   :  { %9099 = vrcp.f32 %v6657_v43 }
0x2361   :  { %v6660_v18 = vpop.xlane.xlu0 %6659 }
0x2362   :  { %9101 = vrcp.f32 %v6660_v18  ;;  %v6663_v19 = vpop.xlane.xlu1 %6662 }
0x2363   :  { %9103 = vrcp.f32 %v6663_v19 }
0x2365   :  { %v6666_v20 = vpop.xlane.xlu0 %6665 }
0x2366   :  { %9105 = vrcp.f32 %v6666_v20  ;;  %v6669_v37 = vpop.xlane.xlu1 %6668 }
0x2367   :  { %9107 = vrcp.f32 %v6669_v37 }
0x2369   :  { %v6672_v41 = vpop.xlane.xlu0 %6671 }
0x236a   :  { %9109 = vrcp.f32 %v6672_v41  ;;  %v7222_v13 = vpop.permute.xlu1 %7221 }
0x236b   :  { %v9100_v21 = vpop.eup %9099 }
0x236c   :  { %v6678_v22 = vmul.f32 %v9100_v21, %v9084_v24 }
0x236d   :  { %v7146_v34 = vpop.permute.xlu0 %7145 }
0x236e   :  { %8849 = vmatmul.mubr.msk.f32.vlgmr.msra.gmra.mxu1 %vm271_vm5, %v6678_v22 }
0x236f   :  { %v9102_v23 = vpop.eup %9101  ;;  %8857 = vmatpush3.msra.mxu1 %v6994_v11  ;;  %8858 = vmatprep.mubr.msk.f32.mxu1 %vm9174_vm4, %v9171_v15 }
0x2370   :  { %v9104_v28 = vpop.eup %9103  ;;  %8866 = vmatprep.subr.mxu1 %v9171_v15  ;;  %v6680_v29 = vmul.f32 %v9102_v23, %v9086_v1 }
0x2371   :  { %v6682_v31 = vmul.f32 %v9104_v28, %v9088_v2 }
0x2372   :  { %8854 = vmatmul.mubr.msk.f32.vlgmr.msra.gmra.mxu0 %vm271_vm5, %v6680_v29 }
0x2373   :  { %v9106_v33 = vpop.eup %9105  ;;  %8859 = vmatmul.mubr.msk.f32.vlgmr.msra.gmra.mxu1 %vm271_vm5, %v6682_v31  ;;  %8862 = vmatpush3.msra.mxu0 %v7070_v54 }
0x2374   :  { %v9108_v30 = vpop.eup %9107  ;;  %8867 = vmatpush3.msra.mxu1 %v7146_v34  ;;  %8863 = vmatprep.mubr.msk.f32.mxu0 %vm9174_vm4, %v9171_v15  ;;  %v6684_v35 = vmul.f32 %v9106_v33, %v9090_v4  ;;  %v7463_v34 = vld [vmem:[#allocation4 + $0x70] sm:$0xff] }
0x2375   :  { %8868 = vmatprep.mubr.msk.f32.mxu1 %vm9174_vm4, %v9171_v15  ;;  %8871 = vmatprep.subr.mxu0 %v9171_v15  ;;  %v6686_v39 = vmul.f32 %v9108_v30, %v10342_v5  ;;  %v7462_v30 = vld [vmem:[#allocation4 + $0x68] sm:$0xff] }
0x2376   :  { %8864 = vmatmul.mubr.msk.f32.vlgmr.msra.gmra.mxu0 %vm271_vm5, %v6684_v35  ;;  %8876 = vmatprep.subr.mxu1 %v7331_v53  ;;  %v7461_v35 = vld [vmem:[#allocation4 + $0x60] sm:$0xff] }
0x2377   :  { %v9110_v42 = vpop.eup %9109  ;;  %8869 = vmatmul.mubr.msk.f32.vlgmr.msra.gmra.mxu1 %vm271_vm5, %v6686_v39  ;;  %8872 = vmatpush3.msra.mxu0 %v7222_v13  ;;  %v8090_v39 = vld [vmem:[%s10508_s5 + $0xf8] sm:$0xff]  ;;  %v8089_v13 = vld [vmem:[%s10508_s5 + $0xf0] sm:$0xff] }
0x2378   :  { %8873 = vmatprep.mubr.msk.f32.mxu0 %vm9174_vm4, %v9171_v15  ;;  %v6688_v12 = vmul.f32 %v9110_v42, %v10347_v60  ;;  %8877 = vmatpush3.msra.mxu1 %v7331_v53  ;;  %v8088_v42 = vld [vmem:[%s10508_s5 + $0xe8] sm:$0xff]  ;;  %vm7840_vm4 = vcmask 801792  }
0x2379   :  { %8878 = vmatprep.subr.mxu1 %v7330_v55 }
0x237a   :  { %8874 = vmatmul.mubr.msk.f32.vlgmr.msra.gmra.mxu0 %vm271_vm5, %v6688_v12  ;;  %8879 = vmatpush3.msra.mxu1 %v7330_v55  ;;  %v8087_v12 = vld [vmem:[%s10508_s5 + $0xe0] sm:$0xff] }
0x237b   :  { %8880 = vmatprep.subr.mxu1 %v7329_v56 }
0x237c   :  { %8881 = vmatpush3.msra.mxu1 %v7329_v56 }
0x237d   :  { %8882 = vmatprep.subr.mxu1 %v7328_v6 }
0x237e   :  { %8883 = vmatpush3.msra.mxu1 %v7328_v6  ;;  %v8078_v6 = vld [vmem:[%s10509_s6 + $0x8c] ss:$0 sm:$0xff] }
0x237f   :  { %8898 = vmatprep.subr.mxu1 %v8090_v39 }
0x23d6   :  { %v6837_v44 = vpop.f32.mrf.mxu0 }
0x23d8   :  { %v8845_v48 = vpop.f32.mrf.mxu0 }
0x23da   :  { %v6761_v49 = vpop.f32.mrf.mxu1 }
0x23dc   :  { %v8840_v52 = vpop.f32.mrf.mxu1 }
0x242e   :  { %v6913_v7 = vpop.f32.mrf.mxu1 }
0x242f   :  { %7299 = vrot.lane.b32.xlu0 %v6913_v7, %s9169_s28 }
0x2430   :  { %v8850_v15 = vpop.f32.mrf.mxu1 }
0x2431   :  { %v8079_v15 = vld [vmem:[%s10509_s6 + $0x8d] ss:$0 sm:$0xff] }
0x2432   :  { %v6989_v58 = vpop.f32.mrf.mxu0 }
0x2433   :  { %v7065_v59 = vpop.f32.mrf.mxu1  ;;  %7301 = vrot.lane.b32.xlu1 %v6989_v58, %s9169_s28 }
0x2434   :  { %7307 = vrot.lane.b32.xlu0 %v7065_v59, %s9179_s13  ;;  %v8855_v61 = vpop.f32.mrf.mxu0 }
0x2435   :  { %v8860_v47 = vpop.f32.mrf.mxu1 }
0x2436   :  { %v7141_v63 = vpop.f32.mrf.mxu0 }
0x2437   :  { %v7217_v24 = vpop.f32.mrf.mxu1  ;;  %7309 = vrot.lane.b32.xlu1 %v7141_v63, %s9179_s13 }
0x2438   :  { %7315 = vrot.lane.b32.xlu0 %v7217_v24, %s9180_s14  ;;  %v8865_v25 = vpop.f32.mrf.mxu0 }
0x2439   :  { %v8870_v1 = vpop.f32.mrf.mxu1  ;;  %v8086_v25 = vld [vmem:[%s10508_s5 + $0xd8] sm:$0xff] }
0x243a   :  { %v7293_v2 = vpop.f32.mrf.mxu0  ;;  %v8085_v1 = vld [vmem:[%s10508_s5 + $0xd0] sm:$0xff] }
0x243b   :  { %7317 = vrot.lane.b32.xlu1 %v7293_v2, %s9180_s14  ;;  %v8084_v2 = vld [vmem:[%s10508_s5 + $0xc8] sm:$0xff] }
0x243c   :  { %v8875_v0 = vpop.f32.mrf.mxu0 }
0x243d   :  { %v8083_v0 = vld [vmem:[%s10508_s5 + $0xc0] sm:$0xff] }
0x24a1   :  { %v7300_v3 = vpop.permute.xlu0 %7299 }
0x24a2   :  { %v7321_v8 = vsel %vm271_vm5, %v6761_v49, %v7300_v3  ;;  %v8080_v3 = vld [vmem:[%s10509_s6 + $0x77] ss:$0 sm:$0xff] }
0x24a5   :  { %v7302_v4 = vpop.permute.xlu1 %7301 }
0x24a6   :  { %v7308_v5 = vpop.permute.xlu0 %7307  ;;  %v7322_v10 = vsel %vm271_vm5, %v6837_v44, %v7302_v4  ;;  %vm7842_vm5 = vcmask 818176  }
0x24a7   :  { %v7323_v60 = vsel %vm58_vm0, %v7321_v8, %v7308_v5 }
0x24a9   :  { %v7310_v51 = vpop.permute.xlu1 %7309 }
0x24aa   :  { %v7316_v50 = vpop.permute.xlu0 %7315  ;;  %v7324_v11 = vsel %vm58_vm0, %v7322_v10, %v7310_v51 }
0x24ab   :  { %v7325_v9 = vsel %vm1602_vm8, %v7323_v60, %v7316_v50 }
0x24ac   :  { %8884 = vmatprep.mubr.msk.f32.mxu1 %vm146_vm3, %v7325_v9  ;;  %v8091_v9 = vld [vmem:[%s10509_s6 + $0x8b] ss:$0 sm:$0xff] }
0x24ad   :  { %v7318_v54 = vpop.permute.xlu1 %7317 }
0x24ae   :  { %v7326_v14 = vsel %vm1602_vm8, %v7324_v11, %v7318_v54 }
0x24af   :  { %8885 = vmatmul.mubr.msk.f32.vlgmr.msra.gmra.mxu1 %vm146_vm3, %v7326_v14 }
0x24b0   :  { %8899 = vmatpush3.msra.mxu1 %v8090_v39 }
0x24b1   :  { %8900 = vmatprep.subr.mxu1 %v8089_v13 }
0x24b2   :  { %8901 = vmatpush3.msra.mxu1 %v8089_v13 }
0x24b3   :  { %8902 = vmatprep.subr.mxu1 %v8088_v42 }
0x24b4   :  { %8903 = vmatpush3.msra.mxu1 %v8088_v42  ;;  %v8094_v42 = vld [vmem:[%s10509_s6 + $0x8e] ss:$0 sm:$0xff] }
0x24b5   :  { %8904 = vmatprep.subr.mxu1 %v8087_v12 }
0x24b6   :  { %8905 = vmatpush3.msra.mxu1 %v8087_v12 }
0x24b7   :  { %8906 = vmatprep.subr.mxu1 %v8086_v25 }
0x24b8   :  { %8907 = vmatpush3.msra.mxu1 %v8086_v25 }
0x24b9   :  { %8908 = vmatprep.subr.mxu1 %v8085_v1 }
0x24ba   :  { %8909 = vmatpush3.msra.mxu1 %v8085_v1 }
0x24bb   :  { %8910 = vmatprep.subr.mxu1 %v8084_v2 }
0x24bc   :  { %8911 = vmatpush3.msra.mxu1 %v8084_v2 }
0x24bd   :  { %8912 = vmatprep.subr.mxu1 %v8083_v0 }
0x24be   :  { %8913 = vmatpush3.msra.mxu1 %v8083_v0 }
0x256f   :  { %v8886_v17 = vpop.f32.mrf.mxu1 }
0x2570   :  { %v7415_v40 = vadd.f32 %v8886_v17, %v8075_v16 }
0x2571   :  { %v7409_v45 = vpop.f32.mrf.mxu1 }
0x2572   :  { %v7419_v36 = vadd.f32 %v7415_v40, %v10198_v27  ;;  %v7410_v43 = vadd.f32 %v8075_v16, %v7409_v45 }
0x2574   :  { %v7418_v18 = vadd.f32 %v7410_v43, %v10196_v26  ;;  %v7425_v19 = vsel %vm146_vm3, %v7419_v36, 0.0  ;;  %v7464_v26 = vld [vmem:[#allocation4 + $0x78] sm:$0xff] }
0x2575   :  { %7426 = vadd.xlane.f32.xlu1 %v7425_v19  ;;  %8887 = vmatprep.subr.mxu0 %v7464_v26 }
0x2576   :  { %v7422_v20 = vsel %vm146_vm3, %v7418_v18, 0.0  ;;  %8888 = vmatpush3.msra.mxu0 %v7464_v26 }
0x2577   :  { %7423 = vadd.xlane.f32.xlu0 %v7422_v20  ;;  %8889 = vmatprep.subr.mxu0 %v7463_v34 }
0x2578   :  { %8890 = vmatpush3.msra.mxu0 %v7463_v34 }
0x2579   :  { %8891 = vmatprep.subr.mxu0 %v7462_v30 }
0x257a   :  { %8892 = vmatpush3.msra.mxu0 %v7462_v30 }
0x257b   :  { %8893 = vmatprep.subr.mxu0 %v7461_v35 }
0x257c   :  { %8894 = vmatpush3.msra.mxu0 %v7461_v35 }
0x25fe   :  { %v7427_v37 = vpop.xlane.xlu1 %7426 }
0x25ff   :  { %v7429_v41 = vmul.f32 0.03125, %v7427_v37 }
0x2600   :  { %v7424_v21 = vpop.xlane.xlu0 %7423 }
0x2601   :  { %v7428_v22 = vmul.f32 0.03125, %v7424_v21  ;;  %v7431_v23 = vsub.f32 %v7419_v36, %v7429_v41 }
0x2603   :  { %v7430_v28 = vsub.f32 %v7418_v18, %v7428_v22  ;;  %v7433_v33 = vmul.f32 %v7431_v23, %v7431_v23 }
0x2605   :  { %v7432_v29 = vmul.f32 %v7430_v28, %v7430_v28  ;;  %v7437_v27 = vsel %vm146_vm3, %v7433_v33, 0.0  ;;  %v7690_v33 = vld [vmem:[%s10509_s6 + $0x30] sm:$0xff] }
0x2607   :  { %v7434_v31 = vsel %vm146_vm3, %v7432_v29, 0.0  ;;  %v7692_v29 = vld [vmem:[%s10509_s6 + $0x40] sm:$0xff] }
0x2608   :  { %7435 = vadd.xlane.f32.xlu0 %v7434_v31  ;;  %v7691_v31 = vld [vmem:[%s10509_s6 + $0x38] sm:$0xff] }
0x260c   :  { %7438 = vadd.xlane.f32.xlu0 %v7437_v27 }
0x2691   :  { %v7436_v44 = vpop.xlane.xlu0 %7435 }
0x2692   :  { %v7440_v48 = vmul.f32 0.03125, %v7436_v44 }
0x2694   :  { %v7442_v49 = vadd.f32 1e-05, %v7440_v48 }
0x2695   :  { %v7439_v52 = vpop.xlane.xlu0 %7438 }
0x2696   :  { %9111 = vrsqrt.f32 %v7442_v49  ;;  %v7441_v53 = vmul.f32 0.03125, %v7439_v52  ;;  %v8095_v52 = vld [vmem:[%s10509_s6 + $0x8f] ss:$0 sm:$0xff] }
0x2698   :  { %v7443_v55 = vadd.f32 1e-05, %v7441_v53 }
0x269a   :  { %9113 = vrsqrt.f32 %v7443_v55 }
0x26a3   :  { %v9112_v56 = vpop.eup %9111 }
0x26a4   :  { %v7446_v7 = vmul.f32 %v9112_v56, %v7430_v28  ;;  %v7693_v28 = vld [vmem:[%s10509_s6 + $0x48] sm:$0xff] }
0x26a5   :  { %8917 = vmatprep.subr.mxu0 %v7693_v28 }
0x26a6   :  { %v7452_v58 = vmul.f32 %v8078_v6, %v7446_v7 }
0x26a7   :  { %v9114_v59 = vpop.eup %9113 }
0x26a8   :  { %v7447_v61 = vmul.f32 %v9114_v59, %v7431_v23  ;;  %v7458_v47 = vadd.f32 %v8079_v15, %v7452_v58  ;;  %v7990_v59 = vld [vmem:[%s10509_s6 + $0x93] ss:$0 sm:$0xff] }
0x26aa   :  { %v7453_v63 = vmul.f32 %v8078_v6, %v7447_v61  ;;  %8895 = vmatprep.mubr.msk.f32.mxu0 %vm146_vm3, %v7458_v47  ;;  %v4060_v61 = vadd.f32 %v7990_v59, %v9931_v62 }
0x26ac   :  { %v7459_v24 = vadd.f32 %v8079_v15, %v7453_v63 }
0x26ae   :  { %8896 = vmatmul.mubr.msk.f32.vlgmr.msra.gmra.mxu0 %vm146_vm3, %v7459_v24 }
0x26af   :  { %8918 = vmatpush3.msra.mxu0 %v7693_v28 }
0x26b0   :  { %8919 = vmatprep.subr.mxu0 %v7692_v29 }
0x26b1   :  { %8920 = vmatpush3.msra.mxu0 %v7692_v29 }
0x26b2   :  { %8921 = vmatprep.subr.mxu0 %v7691_v31 }
0x26b3   :  { %8922 = vmatpush3.msra.mxu0 %v7691_v31  ;;  %v8099_v31 = vld [vmem:[%s10509_s6 + $0x9d] ss:$0 sm:$0xff] }
0x26b4   :  { %8923 = vmatprep.subr.mxu0 %v7690_v33 }
0x26b5   :  { %8924 = vmatpush3.msra.mxu0 %v7690_v33 }
0x276e   :  { %v8897_v4 = vpop.f32.mrf.mxu0 }
0x276f   :  { %v7548_v5 = vadd.f32 %v8897_v4, %v8080_v3  ;;  %v9183_v4 = vmov 1966171168  }
0x2770   :  { %v7542_v8 = vpop.f32.mrf.mxu0 }
0x2771   :  { %v7543_v51 = vadd.f32 %v8080_v3, %v7542_v8  ;;  %v7552_v50 = vmax.f32 %v7548_v5, 0.0  ;;  %v7846_v5 = vunpack.c.l.s4 %v9183_v4 }
0x2773   :  { %v7551_v60 = vmax.f32 %v7543_v51, 0.0  ;;  %v7847_v51 = vunpack.c.0.s8 %v7846_v5 }
0x2775   :  { %8914 = vmatprep.mubr.msk.f32.mxu1 %vm1843_vm9, %v7551_v60 }
0x2776   :  { %8915 = vmatmul.mubr.msk.f32.vlgmr.msra.gmra.mxu1 %vm1843_vm9, %v7552_v50 }
0x2836   :  { %v8916_v10 = vpop.f32.mrf.mxu1 }
0x2837   :  { %v7645_v11 = vadd.f32 %v8916_v10, %v8091_v9 }
0x2838   :  { %v7639_v54 = vpop.f32.mrf.mxu1 }
0x2839   :  { %v7649_v14 = vadd.f32 %v7645_v11, %v7459_v24  ;;  %v7640_v16 = vadd.f32 %v8091_v9, %v7639_v54  ;;  %v7850_v11 = vsub.s32 %v7847_v51, %v9809_v38 }
0x283b   :  { %v7648_v17 = vadd.f32 %v7640_v16, %v7458_v47  ;;  %v7655_v40 = vsel %vm146_vm3, %v7649_v14, 0.0  ;;  %v7832_v47 = vrot.slane %v4060_v61, 2 }
0x283c   :  { %7656 = vadd.xlane.f32.xlu0 %v7655_v40 }
0x283d   :  { %v7652_v45 = vsel %vm146_vm3, %v7648_v17, 0.0 }
0x283e   :  { %7653 = vadd.xlane.f32.xlu1 %v7652_v45 }
0x28c5   :  { %v7657_v36 = vpop.xlane.xlu0 %7656 }
0x28c6   :  { %v7659_v43 = vmul.f32 0.03125, %v7657_v36 }
0x28c7   :  { %v7654_v18 = vpop.xlane.xlu1 %7653 }
0x28c8   :  { %v7661_v19 = vsub.f32 %v7649_v14, %v7659_v43  ;;  %v7658_v20 = vmul.f32 0.03125, %v7654_v18 }
0x28ca   :  { %v7660_v37 = vsub.f32 %v7648_v17, %v7658_v20  ;;  %v7663_v41 = vmul.f32 %v7661_v19, %v7661_v19 }
0x28cc   :  { %v7667_v21 = vsel %vm146_vm3, %v7663_v41, 0.0  ;;  %v7662_v22 = vmul.f32 %v7660_v37, %v7660_v37 }
0x28cd   :  { %7668 = vadd.xlane.f32.xlu0 %v7667_v21 }
0x28ce   :  { %v7664_v23 = vsel %vm146_vm3, %v7662_v22, 0.0 }
0x28cf   :  { %7665 = vadd.xlane.f32.xlu1 %v7664_v23  ;;  %v8098_v23 = vld [vmem:[%s10509_s6 + $0x9c] ss:$0 sm:$0xff] }
0x2956   :  { %v7669_v27 = vpop.xlane.xlu0 %7668 }
0x2957   :  { %v7671_v26 = vmul.f32 0.03125, %v7669_v27 }
0x2958   :  { %v7666_v34 = vpop.xlane.xlu1 %7665 }
0x2959   :  { %v7673_v30 = vadd.f32 1e-05, %v7671_v26  ;;  %v7670_v35 = vmul.f32 0.03125, %v7666_v34 }
0x295b   :  { %9115 = vrsqrt.f32 %v7673_v30  ;;  %v7672_v39 = vadd.f32 1e-05, %v7670_v35 }
0x295d   :  { %9117 = vrsqrt.f32 %v7672_v39 }
0x2968   :  { %v9116_v13 = vpop.eup %9115 }
0x2969   :  { %v7677_v12 = vmul.f32 %v9116_v13, %v7661_v19 }
0x296a   :  { %v9118_v44 = vpop.eup %9117 }
0x296b   :  { %v7676_v48 = vmul.f32 %v9118_v44, %v7660_v37  ;;  %v7683_v49 = vmul.f32 %v8094_v42, %v7677_v12 }
0x296d   :  { %v7682_v53 = vmul.f32 %v8094_v42, %v7676_v48  ;;  %v7689_v56 = vadd.f32 %v8095_v52, %v7683_v49 }
0x296f   :  { %v7688_v55 = vadd.f32 %v8095_v52, %v7682_v53 }
0x2971   :  { %8925 = vmatprep.mubr.msk.f32.mxu0 %vm146_vm3, %v7688_v55 }
0x2972   :  { %8926 = vmatmul.mubr.msk.f32.vlgmr.msra.gmra.mxu0 %vm146_vm3, %v7689_v56 }
0x2a32   :  { %v8927_v6 = vpop.f32.mrf.mxu0 }
0x2a33   :  { %v7780_v7 = vsel %vm58_vm0, %v8927_v6, 0.0 }
0x2a34   :  { %7781 = vadd.xlane.f32.xlu0 %v7780_v7  ;;  %v7766_v15 = vpop.f32.mrf.mxu0 }
0x2a35   :  { %v7777_v58 = vsel %vm58_vm0, %v7766_v15, 0.0 }
0x2a36   :  { %7778 = vadd.xlane.f32.xlu1 %v7777_v58 }
0x2a47   :  { %7818 = vrot.lane.b32.xlu1 %v9908_v46, %s9182_s15 }
0x2a4a   :  { %7825 = vrot.lane.b32.xlu0 %v9914_v57, %s9178_s1 }
0x2a4b   :  { %7829 = vrot.lane.b32.xlu1 %v4060_v61, %s9176_s9 }
0x2a4f   :  { %7833 = vrot.lane.b32.xlu1 %v7832_v47, %s9176_s9 }
0x2abd   :  { %v7782_v63 = vpop.xlane.xlu0 %7781 }
0x2abe   :  { %v7785_v24 = vmul.f32 0.0625, %v7782_v63 }
0x2abf   :  { %v7779_v25 = vpop.xlane.xlu1 %7778 }
0x2ac0   :  { %v7787_v1 = vsub.f32 %v8927_v6, %v7785_v24  ;;  %v7784_v2 = vmul.f32 0.0625, %v7779_v25 }
0x2ac1   :  { %v7826_v9 = vpop.permute.xlu0 %7825 }
0x2ac2   :  { %v7786_v0 = vsub.f32 %v7766_v15, %v7784_v2  ;;  %v7789_v3 = vmul.f32 %v7787_v1, %v7787_v1 }
0x2ac3   :  { %v7819_v46 = vpop.permute.xlu1 %7818 }
0x2ac4   :  { %v7793_v62 = vsel %vm58_vm0, %v7789_v3, 0.0  ;;  %v7788_v8 = vmul.f32 %v7786_v0, %v7786_v0  ;;  %v7836_v60 = vsel %vm146_vm3, %v9901_v32, %v7819_v46 }
0x2ac5   :  { %7794 = vadd.xlane.f32.xlu1 %v7793_v62  ;;  %v7837_v10 = vsel %vm1843_vm9, %v7836_v60, %v7826_v9 }
0x2ac6   :  { %v7790_v57 = vsel %vm58_vm0, %v7788_v8, 0.0 }
0x2ac7   :  { %7791 = vadd.xlane.f32.xlu0 %v7790_v57  ;;  %v7830_v50 = vpop.permute.xlu1 %7829 }
0x2ac8   :  { %v7839_v54 = vsel %vm7838_vm2, %v7837_v10, %v7830_v50 }
0x2acb   :  { %v7834_v14 = vpop.permute.xlu1 %7833 }
0x2acc   :  { %v7841_v16 = vsel %vm7840_vm4, %v7839_v54, %v7834_v14 }
0x2acd   :  { %v7843_v17 = vsel %vm7842_vm5, %v7841_v16, 0.0 }
0x2ace   :  { %v7851_v40 = vrot.slane %v7843_v17, %v7850_v11 }
0x2ad0   :  { %v7852_v45 = vcombine.high %v7851_v40, %v7851_v40  ;;  %v7859_v32 = vrot.slane %v7851_v40, %v7850_v11 }
0x2ad2   :  { %v7866_v36 = vrot.slane %v7852_v45, %v7850_v11  ;;  %v7870_v18 = vsel %vm7869_vm6, %v7859_v32, 0.0 }
0x2ad4   :  { %v7871_v43 = vsel %vm7869_vm6, %v7866_v36, 0.0 }
0x2ad6   :  { %7876 = vrot.lane.b32.xlu1 %v7871_v43, %s9179_s13 }
0x2add   :  { %7874 = vrot.lane.b32.xlu0 %v7870_v18, %s9179_s13 }
0x2b4e   :  { %v7795_v19 = vpop.xlane.xlu1 %7794 }
0x2b4f   :  { %v7797_v20 = vmul.f32 0.0625, %v7795_v19 }
0x2b50   :  { %v7792_v37 = vpop.xlane.xlu0 %7791 }
0x2b51   :  { %v7799_v41 = vadd.f32 1e-05, %v7797_v20  ;;  %v7796_v38 = vmul.f32 0.0625, %v7792_v37 }
0x2b52   :  { %v7877_v30 = vpop.permute.xlu1 %7876 }
0x2b53   :  { %9119 = vrsqrt.f32 %v7799_v41  ;;  %v7798_v21 = vadd.f32 1e-05, %v7796_v38 }
0x2b54   :  { %v7875_v13 = vpop.permute.xlu0 %7874 }
0x2b55   :  { %9121 = vrsqrt.f32 %v7798_v21 }
0x2b60   :  { %v9120_v22 = vpop.eup %9119 }
0x2b61   :  { %v7803_v28 = vmul.f32 %v9120_v22, %v7787_v1 }
0x2b62   :  { %v9122_v29 = vpop.eup %9121 }
0x2b63   :  { %v7809_v33 = vmul.f32 %v8098_v23, %v7803_v28  ;;  %v7802_v27 = vmul.f32 %v9122_v29, %v7786_v0 }
0x2b65   :  { %v7815_v26 = vadd.f32 %v8099_v31, %v7809_v33  ;;  %v7808_v34 = vmul.f32 %v8098_v23, %v7802_v27 }
0x2b67   :  { %v7881_v35 = vsel %vm58_vm0, %v7815_v26, %v7877_v30  ;;  %v7814_v39 = vadd.f32 %v8099_v31, %v7808_v34 }
0x2b68   :  { %7883 = vst [vmem:[%s10510_s7 + $0x8] sm:$0xff] %v7881_v35 }
0x2b69   :  { %v7880_v42 = vsel %vm58_vm0, %v7814_v39, %v7875_v13 }
0x2b6a   :  { %7882 = vst [vmem:[%s10510_s7] sm:$0xff] %v7880_v42 }
0x2b6b   :  { %7888 = vsyncpa [#allocation3], 1 }
0x2b6c   :  { %7889 = vsyncpa [#allocation5], 1 }

</bundles_post_ra>
